<compile_context>
chip_gen: v5e
topology: v5e:2x2
jax: 0.10.0
libtpu: 0.0.40
codegen_flags: <defaults>
</compile_context>

<pallas_src>
import functools

import jax
import jax.numpy as jnp
from jax.experimental import pallas as pl
from jax.experimental.pallas import tpu as pltpu


# ---------------------------------------------------------------------------
# helpers
# ---------------------------------------------------------------------------
def _round_up(x, m):
    return (x + m - 1) // m * m


def _pick_tile(n, unit, target):
    """Largest divisor of n that is a multiple of `unit` and <= target (else n)."""
    best = None
    for t in range(unit, min(n, target) + 1, unit):
        if n % t == 0:
            best = t
    return best if best is not None else n


# ---------------------------------------------------------------------------
# Pallas kernel #1: row-tiled matmul + bias (token-major output).
# Used for the PositionalEmbedding Conv3d (im2col rows -> (B*S, d)).
# ---------------------------------------------------------------------------
def _matmul_bias_rows_kernel(a_ref, w_ref, b_ref, o_ref):
    o_ref[...] = (
        jnp.dot(a_ref[...], w_ref[...], preferred_element_type=jnp.float32)
        + b_ref[...]
    )


def _matmul_bias_rows(a, w, b, tm_target=512):
    M, K = a.shape
    N = w.shape[1]
    Mp = _round_up(M, 16)
    if Mp != M:
        a = jnp.pad(a, ((0, Mp - M), (0, 0)))
    tm = _pick_tile(Mp, 16, tm_target)

    out = pl.pallas_call(
        _matmul_bias_rows_kernel,
        out_shape=jax.ShapeDtypeStruct((Mp, N), jnp.float32),
        grid=(Mp // tm,),
        in_specs=[
            pl.BlockSpec((tm, K), lambda i: (i, 0)),
            pl.BlockSpec((K, N), lambda i: (0, 0)),   # weights stay VMEM-resident
            pl.BlockSpec((1, N), lambda i: (0, 0)),
        ],
        out_specs=pl.BlockSpec((tm, N), lambda i: (i, 0)),
        compiler_params=pltpu.CompilerParams(dimension_semantics=("parallel",)),
    )(a.astype(jnp.bfloat16), w.astype(jnp.bfloat16), b.astype(jnp.float32))
    return out[:M] if Mp != M else out


# ---------------------------------------------------------------------------
# Pallas kernel #2: column-tiled matmul + bias with channel-major output
# (Cout on sublanes, spatial positions on lanes).  Used for the final Conv3d,
# producing (B, Cout, S) directly -> lane-dense stores, no output transpose.
# ---------------------------------------------------------------------------
def _matmul_bias_cols_kernel(a_ref, w_ref, b_ref, o_ref):
    o_ref[0] = (
        jnp.dot(w_ref[...], a_ref[0], preferred_element_type=jnp.float32)
        + b_ref[...]
    )


def _matmul_bias_cols(a, w, b, ts_target=1024):
    B, F, S = a.shape
    Cout = w.shape[0]
    ts = _pick_tile(S, 128, ts_target)
    return pl.pallas_call(
        _matmul_bias_cols_kernel,
        out_shape=jax.ShapeDtypeStruct((B, Cout, S), jnp.float32),
        grid=(B, S // ts),
        in_specs=[
            pl.BlockSpec((1, F, ts), lambda i, j: (i, 0, j)),
            pl.BlockSpec((Cout, F), lambda i, j: (0, 0)),
            pl.BlockSpec((Cout, 1), lambda i, j: (0, 0)),
        ],
        out_specs=pl.BlockSpec((1, Cout, ts), lambda i, j: (i, 0, j)),
        compiler_params=pltpu.CompilerParams(
            dimension_semantics=("parallel", "parallel")),
    )(a.astype(jnp.bfloat16), w.astype(jnp.bfloat16), b.astype(jnp.float32))


# ---------------------------------------------------------------------------
# im2col builders (plain-JAX glue; 3x3x3, pad=1, stride=1)
# ---------------------------------------------------------------------------
def _im2col_token_major(x):
    """(B, C, D, H, W) -> (B*S, C*27); rows ordered (b, dz, hz, wz), columns
    ordered (c, kd, kh, kw) to match torch Conv3d weight flattening."""
    B, C, D, H, W = x.shape
    xt = jnp.transpose(x, (0, 2, 3, 4, 1))                    # channel-last (1x volume)
    xp = jnp.pad(xt, ((0, 0), (1, 1), (1, 1), (1, 1), (0, 0)))
    cols = [xp[:, kd:kd + D, kh:kh + H, kw:kw + W, :]
            for kd in range(3) for kh in range(3) for kw in range(3)]
    patches = jnp.stack(cols, axis=-1)                        # (B, D, H, W, C, 27)
    return patches.reshape(B * D * H * W, C * 27)


def _im2col_feature_major(x):
    """(B, C, D, H, W) -> (B, C*27, S) (feature-major, for lane-dense conv)."""
    B, C, D, H, W = x.shape
    xp = jnp.pad(x, ((0, 0), (0, 0), (1, 1), (1, 1), (1, 1)))
    cols = [xp[:, :, kd:kd + D, kh:kh + H, kw:kw + W]
            for kd in range(3) for kh in range(3) for kw in range(3)]
    patches = jnp.stack(cols, axis=2)                         # (B, C, 27, D, H, W)
    return patches.reshape(B, C * 27, D * H * W)


# ---------------------------------------------------------------------------
# Pallas kernel #3: transformer body
# ---------------------------------------------------------------------------
def _layer_norm(x, g, b, eps=1e-5):
    mu = jnp.mean(x, axis=-1, keepdims=True)
    var = jnp.mean((x - mu) ** 2, axis=-1, keepdims=True)
    return (x - mu) * jax.lax.rsqrt(var + eps) * g + b


def _transformer_body_kernel(n_heads, b_blk, seq,
                             x_ref, g_ref, be_ref,
                             wqkv_ref, bqkv_ref, wf_ref, bf_ref,
                             o_ref):
    d = x_ref.shape[-1]
    dh = d // n_heads
    scale = 1.0 / float(dh) ** 0.5

    x = x_ref[...]                       # (b_blk*seq, d) f32
    g = g_ref[...]
    be = be_ref[...]

    xn = _layer_norm(x, g, be)           # LayerNorm #1 (f32 statistics)

    # Fused Q|K|V projection: one MXU matmul instead of three (bf16 in, f32 acc).
    qkv = jnp.dot(xn.astype(jnp.bfloat16), wqkv_ref[...],
                  preferred_element_type=jnp.float32) + bqkv_ref[...]

    dn_qkT = (((1,), (1,)), ((), ()))    # contract last dims: q @ k^T without .T

    # TODO(synk): head batching via a single (n_heads, S, dh) einsum needs an
    # in-kernel lane-dim split reshape; kept as a static per-head unroll for
    # robust Mosaic lowering (n_heads is small).
    batch_rows = []
    for b in range(b_blk):               # static unroll: per-batch attention
        r0 = b * seq
        head_outs = []
        for h in range(n_heads):         # static unroll over heads
            c0 = h * dh
            qh = qkv[r0:r0 + seq, c0:c0 + dh].astype(jnp.bfloat16)
            kh = qkv[r0:r0 + seq, d + c0:d + c0 + dh].astype(jnp.bfloat16)
            vh = qkv[r0:r0 + seq, 2 * d + c0:2 * d + c0 + dh].astype(jnp.bfloat16)
            s = jax.lax.dot_general(qh, kh, dn_qkT,
                                    preferred_element_type=jnp.float32) * scale
            # Reference uses nn.Softmax(dim=2) on (B, H, Sq, Sk): normalize over
            # the *query* axis, i.e. axis 0 of this (Sq, Sk) matrix.
            m = jnp.max(s, axis=0, keepdims=True)
            p = jnp.exp(s - m)
            p = p * pl.reciprocal(jnp.sum(p, axis=0, keepdims=True), approx=True)
            head_outs.append(
                jnp.dot(p.astype(jnp.bfloat16), vh,
                        preferred_element_type=jnp.float32))       # (seq, dh)
        row = head_outs[0] if n_heads == 1 else jnp.concatenate(head_outs, axis=1)
        batch_rows.append(row)
    attn = batch_rows[0] if b_blk == 1 else jnp.concatenate(batch_rows, axis=0)

    xt = attn + xn                        # residual vs the layer-normed input
    x2 = _layer_norm(xt, g, be)           # LayerNorm #2 (same gamma/beta)
    ffn = jnp.dot(x2.astype(jnp.bfloat16), wf_ref[...],
                  preferred_element_type=jnp.float32) + bf_ref[...]
    o_ref[...] = jnp.maximum(ffn, 0.0) + xt


def _transformer_body(x2d, params, n_heads, batch, seq):
    d = x2d.shape[-1]
    g = params["ln_g"].reshape(1, d).astype(jnp.float32)
    be = params["ln_b"].reshape(1, d).astype(jnp.float32)
    # PyTorch Linear weights are (out, in): pre-transpose; fuse Q/K/V.
    wqkv = jnp.concatenate(
        [params["wq"].T, params["wk"].T, params["wv"].T], axis=1
    ).astype(jnp.bfloat16)                                         # (d, 3d)
    bqkv = jnp.concatenate(
        [params["bq"], params["bk"], params["bv"]]
    ).reshape(1, 3 * d).astype(jnp.float32)
    wf = params["wf"].T.astype(jnp.bfloat16)                       # (d, d)
    bf = params["bf"].reshape(1, d).astype(jnp.float32)

    # Process several batch elements per grid step (amortize per-step overhead).
    b_blk = min(batch, max(1, 4096 // seq))
    while batch % b_blk:
        b_blk -= 1
    if (b_blk * seq) % 8:
        b_blk = batch          # block must equal the full dim if not 8-aligned
    rows = b_blk * seq

    kernel = functools.partial(_transformer_body_kernel, n_heads, b_blk, seq)

    def const(shape):
        return pl.BlockSpec(shape, lambda i: (0, 0))

    return pl.pallas_call(
        kernel,
        out_shape=jax.ShapeDtypeStruct((batch * seq, d), jnp.float32),
        grid=(batch // b_blk,),
        in_specs=[
            pl.BlockSpec((rows, d), lambda i: (i, 0)),
            const((1, d)), const((1, d)),
            const((d, 3 * d)), const((1, 3 * d)),
            const((d, d)), const((1, d)),
        ],
        out_specs=pl.BlockSpec((rows, d), lambda i: (i, 0)),
        compiler_params=pltpu.CompilerParams(dimension_semantics=("parallel",)),
    )(x2d, g, be, wqkv, bqkv, wf, bf)


# ---------------------------------------------------------------------------
# Full forward pass
# ---------------------------------------------------------------------------
@functools.partial(jax.jit, static_argnames=("n_heads",))
def transformer_block_forward(x, params, n_heads):
    B, C, D, H, W = x.shape
    d = params["pe_w"].shape[0]          # = attention_layers * 4
    S = D * H * W

    # PositionalEmbedding: Conv3d -> token-major (B*S, d).
    # (The nn.Parameter(zeros) addition in the reference is an exact no-op.)
    a1 = _im2col_token_major(x)                               # (B*S, C*27)
    w1 = params["pe_w"].reshape(d, C * 27).T                  # (C*27, d)
    b1 = params["pe_b"].reshape(1, d)
    x_emb = _matmul_bias_rows(a1, w1, b1)                     # (B*S, d) f32

    # Transformer body (LN, fused QKV, attention, residuals, FFN+ReLU).
    y = _transformer_body(x_emb, params, n_heads, B, S)       # (B*S, d) f32

    # Final Conv3d in channel-major layout -> lane-dense output, no transpose after.
    y5 = y.reshape(B, S, d).transpose(0, 2, 1).reshape(B, d, D, H, W)
    a2 = _im2col_feature_major(y5)                            # (B, d*27, S)
    w2 = params["conv_w"].reshape(C, d * 27)                  # (Cout, d*27)
    b2 = params["conv_b"].reshape(C, 1)
    out = _matmul_bias_cols(a2, w2, b2)                       # (B, C, S)
    return out.reshape(B, C, D, H, W)


if __name__ == "__main__":
    key = jax.random.PRNGKey(0)
    B, C, Dp, Hp, Wp = 2, 4, 4, 4, 4        # attention_layers = C = 4
    n_heads = 2                             # config['transformer_n_heads']
    d = C * 4                               # = 16
    S = Dp * Hp * Wp                        # = 64

    ks = jax.random.split(key, 16)
    x = jax.random.normal(ks[0], (B, C, Dp, Hp, Wp), jnp.float32)

    params = {
        # PositionalEmbedding conv: Conv3d(C -> d, 3, padding=1)
        "pe_w": 0.05 * jax.random.normal(ks[1], (d, C, 3, 3, 3), jnp.float32),
        "pe_b": 0.05 * jax.random.normal(ks[2], (d,), jnp.float32),
        # LayerNorm(d)
        "ln_g": jnp.ones((d,), jnp.float32)
        + 0.01 * jax.random.normal(ks[3], (d,), jnp.float32),
        "ln_b": 0.01 * jax.random.normal(ks[4], (d,), jnp.float32),
        # query / key / value / ffn: Linear(d, d), PyTorch (out, in) layout
        "wq": 0.1 * jax.random.normal(ks[5], (d, d), jnp.float32),
        "bq": 0.05 * jax.random.normal(ks[6], (d,), jnp.float32),
        "wk": 0.1 * jax.random.normal(ks[7], (d, d), jnp.float32),
        "bk": 0.05 * jax.random.normal(ks[8], (d,), jnp.float32),
        "wv": 0.1 * jax.random.normal(ks[9], (d, d), jnp.float32),
        "bv": 0.05 * jax.random.normal(ks[10], (d,), jnp.float32),
        "wf": 0.1 * jax.random.normal(ks[11], (d, d), jnp.float32),
        "bf": 0.05 * jax.random.normal(ks[12], (d,), jnp.float32),
        # Final conv: Conv3d(d -> C, 3, padding=1)
        "conv_w": 0.05 * jax.random.normal(ks[13], (C, d, 3, 3, 3), jnp.float32),
        "conv_b": 0.05 * jax.random.normal(ks[14], (C,), jnp.float32),
    }

    out = transformer_block_forward(x, params, n_heads)
    jax.block_until_ready(out)
    assert out.shape == (B, C, Dp, Hp, Wp)
    print("KERNEL_OK")
</pallas_src>

<mosaic_0001>
module attributes {stable_mosaic.version = 11 : i64} {
  func.func @_matmul_bias_rows_kernel(%arg0: i32, %arg1: memref<128x108xbf16, #tpu.memory_space<vmem>>, %arg2: memref<108x16xbf16, #tpu.memory_space<vmem>>, %arg3: memref<1x16xf32, #tpu.memory_space<vmem>>, %arg4: memref<128x16xf32, #tpu.memory_space<vmem>>) attributes {dimension_semantics = [#tpu.dimension_semantics<parallel>], iteration_bounds = array<i64: 1>, scalar_prefetch = 0 : i64, scratch_operands = 0 : i64, tpu.core_type = #tpu.core_type<tc>, window_params = [{transform_indices = @transform_0, window_bounds = array<i64: 128, 108>}, {pipeline_mode = #tpu.pipeline_mode<synchronous>, transform_indices = @transform_1, window_bounds = array<i64: 108, 16>}, {pipeline_mode = #tpu.pipeline_mode<synchronous>, transform_indices = @transform_2, window_bounds = array<i64: 1, 16>}, {transform_indices = @transform_3, window_bounds = array<i64: 128, 16>}]} {
    %c0 = arith.constant 0 : index
    %c0_0 = arith.constant 0 : index
    %0 = vector.load %arg1[%c0, %c0_0] : memref<128x108xbf16, #tpu.memory_space<vmem>>, vector<128x108xbf16>
    %c0_1 = arith.constant 0 : index
    %c0_2 = arith.constant 0 : index
    %1 = vector.load %arg2[%c0_1, %c0_2] : memref<108x16xbf16, #tpu.memory_space<vmem>>, vector<108x16xbf16>
    %cst = arith.constant dense<0.000000e+00> : vector<128x16xf32>
    %2 = tpu.matmul %0, %1, %cst {dimension_numbers = #tpu.dot_dimension_numbers<[1], [0], [0], [1], [0, 0, 1, 1], [], []>} : vector<128x108xbf16>, vector<108x16xbf16>, vector<128x16xf32> -> vector<128x16xf32>
    %c0_3 = arith.constant 0 : index
    %c0_4 = arith.constant 0 : index
    %3 = vector.load %arg3[%c0_3, %c0_4] : memref<1x16xf32, #tpu.memory_space<vmem>>, vector<1x16xf32>
    %4 = vector.broadcast %3 : vector<1x16xf32> to vector<128x16xf32>
    %5 = arith.addf %2, %4 : vector<128x16xf32>
    %c0_5 = arith.constant 0 : index
    %c0_6 = arith.constant 0 : index
    %6 = vector.load %arg4[%c0_5, %c0_6] : memref<128x16xf32, #tpu.memory_space<vmem>>, vector<128x16xf32>
    tpu.vector_store %arg4[%c0_5, %c0_6], %5 {strides = array<i32>} : memref<128x16xf32, #tpu.memory_space<vmem>>, vector<128x16xf32>,
    return
  }
  func.func @transform_0(%arg0: i32) -> (i32, i32) {
    %c0_i32 = arith.constant 0 : i32
    %c0_i32_0 = arith.constant 0 : i32
    return %arg0, %c0_i32 : i32, i32
  }
  func.func @transform_1(%arg0: i32) -> (i32, i32) {
    %c0_i32 = arith.constant 0 : i32
    %c0_i32_0 = arith.constant 0 : i32
    %c0_i32_1 = arith.constant 0 : i32
    return %c0_i32, %c0_i32_0 : i32, i32
  }
  func.func @transform_2(%arg0: i32) -> (i32, i32) {
    %c0_i32 = arith.constant 0 : i32
    %c0_i32_0 = arith.constant 0 : i32
    %c0_i32_1 = arith.constant 0 : i32
    return %c0_i32, %c0_i32_0 : i32, i32
  }
  func.func @transform_3(%arg0: i32) -> (i32, i32) {
    %c0_i32 = arith.constant 0 : i32
    %c0_i32_0 = arith.constant 0 : i32
    return %arg0, %c0_i32 : i32, i32
  }
}

module attributes {stable_mosaic.version = 11 : i64} {
  func.func @_transformer_body_kernel(%arg0: i32, %arg1: memref<128x16xf32, #tpu.memory_space<vmem>>, %arg2: memref<1x16xf32, #tpu.memory_space<vmem>>, %arg3: memref<1x16xf32, #tpu.memory_space<vmem>>, %arg4: memref<16x48xbf16, #tpu.memory_space<vmem>>, %arg5: memref<1x48xf32, #tpu.memory_space<vmem>>, %arg6: memref<16x16xbf16, #tpu.memory_space<vmem>>, %arg7: memref<1x16xf32, #tpu.memory_space<vmem>>, %arg8: memref<128x16xf32, #tpu.memory_space<vmem>>) attributes {dimension_semantics = [#tpu.dimension_semantics<parallel>], iteration_bounds = array<i64: 1>, scalar_prefetch = 0 : i64, scratch_operands = 0 : i64, tpu.core_type = #tpu.core_type<tc>, window_params = [{transform_indices = @transform_0, window_bounds = array<i64: 128, 16>}, {pipeline_mode = #tpu.pipeline_mode<synchronous>, transform_indices = @transform_1, window_bounds = array<i64: 1, 16>}, {pipeline_mode = #tpu.pipeline_mode<synchronous>, transform_indices = @transform_2, window_bounds = array<i64: 1, 16>}, {pipeline_mode = #tpu.pipeline_mode<synchronous>, transform_indices = @transform_3, window_bounds = array<i64: 16, 48>}, {pipeline_mode = #tpu.pipeline_mode<synchronous>, transform_indices = @transform_4, window_bounds = array<i64: 1, 48>}, {pipeline_mode = #tpu.pipeline_mode<synchronous>, transform_indices = @transform_5, window_bounds = array<i64: 16, 16>}, {pipeline_mode = #tpu.pipeline_mode<synchronous>, transform_indices = @transform_6, window_bounds = array<i64: 1, 16>}, {transform_indices = @transform_7, window_bounds = array<i64: 128, 16>}]} {
    %c0 = arith.constant 0 : index
    %c0_0 = arith.constant 0 : index
    %0 = vector.load %arg1[%c0, %c0_0] : memref<128x16xf32, #tpu.memory_space<vmem>>, vector<128x16xf32>
    %c0_1 = arith.constant 0 : index
    %c0_2 = arith.constant 0 : index
    %1 = vector.load %arg2[%c0_1, %c0_2] : memref<1x16xf32, #tpu.memory_space<vmem>>, vector<1x16xf32>
    %c0_3 = arith.constant 0 : index
    %c0_4 = arith.constant 0 : index
    %2 = vector.load %arg3[%c0_3, %c0_4] : memref<1x16xf32, #tpu.memory_space<vmem>>, vector<1x16xf32>
    %cst = arith.constant dense<0.000000e+00> : vector<128xf32>
    %3 = vector.multi_reduction <add>, %0, %cst [1] : vector<128x16xf32> to vector<128xf32>
    %4 = vector.shape_cast %3 : vector<128xf32> to vector<128x1xf32>
    %cst_5 = arith.constant 1.600000e+01 : f32
    %5 = vector.broadcast %cst_5 : f32 to vector<128x1xf32>
    %6 = arith.divf %4, %5 : vector<128x1xf32>
    %7 = vector.broadcast %6 : vector<128x1xf32> to vector<128x16xf32>
    %8 = arith.subf %0, %7 : vector<128x16xf32>
    %9 = arith.mulf %8, %8 : vector<128x16xf32>
    %cst_6 = arith.constant dense<0.000000e+00> : vector<128xf32>
    %10 = vector.multi_reduction <add>, %9, %cst_6 [1] : vector<128x16xf32> to vector<128xf32>
    %11 = vector.shape_cast %10 : vector<128xf32> to vector<128x1xf32>
    %cst_7 = arith.constant 1.600000e+01 : f32
    %12 = vector.broadcast %cst_7 : f32 to vector<128x1xf32>
    %13 = arith.divf %11, %12 : vector<128x1xf32>
    %14 = vector.broadcast %6 : vector<128x1xf32> to vector<128x16xf32>
    %15 = arith.subf %0, %14 : vector<128x16xf32>
    %cst_8 = arith.constant 9.99999974E-6 : f32
    %16 = vector.broadcast %cst_8 : f32 to vector<128x1xf32>
    %17 = arith.addf %13, %16 : vector<128x1xf32>
    %18 = math.rsqrt %17 : vector<128x1xf32>
    %19 = vector.broadcast %18 : vector<128x1xf32> to vector<128x16xf32>
    %20 = arith.mulf %15, %19 : vector<128x16xf32>
    %21 = vector.broadcast %1 : vector<1x16xf32> to vector<128x16xf32>
    %22 = arith.mulf %20, %21 : vector<128x16xf32>
    %23 = vector.broadcast %2 : vector<1x16xf32> to vector<128x16xf32>
    %24 = arith.addf %22, %23 : vector<128x16xf32>
    %25 = arith.truncf %24 : vector<128x16xf32> to vector<128x16xbf16>
    %c0_9 = arith.constant 0 : index
    %c0_10 = arith.constant 0 : index
    %26 = vector.load %arg4[%c0_9, %c0_10] : memref<16x48xbf16, #tpu.memory_space<vmem>>, vector<16x48xbf16>
    %cst_11 = arith.constant dense<0.000000e+00> : vector<128x48xf32>
    %27 = tpu.matmul %25, %26, %cst_11 {dimension_numbers = #tpu.dot_dimension_numbers<[1], [0], [0], [1], [0, 0, 1, 1], [], []>} : vector<128x16xbf16>, vector<16x48xbf16>, vector<128x48xf32> -> vector<128x48xf32>
    %c0_12 = arith.constant 0 : index
    %c0_13 = arith.constant 0 : index
    %28 = vector.load %arg5[%c0_12, %c0_13] : memref<1x48xf32, #tpu.memory_space<vmem>>, vector<1x48xf32>
    %29 = vector.broadcast %28 : vector<1x48xf32> to vector<128x48xf32>
    %30 = arith.addf %27, %29 : vector<128x48xf32>
    %31 = vector.extract_strided_slice %30 {offsets = [0, 0], sizes = [64, 8], strides = [1, 1]} : vector<128x48xf32> to vector<64x8xf32>
    %32 = arith.truncf %31 : vector<64x8xf32> to vector<64x8xbf16>
    %33 = vector.extract_strided_slice %30 {offsets = [0, 16], sizes = [64, 8], strides = [1, 1]} : vector<128x48xf32> to vector<64x8xf32>
    %34 = arith.truncf %33 : vector<64x8xf32> to vector<64x8xbf16>
    %35 = vector.extract_strided_slice %30 {offsets = [0, 32], sizes = [64, 8], strides = [1, 1]} : vector<128x48xf32> to vector<64x8xf32>
    %36 = arith.truncf %35 : vector<64x8xf32> to vector<64x8xbf16>
    %cst_14 = arith.constant dense<0.000000e+00> : vector<64x64xf32>
    %37 = tpu.matmul %32, %34, %cst_14 {dimension_numbers = #tpu.dot_dimension_numbers<[1], [1], [0], [0], [0, 0, 1, 0], [], []>} : vector<64x8xbf16>, vector<64x8xbf16>, vector<64x64xf32> -> vector<64x64xf32>
    %cst_15 = arith.constant 0.353553385 : f32
    %38 = vector.broadcast %cst_15 : f32 to vector<64x64xf32>
    %39 = arith.mulf %37, %38 : vector<64x64xf32>
    %cst_16 = arith.constant dense<0xFF800000> : vector<64xf32>
    %40 = vector.multi_reduction <maximumf>, %39, %cst_16 [0] : vector<64x64xf32> to vector<64xf32>
    %41 = vector.shape_cast %40 : vector<64xf32> to vector<1x64xf32>
    %42 = vector.broadcast %41 : vector<1x64xf32> to vector<64x64xf32>
    %43 = arith.subf %39, %42 : vector<64x64xf32>
    %44 = math.exp %43 : vector<64x64xf32>
    %cst_17 = arith.constant dense<0.000000e+00> : vector<64xf32>
    %45 = vector.multi_reduction <add>, %44, %cst_17 [0] : vector<64x64xf32> to vector<64xf32>
    %46 = vector.shape_cast %45 : vector<64xf32> to vector<1x64xf32>
    %47 = tpu.reciprocal %46 {approx = true} : vector<1x64xf32> -> vector<1x64xf32>
    %48 = vector.broadcast %47 : vector<1x64xf32> to vector<64x64xf32>
    %49 = arith.mulf %44, %48 : vector<64x64xf32>
    %50 = arith.truncf %49 : vector<64x64xf32> to vector<64x64xbf16>
    %cst_18 = arith.constant dense<0.000000e+00> : vector<64x8xf32>
    %51 = tpu.matmul %50, %36, %cst_18 {dimension_numbers = #tpu.dot_dimension_numbers<[1], [0], [0], [1], [0, 0, 1, 1], [], []>} : vector<64x64xbf16>, vector<64x8xbf16>, vector<64x8xf32> -> vector<64x8xf32>
    %52 = vector.extract_strided_slice %30 {offsets = [0, 8], sizes = [64, 8], strides = [1, 1]} : vector<128x48xf32> to vector<64x8xf32>
    %53 = arith.truncf %52 : vector<64x8xf32> to vector<64x8xbf16>
    %54 = vector.extract_strided_slice %30 {offsets = [0, 24], sizes = [64, 8], strides = [1, 1]} : vector<128x48xf32> to vector<64x8xf32>
    %55 = arith.truncf %54 : vector<64x8xf32> to vector<64x8xbf16>
    %56 = vector.extract_strided_slice %30 {offsets = [0, 40], sizes = [64, 8], strides = [1, 1]} : vector<128x48xf32> to vector<64x8xf32>
    %57 = arith.truncf %56 : vector<64x8xf32> to vector<64x8xbf16>
    %cst_19 = arith.constant dense<0.000000e+00> : vector<64x64xf32>
    %58 = tpu.matmul %53, %55, %cst_19 {dimension_numbers = #tpu.dot_dimension_numbers<[1], [1], [0], [0], [0, 0, 1, 0], [], []>} : vector<64x8xbf16>, vector<64x8xbf16>, vector<64x64xf32> -> vector<64x64xf32>
    %cst_20 = arith.constant 0.353553385 : f32
    %59 = vector.broadcast %cst_20 : f32 to vector<64x64xf32>
    %60 = arith.mulf %58, %59 : vector<64x64xf32>
    %cst_21 = arith.constant dense<0xFF800000> : vector<64xf32>
    %61 = vector.multi_reduction <maximumf>, %60, %cst_21 [0] : vector<64x64xf32> to vector<64xf32>
    %62 = vector.shape_cast %61 : vector<64xf32> to vector<1x64xf32>
    %63 = vector.broadcast %62 : vector<1x64xf32> to vector<64x64xf32>
    %64 = arith.subf %60, %63 : vector<64x64xf32>
    %65 = math.exp %64 : vector<64x64xf32>
    %cst_22 = arith.constant dense<0.000000e+00> : vector<64xf32>
    %66 = vector.multi_reduction <add>, %65, %cst_22 [0] : vector<64x64xf32> to vector<64xf32>
    %67 = vector.shape_cast %66 : vector<64xf32> to vector<1x64xf32>
    %68 = tpu.reciprocal %67 {approx = true} : vector<1x64xf32> -> vector<1x64xf32>
    %69 = vector.broadcast %68 : vector<1x64xf32> to vector<64x64xf32>
    %70 = arith.mulf %65, %69 : vector<64x64xf32>
    %71 = arith.truncf %70 : vector<64x64xf32> to vector<64x64xbf16>
    %cst_23 = arith.constant dense<0.000000e+00> : vector<64x8xf32>
    %72 = tpu.matmul %71, %57, %cst_23 {dimension_numbers = #tpu.dot_dimension_numbers<[1], [0], [0], [1], [0, 0, 1, 1], [], []>} : vector<64x64xbf16>, vector<64x8xbf16>, vector<64x8xf32> -> vector<64x8xf32>
    %73 = tpu.concatenate %51, %72 in 1 : vector<64x8xf32>, vector<64x8xf32> -> vector<64x16xf32>
    %74 = vector.extract_strided_slice %30 {offsets = [64, 0], sizes = [64, 8], strides = [1, 1]} : vector<128x48xf32> to vector<64x8xf32>
    %75 = arith.truncf %74 : vector<64x8xf32> to vector<64x8xbf16>
    %76 = vector.extract_strided_slice %30 {offsets = [64, 16], sizes = [64, 8], strides = [1, 1]} : vector<128x48xf32> to vector<64x8xf32>
    %77 = arith.truncf %76 : vector<64x8xf32> to vector<64x8xbf16>
    %78 = vector.extract_strided_slice %30 {offsets = [64, 32], sizes = [64, 8], strides = [1, 1]} : vector<128x48xf32> to vector<64x8xf32>
    %79 = arith.truncf %78 : vector<64x8xf32> to vector<64x8xbf16>
    %cst_24 = arith.constant dense<0.000000e+00> : vector<64x64xf32>
    %80 = tpu.matmul %75, %77, %cst_24 {dimension_numbers = #tpu.dot_dimension_numbers<[1], [1], [0], [0], [0, 0, 1, 0], [], []>} : vector<64x8xbf16>, vector<64x8xbf16>, vector<64x64xf32> -> vector<64x64xf32>
    %cst_25 = arith.constant 0.353553385 : f32
    %81 = vector.broadcast %cst_25 : f32 to vector<64x64xf32>
    %82 = arith.mulf %80, %81 : vector<64x64xf32>
    %cst_26 = arith.constant dense<0xFF800000> : vector<64xf32>
    %83 = vector.multi_reduction <maximumf>, %82, %cst_26 [0] : vector<64x64xf32> to vector<64xf32>
    %84 = vector.shape_cast %83 : vector<64xf32> to vector<1x64xf32>
    %85 = vector.broadcast %84 : vector<1x64xf32> to vector<64x64xf32>
    %86 = arith.subf %82, %85 : vector<64x64xf32>
    %87 = math.exp %86 : vector<64x64xf32>
    %cst_27 = arith.constant dense<0.000000e+00> : vector<64xf32>
    %88 = vector.multi_reduction <add>, %87, %cst_27 [0] : vector<64x64xf32> to vector<64xf32>
    %89 = vector.shape_cast %88 : vector<64xf32> to vector<1x64xf32>
    %90 = tpu.reciprocal %89 {approx = true} : vector<1x64xf32> -> vector<1x64xf32>
    %91 = vector.broadcast %90 : vector<1x64xf32> to vector<64x64xf32>
    %92 = arith.mulf %87, %91 : vector<64x64xf32>
    %93 = arith.truncf %92 : vector<64x64xf32> to vector<64x64xbf16>
    %cst_28 = arith.constant dense<0.000000e+00> : vector<64x8xf32>
    %94 = tpu.matmul %93, %79, %cst_28 {dimension_numbers = #tpu.dot_dimension_numbers<[1], [0], [0], [1], [0, 0, 1, 1], [], []>} : vector<64x64xbf16>, vector<64x8xbf16>, vector<64x8xf32> -> vector<64x8xf32>
    %95 = vector.extract_strided_slice %30 {offsets = [64, 8], sizes = [64, 8], strides = [1, 1]} : vector<128x48xf32> to vector<64x8xf32>
    %96 = arith.truncf %95 : vector<64x8xf32> to vector<64x8xbf16>
    %97 = vector.extract_strided_slice %30 {offsets = [64, 24], sizes = [64, 8], strides = [1, 1]} : vector<128x48xf32> to vector<64x8xf32>
    %98 = arith.truncf %97 : vector<64x8xf32> to vector<64x8xbf16>
    %99 = vector.extract_strided_slice %30 {offsets = [64, 40], sizes = [64, 8], strides = [1, 1]} : vector<128x48xf32> to vector<64x8xf32>
    %100 = arith.truncf %99 : vector<64x8xf32> to vector<64x8xbf16>
    %cst_29 = arith.constant dense<0.000000e+00> : vector<64x64xf32>
    %101 = tpu.matmul %96, %98, %cst_29 {dimension_numbers = #tpu.dot_dimension_numbers<[1], [1], [0], [0], [0, 0, 1, 0], [], []>} : vector<64x8xbf16>, vector<64x8xbf16>, vector<64x64xf32> -> vector<64x64xf32>
    %cst_30 = arith.constant 0.353553385 : f32
    %102 = vector.broadcast %cst_30 : f32 to vector<64x64xf32>
    %103 = arith.mulf %101, %102 : vector<64x64xf32>
    %cst_31 = arith.constant dense<0xFF800000> : vector<64xf32>
    %104 = vector.multi_reduction <maximumf>, %103, %cst_31 [0] : vector<64x64xf32> to vector<64xf32>
    %105 = vector.shape_cast %104 : vector<64xf32> to vector<1x64xf32>
    %106 = vector.broadcast %105 : vector<1x64xf32> to vector<64x64xf32>
    %107 = arith.subf %103, %106 : vector<64x64xf32>
    %108 = math.exp %107 : vector<64x64xf32>
    %cst_32 = arith.constant dense<0.000000e+00> : vector<64xf32>
    %109 = vector.multi_reduction <add>, %108, %cst_32 [0] : vector<64x64xf32> to vector<64xf32>
    %110 = vector.shape_cast %109 : vector<64xf32> to vector<1x64xf32>
    %111 = tpu.reciprocal %110 {approx = true} : vector<1x64xf32> -> vector<1x64xf32>
    %112 = vector.broadcast %111 : vector<1x64xf32> to vector<64x64xf32>
    %113 = arith.mulf %108, %112 : vector<64x64xf32>
    %114 = arith.truncf %113 : vector<64x64xf32> to vector<64x64xbf16>
    %cst_33 = arith.constant dense<0.000000e+00> : vector<64x8xf32>
    %115 = tpu.matmul %114, %100, %cst_33 {dimension_numbers = #tpu.dot_dimension_numbers<[1], [0], [0], [1], [0, 0, 1, 1], [], []>} : vector<64x64xbf16>, vector<64x8xbf16>, vector<64x8xf32> -> vector<64x8xf32>
    %116 = tpu.concatenate %94, %115 in 1 : vector<64x8xf32>, vector<64x8xf32> -> vector<64x16xf32>
    %117 = tpu.concatenate %73, %116 in 0 : vector<64x16xf32>, vector<64x16xf32> -> vector<128x16xf32>
    %118 = arith.addf %117, %24 : vector<128x16xf32>
    %cst_34 = arith.constant dense<0.000000e+00> : vector<128xf32>
    %119 = vector.multi_reduction <add>, %118, %cst_34 [1] : vector<128x16xf32> to vector<128xf32>
    %120 = vector.shape_cast %119 : vector<128xf32> to vector<128x1xf32>
    %cst_35 = arith.constant 1.600000e+01 : f32
    %121 = vector.broadcast %cst_35 : f32 to vector<128x1xf32>
    %122 = arith.divf %120, %121 : vector<128x1xf32>
    %123 = vector.broadcast %122 : vector<128x1xf32> to vector<128x16xf32>
    %124 = arith.subf %118, %123 : vector<128x16xf32>
    %125 = arith.mulf %124, %124 : vector<128x16xf32>
    %cst_36 = arith.constant dense<0.000000e+00> : vector<128xf32>
    %126 = vector.multi_reduction <add>, %125, %cst_36 [1] : vector<128x16xf32> to vector<128xf32>
    %127 = vector.shape_cast %126 : vector<128xf32> to vector<128x1xf32>
    %cst_37 = arith.constant 1.600000e+01 : f32
    %128 = vector.broadcast %cst_37 : f32 to vector<128x1xf32>
    %129 = arith.divf %127, %128 : vector<128x1xf32>
    %130 = vector.broadcast %122 : vector<128x1xf32> to vector<128x16xf32>
    %131 = arith.subf %118, %130 : vector<128x16xf32>
    %cst_38 = arith.constant 9.99999974E-6 : f32
    %132 = vector.broadcast %cst_38 : f32 to vector<128x1xf32>
    %133 = arith.addf %129, %132 : vector<128x1xf32>
    %134 = math.rsqrt %133 : vector<128x1xf32>
    %135 = vector.broadcast %134 : vector<128x1xf32> to vector<128x16xf32>
    %136 = arith.mulf %131, %135 : vector<128x16xf32>
    %137 = vector.broadcast %1 : vector<1x16xf32> to vector<128x16xf32>
    %138 = arith.mulf %136, %137 : vector<128x16xf32>
    %139 = vector.broadcast %2 : vector<1x16xf32> to vector<128x16xf32>
    %140 = arith.addf %138, %139 : vector<128x16xf32>
    %141 = arith.truncf %140 : vector<128x16xf32> to vector<128x16xbf16>
    %c0_39 = arith.constant 0 : index
    %c0_40 = arith.constant 0 : index
    %142 = vector.load %arg6[%c0_39, %c0_40] : memref<16x16xbf16, #tpu.memory_space<vmem>>, vector<16x16xbf16>
    %cst_41 = arith.constant dense<0.000000e+00> : vector<128x16xf32>
    %143 = tpu.matmul %141, %142, %cst_41 {dimension_numbers = #tpu.dot_dimension_numbers<[1], [0], [0], [1], [0, 0, 1, 1], [], []>} : vector<128x16xbf16>, vector<16x16xbf16>, vector<128x16xf32> -> vector<128x16xf32>
    %c0_42 = arith.constant 0 : index
    %c0_43 = arith.constant 0 : index
    %144 = vector.load %arg7[%c0_42, %c0_43] : memref<1x16xf32, #tpu.memory_space<vmem>>, vector<1x16xf32>
    %145 = vector.broadcast %144 : vector<1x16xf32> to vector<128x16xf32>
    %146 = arith.addf %143, %145 : vector<128x16xf32>
    %cst_44 = arith.constant 0.000000e+00 : f32
    %147 = vector.broadcast %cst_44 : f32 to vector<128x16xf32>
    %148 = arith.maximumf %146, %147 : vector<128x16xf32>
    %149 = arith.addf %148, %118 : vector<128x16xf32>
    %c0_45 = arith.constant 0 : index
    %c0_46 = arith.constant 0 : index
    %150 = vector.load %arg8[%c0_45, %c0_46] : memref<128x16xf32, #tpu.memory_space<vmem>>, vector<128x16xf32>
    tpu.vector_store %arg8[%c0_45, %c0_46], %149 {strides = array<i32>} : memref<128x16xf32, #tpu.memory_space<vmem>>, vector<128x16xf32>,
    return
  }
  func.func @transform_0(%arg0: i32) -> (i32, i32) {
    %c0_i32 = arith.constant 0 : i32
    %c0_i32_0 = arith.constant 0 : i32
    return %arg0, %c0_i32 : i32, i32
  }
  func.func @transform_1(%arg0: i32) -> (i32, i32) {
    %c0_i32 = arith.constant 0 : i32
    %c0_i32_0 = arith.constant 0 : i32
    %c0_i32_1 = arith.constant 0 : i32
    return %c0_i32, %c0_i32_0 : i32, i32
  }
  func.func @transform_2(%arg0: i32) -> (i32, i32) {
    %c0_i32 = arith.constant 0 : i32
    %c0_i32_0 = arith.constant 0 : i32
    %c0_i32_1 = arith.constant 0 : i32
    return %c0_i32, %c0_i32_0 : i32, i32
  }
  func.func @transform_3(%arg0: i32) -> (i32, i32) {
    %c0_i32 = arith.constant 0 : i32
    %c0_i32_0 = arith.constant 0 : i32
    %c0_i32_1 = arith.constant 0 : i32
    return %c0_i32, %c0_i32_0 : i32, i32
  }
  func.func @transform_4(%arg0: i32) -> (i32, i32) {
    %c0_i32 = arith.constant 0 : i32
    %c0_i32_0 = arith.constant 0 : i32
    %c0_i32_1 = arith.constant 0 : i32
    return %c0_i32, %c0_i32_0 : i32, i32
  }
  func.func @transform_5(%arg0: i32) -> (i32, i32) {
    %c0_i32 = arith.constant 0 : i32
    %c0_i32_0 = arith.constant 0 : i32
    %c0_i32_1 = arith.constant 0 : i32
    return %c0_i32, %c0_i32_0 : i32, i32
  }
  func.func @transform_6(%arg0: i32) -> (i32, i32) {
    %c0_i32 = arith.constant 0 : i32
    %c0_i32_0 = arith.constant 0 : i32
    %c0_i32_1 = arith.constant 0 : i32
    return %c0_i32, %c0_i32_0 : i32, i32
  }
  func.func @transform_7(%arg0: i32) -> (i32, i32) {
    %c0_i32 = arith.constant 0 : i32
    %c0_i32_0 = arith.constant 0 : i32
    return %arg0, %c0_i32 : i32, i32
  }
}

module attributes {stable_mosaic.version = 11 : i64} {
  func.func @_matmul_bias_cols_kernel(%arg0: i32, %arg1: i32, %arg2: memref<1x432x64xbf16, #tpu.memory_space<vmem>>, %arg3: memref<4x432xbf16, #tpu.memory_space<vmem>>, %arg4: memref<4x1xf32, #tpu.memory_space<vmem>>, %arg5: memref<1x4x64xf32, #tpu.memory_space<vmem>>) attributes {dimension_semantics = [#tpu.dimension_semantics<parallel>, #tpu.dimension_semantics<parallel>], iteration_bounds = array<i64: 2, 1>, scalar_prefetch = 0 : i64, scratch_operands = 0 : i64, tpu.core_type = #tpu.core_type<tc>, window_params = [{transform_indices = @transform_0, window_bounds = array<i64: 1, 432, 64>}, {pipeline_mode = #tpu.pipeline_mode<synchronous>, transform_indices = @transform_1, window_bounds = array<i64: 4, 432>}, {pipeline_mode = #tpu.pipeline_mode<synchronous>, transform_indices = @transform_2, window_bounds = array<i64: 4, 1>}, {transform_indices = @transform_3, window_bounds = array<i64: 1, 4, 64>}]} {
    %c0 = arith.constant 0 : index
    %c0_0 = arith.constant 0 : index
    %0 = vector.load %arg3[%c0, %c0_0] : memref<4x432xbf16, #tpu.memory_space<vmem>>, vector<4x432xbf16>
    %c0_1 = arith.constant 0 : index
    %c0_2 = arith.constant 0 : index
    %c0_3 = arith.constant 0 : index
    %1 = vector.load %arg2[%c0_1, %c0_2, %c0_3] : memref<1x432x64xbf16, #tpu.memory_space<vmem>>, vector<1x432x64xbf16>
    %2 = vector.shape_cast %1 : vector<1x432x64xbf16> to vector<432x64xbf16>
    %cst = arith.constant dense<0.000000e+00> : vector<4x64xf32>
    %3 = tpu.matmul %0, %2, %cst {dimension_numbers = #tpu.dot_dimension_numbers<[1], [0], [0], [1], [0, 0, 1, 1], [], []>} : vector<4x432xbf16>, vector<432x64xbf16>, vector<4x64xf32> -> vector<4x64xf32>
    %c0_4 = arith.constant 0 : index
    %c0_5 = arith.constant 0 : index
    %4 = vector.load %arg4[%c0_4, %c0_5] : memref<4x1xf32, #tpu.memory_space<vmem>>, vector<4x1xf32>
    %5 = vector.broadcast %4 : vector<4x1xf32> to vector<4x64xf32>
    %6 = arith.addf %3, %5 : vector<4x64xf32>
    %c0_6 = arith.constant 0 : index
    %c0_7 = arith.constant 0 : index
    %c0_8 = arith.constant 0 : index
    %7 = vector.load %arg5[%c0_6, %c0_7, %c0_8] : memref<1x4x64xf32, #tpu.memory_space<vmem>>, vector<1x4x64xf32>
    %8 = vector.shape_cast %7 : vector<1x4x64xf32> to vector<4x64xf32>
    %9 = vector.shape_cast %6 : vector<4x64xf32> to vector<1x4x64xf32>
    tpu.vector_store %arg5[%c0_6, %c0_7, %c0_8], %9 {strides = array<i32>} : memref<1x4x64xf32, #tpu.memory_space<vmem>>, vector<1x4x64xf32>,
    return
  }
  func.func @transform_0(%arg0: i32, %arg1: i32) -> (i32, i32, i32) {
    %c0_i32 = arith.constant 0 : i32
    %c0_i32_0 = arith.constant 0 : i32
    return %arg0, %c0_i32, %arg1 : i32, i32, i32
  }
  func.func @transform_1(%arg0: i32, %arg1: i32) -> (i32, i32) {
    %c0_i32 = arith.constant 0 : i32
    %c0_i32_0 = arith.constant 0 : i32
    %c0_i32_1 = arith.constant 0 : i32
    return %c0_i32, %c0_i32_0 : i32, i32
  }
  func.func @transform_2(%arg0: i32, %arg1: i32) -> (i32, i32) {
    %c0_i32 = arith.constant 0 : i32
    %c0_i32_0 = arith.constant 0 : i32
    %c0_i32_1 = arith.constant 0 : i32
    return %c0_i32, %c0_i32_0 : i32, i32
  }
  func.func @transform_3(%arg0: i32, %arg1: i32) -> (i32, i32, i32) {
    %c0_i32 = arith.constant 0 : i32
    %c0_i32_0 = arith.constant 0 : i32
    return %arg0, %c0_i32, %arg1 : i32, i32, i32
  }
}

</mosaic_0001>

<bundles_post_ra>
// kernel: transformer_block_forward.3
= control target key start
LH: loop header
LB: loop body
LE: loop exit
PB: predicated region body
PF: predicated region fallthrough
CT: control target
= control target key end

     0   :  { %vm155_vm0 = vcmask 1045504   ;;  %vm130_vm1 = vcmask 883712   ;;  %vm208_vm2 = vcmask 130048   ;;  %s477_s1 = inlined_call_operand.vmem [shape: bf16[108,16], index: 1, kind: input, shape index: {}]   ;;  %s478_s2 = inlined_call_operand.vmem [shape: f32[1,16], index: 2, kind: input, shape index: {}]   ;;  %s479_s0 = inlined_call_operand.vmem [shape: bf16[128,108], index: 0, kind: input, shape index: {}]   ;;  %s480_s3 = inlined_call_operand.vmem [shape: f32[128,16], index: 3, kind: output, shape index: {}]  }
   0x1   :  { %v287_v0 = vld [vmem:[%s477_s1 + $0x30] sm:$0xf]  ;;  %v311_v1 = vld [vmem:[%s477_s1 + $0x30] sm:$0x30]  ;;  %v310_v4 = vld [vmem:[%s477_s1 + $0x28] sm:$0xff] }
   0x2   :  { %v288_v2 = vor.u32 %v311_v1, %v287_v0  ;;  %v309_v5 = vld [vmem:[%s477_s1 + $0x20] sm:$0xff]  ;;  %v308_v6 = vld [vmem:[%s477_s1 + $0x18] sm:$0xff]  ;;  %v307_v7 = vld [vmem:[%s477_s1 + $0x10] sm:$0xff] }
   0x3   :  { %v306_v8 = vld [vmem:[%s477_s1 + $0x8] sm:$0xff]  ;;  %v305_v9 = vld [vmem:[%s477_s1] sm:$0xff]  ;;  %v299_v11 = vld [vmem:[%s479_s0 + $0x10] sm:$0xff] }
   0x4   :  { %v157_v3 = vsel %vm155_vm0, %v288_v2, 0  ;;  %v297_v10 = vld [vmem:[%s479_s0] sm:$0xff]  ;;  %v303_v13 = vld [vmem:[%s479_s0 + $0x30] sm:$0xff]  ;;  %v298_v14 = vld [vmem:[%s479_s0 + $0x8] sm:$0xff] }
   0x5   :  { %160 = vmatpush.bf16.msra.mxu0 %v157_v3  ;;  %312 = vmatpush.bf16.msra.mxu1 %v157_v3  ;;  %v301_v12 = vld [vmem:[%s479_s0 + $0x20] sm:$0xff]  ;;  %v300_v15 = vld [vmem:[%s479_s0 + $0x18] sm:$0xff]  ;;  %v302_v16 = vld [vmem:[%s479_s0 + $0x28] sm:$0xff] }
   0x6   :  { %313 = vmatpush.bf16.msra.mxu2 %v157_v3  ;;  %314 = vmatpush.bf16.msra.mxu3 %v157_v3  ;;  %v304_v17 = vld [vmem:[%s479_s0 + $0x38] sm:$0xff]  ;;  %v333_v18 = vld [vmem:[%s478_s2] ss:$0 sm:$0xff] }
   0x9   :  { %161 = vmatpush.bf16.msra.mxu0 %v310_v4  ;;  %315 = vmatpush.bf16.msra.mxu1 %v310_v4 }
   0xa   :  { %316 = vmatpush.bf16.msra.mxu2 %v310_v4  ;;  %317 = vmatpush.bf16.msra.mxu3 %v310_v4 }
   0xd   :  { %162 = vmatpush.bf16.msra.mxu0 %v309_v5  ;;  %318 = vmatpush.bf16.msra.mxu1 %v309_v5 }
   0xe   :  { %319 = vmatpush.bf16.msra.mxu2 %v309_v5  ;;  %320 = vmatpush.bf16.msra.mxu3 %v309_v5 }
  0x11   :  { %163 = vmatpush.bf16.msra.mxu0 %v308_v6  ;;  %321 = vmatpush.bf16.msra.mxu1 %v308_v6 }
  0x12   :  { %322 = vmatpush.bf16.msra.mxu2 %v308_v6  ;;  %323 = vmatpush.bf16.msra.mxu3 %v308_v6 }
  0x15   :  { %164 = vmatpush.bf16.msra.mxu0 %v307_v7  ;;  %324 = vmatpush.bf16.msra.mxu1 %v307_v7 }
  0x16   :  { %325 = vmatpush.bf16.msra.mxu2 %v307_v7  ;;  %326 = vmatpush.bf16.msra.mxu3 %v307_v7 }
  0x19   :  { %165 = vmatpush.bf16.msra.mxu0 %v306_v8  ;;  %327 = vmatpush.bf16.msra.mxu1 %v306_v8 }
  0x1a   :  { %328 = vmatpush.bf16.msra.mxu2 %v306_v8  ;;  %329 = vmatpush.bf16.msra.mxu3 %v306_v8 }
  0x1d   :  { %166 = vmatpush.bf16.msra.mxu0 %v305_v9  ;;  %330 = vmatpush.bf16.msra.mxu1 %v305_v9 }
  0x1e   :  { %331 = vmatpush.bf16.msra.mxu2 %v305_v9  ;;  %332 = vmatpush.bf16.msra.mxu3 %v305_v9 }
  0x20   :  { %289 = vmatmul.msk.bf16.vlgmr.msra.gmra.mxu0 %vm130_vm1, %v297_v10  ;;  %291 = vmatmul.msk.bf16.vlgmr.msra.gmra.mxu1 %vm130_vm1, %v299_v11 }
  0x21   :  { %293 = vmatmul.msk.bf16.vlgmr.msra.gmra.mxu2 %vm130_vm1, %v301_v12  ;;  %295 = vmatmul.msk.bf16.vlgmr.msra.gmra.mxu3 %vm130_vm1, %v303_v13 }
  0x30   :  { %290 = vmatmul.msk.bf16.gmra.mxu0 %vm130_vm1, %v298_v14  ;;  %292 = vmatmul.msk.bf16.gmra.mxu1 %vm130_vm1, %v300_v15 }
  0x31   :  { %294 = vmatmul.msk.bf16.gmra.mxu2 %vm130_vm1, %v302_v16  ;;  %296 = vmatmul.msk.bf16.gmra.mxu3 %vm130_vm1, %v304_v17 }
  0x9d   :  { %v168_v19 = vpop.f32.mrf.mxu0  ;;  %v178_v20 = vpop.f32.mrf.mxu1 }
  0x9e   :  { %v169_v21 = vadd.f32 %v333_v18, %v168_v19  ;;  %v179_v22 = vadd.f32 %v333_v18, %v178_v20 }
  0xa0   :  { %209 = vst.msk [vmem:[%s480_s3] sm:$0xff] %vm208_vm2, %v169_v21 }
  0xa1   :  { %213 = vst.msk [vmem:[%s480_s3 + $0x20] sm:$0xff] %vm208_vm2, %v179_v22 }
  0xa4   :  { %v188_v23 = vpop.f32.mrf.mxu2  ;;  %v198_v24 = vpop.f32.mrf.mxu3 }
  0xa5   :  { %v189_v25 = vadd.f32 %v333_v18, %v188_v23  ;;  %v199_v26 = vadd.f32 %v333_v18, %v198_v24  ;;  %v170_v27 = vpop.f32.mrf.mxu0  ;;  %v180_v28 = vpop.f32.mrf.mxu1 }
  0xa6   :  { %v171_v29 = vadd.f32 %v333_v18, %v170_v27  ;;  %v181_v30 = vadd.f32 %v333_v18, %v180_v28 }
  0xa7   :  { %217 = vst.msk [vmem:[%s480_s3 + $0x40] sm:$0xff] %vm208_vm2, %v189_v25 }
  0xa8   :  { %221 = vst.msk [vmem:[%s480_s3 + $0x60] sm:$0xff] %vm208_vm2, %v199_v26 }
  0xa9   :  { %210 = vst.msk [vmem:[%s480_s3 + $0x8] sm:$0xff] %vm208_vm2, %v171_v29 }
  0xaa   :  { %214 = vst.msk [vmem:[%s480_s3 + $0x28] sm:$0xff] %vm208_vm2, %v181_v30 }
  0xac   :  { %v190_v31 = vpop.f32.mrf.mxu2  ;;  %v200_v32 = vpop.f32.mrf.mxu3 }
  0xad   :  { %v191_v33 = vadd.f32 %v333_v18, %v190_v31  ;;  %v201_v34 = vadd.f32 %v333_v18, %v200_v32  ;;  %v173_v35 = vpop.f32.mrf.mxu0  ;;  %v183_v36 = vpop.f32.mrf.mxu1 }
  0xae   :  { %v174_v37 = vadd.f32 %v333_v18, %v173_v35  ;;  %v184_v38 = vadd.f32 %v333_v18, %v183_v36 }
  0xaf   :  { %218 = vst.msk [vmem:[%s480_s3 + $0x48] sm:$0xff] %vm208_vm2, %v191_v33 }
  0xb0   :  { %222 = vst.msk [vmem:[%s480_s3 + $0x68] sm:$0xff] %vm208_vm2, %v201_v34 }
  0xb1   :  { %211 = vst.msk [vmem:[%s480_s3 + $0x10] sm:$0xff] %vm208_vm2, %v174_v37 }
  0xb2   :  { %215 = vst.msk [vmem:[%s480_s3 + $0x30] sm:$0xff] %vm208_vm2, %v184_v38 }
  0xb4   :  { %v193_v39 = vpop.f32.mrf.mxu2  ;;  %v203_v40 = vpop.f32.mrf.mxu3 }
  0xb5   :  { %v194_v41 = vadd.f32 %v333_v18, %v193_v39  ;;  %v204_v42 = vadd.f32 %v333_v18, %v203_v40  ;;  %v175_v43 = vpop.f32.mrf.mxu0  ;;  %v185_v44 = vpop.f32.mrf.mxu1 }
  0xb6   :  { %v176_v45 = vadd.f32 %v333_v18, %v175_v43  ;;  %v186_v46 = vadd.f32 %v333_v18, %v185_v44 }
  0xb7   :  { %219 = vst.msk [vmem:[%s480_s3 + $0x50] sm:$0xff] %vm208_vm2, %v194_v41 }
  0xb8   :  { %223 = vst.msk [vmem:[%s480_s3 + $0x70] sm:$0xff] %vm208_vm2, %v204_v42 }
  0xb9   :  { %212 = vst.msk [vmem:[%s480_s3 + $0x18] sm:$0xff] %vm208_vm2, %v176_v45 }
  0xba   :  { %216 = vst.msk [vmem:[%s480_s3 + $0x38] sm:$0xff] %vm208_vm2, %v186_v46 }
  0xbc   :  { %v195_v47 = vpop.f32.mrf.mxu2  ;;  %v205_v48 = vpop.f32.mrf.mxu3 }
  0xbd   :  { %v196_v49 = vadd.f32 %v333_v18, %v195_v47  ;;  %v206_v50 = vadd.f32 %v333_v18, %v205_v48 }
  0xbf   :  { %220 = vst.msk [vmem:[%s480_s3 + $0x58] sm:$0xff] %vm208_vm2, %v196_v49 }
  0xc0   :  { %224 = vst.msk [vmem:[%s480_s3 + $0x78] sm:$0xff] %vm208_vm2, %v206_v50 }

// kernel: transformer_block_forward.4
= control target key start
LH: loop header
LB: loop body
LE: loop exit
PB: predicated region body
PF: predicated region fallthrough
CT: control target
= control target key end

     0   :  { %vm45_vm0 = vcmask 130048   ;;  %v2208_v14 = vmov 16.0   ;;  %s2210_s16 = smov 104   ;;  %s2211_s17 = smov 120   ;;  %s3475_s0 = inlined_call_operand.vmem [shape: f32[128,16], index: 0, kind: input, shape index: {}]   ;;  %s3476_s1 = inlined_call_operand.vmem [shape: f32[1,16], index: 1, kind: input, shape index: {}]   ;;  %s3477_s2 = inlined_call_operand.vmem [shape: f32[1,16], index: 2, kind: input, shape index: {}]   ;;  %s3478_s3 = inlined_call_operand.vmem [shape: bf16[16,48], index: 3, kind: input, shape index: {}]   ;;  %s3479_s4 = inlined_call_operand.vmem [shape: f32[1,48], index: 4, kind: input, shape index: {}]   ;;  %s3480_s5 = inlined_call_operand.vmem [shape: bf16[16,16], index: 5, kind: input, shape index: {}]   ;;  %s3481_s6 = inlined_call_operand.vmem [shape: f32[1,16], index: 6, kind: input, shape index: {}]   ;;  %s3482_s7 = inlined_call_operand.vmem [shape: f32[128,16], index: 7, kind: output, shape index: {}]  }
   0x1   :  { %v31_v0 = vld [vmem:[%s3475_s0 + $0x20] sm:$0xff]  ;;  %v29_v1 = vld [vmem:[%s3475_s0 + $0x10] sm:$0xff]  ;;  %v32_v6 = vld [vmem:[%s3475_s0 + $0x28] sm:$0xff]  ;;  %2068 = vrcp.f32 %v2208_v14  ;;  %s2212_s18 = smov 96   ;;  %s2213_s19 = smov 88  }
   0x2   :  { %v27_v2 = vld [vmem:[%s3475_s0] sm:$0xff]  ;;  %v58_v3 = vsel %vm45_vm0, %v31_v0, 0.0  ;;  %v52_v4 = vsel %vm45_vm0, %v29_v1, 0.0  ;;  %v30_v7 = vld [vmem:[%s3475_s0 + $0x18] sm:$0xff]  ;;  %v28_v8 = vld [vmem:[%s3475_s0 + $0x8] sm:$0xff]  ;;  %v61_v9 = vsel %vm45_vm0, %v32_v6, 0.0 }
   0x3   :  { %v46_v5 = vsel %vm45_vm0, %v27_v2, 0.0  ;;  %59 = vadd.xlane.f32.xlu2 %v58_v3  ;;  %53 = vadd.xlane.f32.xlu1 %v52_v4  ;;  %v55_v10 = vsel %vm45_vm0, %v30_v7, 0.0  ;;  %v49_v11 = vsel %vm45_vm0, %v28_v8, 0.0  ;;  %v33_v12 = vld [vmem:[%s3475_s0 + $0x30] sm:$0xff]  ;;  %v34_v36 = vld [vmem:[%s3475_s0 + $0x38] sm:$0xff]  ;;  %v2331_v56 = vld [vmem:[%s3475_s0 + $0x48] sm:$0xff] }
   0x4   :  { %47 = vadd.xlane.f32.xlu0 %v46_v5  ;;  %v64_v13 = vsel %vm45_vm0, %v33_v12, 0.0  ;;  %v67_v41 = vsel %vm45_vm0, %v34_v36, 0.0  ;;  %v73_v58 = vsel %vm45_vm0, %v2331_v56, 0.0  ;;  %v2341_v60 = vld [vmem:[%s3475_s0 + $0x60] sm:$0xff]  ;;  %s2214_s20 = smov 8  }
   0x5   :  { %v2346_v61 = vld [vmem:[%s3475_s0 + $0x40] sm:$0xff]  ;;  %v82_v62 = vsel %vm45_vm0, %v2341_v60, 0.0 }
   0x6   :  { %v70_v63 = vsel %vm45_vm0, %v2346_v61, 0.0  ;;  %v2055_v5 = vld [vmem:[%s3478_s3] sm:$0xff] }
   0x7   :  { %v2069_v15 = vpop.eup %2068  ;;  %494 = vmatpush.bf16.msra.mxu0 %v2055_v5 }
   0x8   :  { %v95_v16 = vmul.f32 16.0, %v2069_v15  ;;  %vm99_vm1 = vweird.f32 %v2069_v15 }
   0xa   :  { %v96_v17 = vsub.f32 1.0, %v95_v16 }
   0xb   :  { %62 = vadd.xlane.f32.xlu2 %v61_v9  ;;  %56 = vadd.xlane.f32.xlu1 %v55_v10 }
   0xc   :  { %50 = vadd.xlane.f32.xlu0 %v49_v11  ;;  %v97_v18 = vmul.f32 %v2069_v15, %v96_v17 }
   0xe   :  { %v98_v19 = vadd.f32 %v2069_v15, %v97_v18 }
  0x10   :  { %v2283_v20 = vsel %vm99_vm1, %v2069_v15, %v98_v19 }
  0x13   :  { %65 = vadd.xlane.f32.xlu2 %v64_v13 }
  0x76   :  { %v60_v21 = vpop.xlane.xlu2 %59  ;;  %v54_v22 = vpop.xlane.xlu1 %53 }
  0x77   :  { %v48_v23 = vpop.xlane.xlu0 %47  ;;  %v105_v32 = vmul.f32 %v2283_v20, %v60_v21  ;;  %v103_v33 = vmul.f32 %v2283_v20, %v54_v22 }
  0x78   :  { %v101_v24 = vmul.f32 %v2283_v20, %v48_v23 }
  0x79   :  { %v2304_v39 = vsub.f32 %v31_v0, %v105_v32  ;;  %v2306_v40 = vsub.f32 %v29_v1, %v103_v33  ;;  %v2355_v0 = vld [vmem:[%s3475_s0 + $0x58] sm:$0xff] }
  0x7a   :  { %v2286_v25 = vsub.f32 %v27_v2, %v101_v24  ;;  %v79_v1 = vsel %vm45_vm0, %v2355_v0, 0.0 }
  0x7b   :  { %v137_v48 = vmul.f32 %v2304_v39, %v2304_v39  ;;  %v135_v49 = vmul.f32 %v2306_v40, %v2306_v40 }
  0x7c   :  { %v133_v26 = vmul.f32 %v2286_v25, %v2286_v25 }
  0x7d   :  { %v161_v53 = vsel %vm45_vm0, %v137_v48, 0.0  ;;  %v155_v54 = vsel %vm45_vm0, %v135_v49, 0.0 }
  0x7e   :  { %v63_v27 = vpop.xlane.xlu2 %62  ;;  %v57_v28 = vpop.xlane.xlu1 %56  ;;  %v149_v29 = vsel %vm45_vm0, %v133_v26, 0.0 }
  0x7f   :  { %v104_v30 = vmul.f32 %v2283_v20, %v57_v28  ;;  %150 = vadd.xlane.f32.xlu0 %v149_v29  ;;  %v51_v31 = vpop.xlane.xlu0 %50  ;;  %v106_v47 = vmul.f32 %v2283_v20, %v63_v27  ;;  %v2380_v27 = vld [vmem:[%s3475_s0 + $0x50] sm:$0xff] }
  0x80   :  { %v102_v34 = vmul.f32 %v2283_v20, %v51_v31 }
  0x81   :  { %v2295_v35 = vsub.f32 %v30_v7, %v104_v30  ;;  %v2323_v52 = vsub.f32 %v32_v6, %v106_v47 }
  0x82   :  { %v2300_v37 = vsub.f32 %v28_v8, %v102_v34  ;;  %v76_v34 = vsel %vm45_vm0, %v2380_v27, 0.0 }
  0x83   :  { %v136_v38 = vmul.f32 %v2295_v35, %v2295_v35  ;;  %v138_v57 = vmul.f32 %v2323_v52, %v2323_v52 }
  0x84   :  { %v134_v42 = vmul.f32 %v2300_v37, %v2300_v37 }
  0x85   :  { %v158_v43 = vsel %vm45_vm0, %v136_v38, 0.0  ;;  %v164_v59 = vsel %vm45_vm0, %v138_v57, 0.0 }
  0x86   :  { %v66_v44 = vpop.xlane.xlu2 %65  ;;  %159 = vadd.xlane.f32.xlu2 %v158_v43  ;;  %v152_v45 = vsel %vm45_vm0, %v134_v42, 0.0 }
  0x87   :  { %v107_v46 = vmul.f32 %v2283_v20, %v66_v44  ;;  %68 = vadd.xlane.f32.xlu0 %v67_v41  ;;  %153 = vadd.xlane.f32.xlu1 %v152_v45 }
  0x89   :  { %v2319_v50 = vsub.f32 %v33_v12, %v107_v46 }
  0x8b   :  { %v139_v51 = vmul.f32 %v2319_v50, %v2319_v50 }
  0x8d   :  { %v167_v55 = vsel %vm45_vm0, %v139_v51, 0.0 }
  0x8e   :  { %168 = vadd.xlane.f32.xlu2 %v167_v55  ;;  %v2409_v55 = vld [vmem:[%s3475_s0 + $0x68] sm:$0xff] }
  0x8f   :  { %162 = vadd.xlane.f32.xlu0 %v161_v53  ;;  %156 = vadd.xlane.f32.xlu1 %v155_v54 }
  0x96   :  { %74 = vadd.xlane.f32.xlu2 %v73_v58 }
  0x97   :  { %165 = vadd.xlane.f32.xlu1 %v164_v59 }
  0x9e   :  { %83 = vadd.xlane.f32.xlu2 %v82_v62 }
  0x9f   :  { %71 = vadd.xlane.f32.xlu1 %v70_v63 }
  0xa7   :  { %80 = vadd.xlane.f32.xlu1 %v79_v1 }
  0xf2   :  { %v151_v2 = vpop.xlane.xlu0 %150 }
  0xf3   :  { %v197_v3 = vmul.f32 %v151_v2, %v2283_v20 }
  0xf5   :  { %v213_v4 = vadd.f32 1e-05, %v197_v3  ;;  %v85_v3 = vsel %vm45_vm0, %v2409_v55, 0.0 }
  0xf7   :  { %2070 = vrsqrt.f32 %v213_v4  ;;  %vm235_vm3 = vweird.f32 %v213_v4 }
  0xf9   :  { %v160_v6 = vpop.xlane.xlu2 %159 }
  0xfa   :  { %v200_v7 = vmul.f32 %v160_v6, %v2283_v20  ;;  %v154_v8 = vpop.xlane.xlu1 %153  ;;  %v69_v9 = vpop.xlane.xlu0 %68 }
  0xfb   :  { %v198_v10 = vmul.f32 %v154_v8, %v2283_v20  ;;  %v108_v11 = vmul.f32 %v2283_v20, %v69_v9 }
  0xfc   :  { %v2366_v12 = vadd.f32 1e-05, %v200_v7 }
  0xfd   :  { %v2071_v13 = vpop.eup %2070  ;;  %v214_v14 = vadd.f32 1e-05, %v198_v10  ;;  %v2368_v15 = vsub.f32 %v34_v36, %v108_v11  ;;  %v2432_v10 = vld [vmem:[%s3477_s2] ss:$0 sm:$0xff] }
  0xfe   :  { %v230_v16 = vmul.f32 %v2071_v13, %v213_v4  ;;  %2072 = vrsqrt.f32 %v2366_v12  ;;  %vm236_vm2 = vweird.f32 %v2071_v13  ;;  %vm265_vm8 = vweird.f32 %v2366_v12 }
  0xff   :  { %2074 = vrsqrt.f32 %v214_v14  ;;  %v140_v17 = vmul.f32 %v2368_v15, %v2368_v15  ;;  %vm2394_vm4 = vmor %vm235_vm3, %vm236_vm2  ;;  %vm245_vm5 = vweird.f32 %v214_v14 }
 0x100   :  { %v231_v18 = vmul.f32 %v2071_v13, %v230_v16 }
 0x101   :  { %v2373_v19 = vpop.xlane.xlu2 %168  ;;  %v170_v21 = vsel %vm45_vm0, %v140_v17, 0.0  ;;  %v2443_v17 = vld [vmem:[%s3475_s0 + $0x70] sm:$0xff] }
 0x102   :  { %v232_v22 = vmul.f32 0.5, %v231_v18  ;;  %v157_v23 = vpop.xlane.xlu1 %156  ;;  %171 = vadd.xlane.f32.xlu0 %v170_v21  ;;  %v163_v24 = vpop.xlane.xlu0 %162 }
 0x103   :  { %v199_v26 = vmul.f32 %v157_v23, %v2283_v20  ;;  %v201_v32 = vmul.f32 %v163_v24, %v2283_v20 }
 0x104   :  { %v2382_v28 = vpop.eup %2072  ;;  %v233_v29 = vsub.f32 1.5, %v232_v22 }
 0x105   :  { %v2075_v30 = vpop.eup %2074  ;;  %v2384_v31 = vadd.f32 1e-05, %v199_v26  ;;  %v260_v38 = vmul.f32 %v2382_v28, %v2366_v12  ;;  %v2392_v42 = vadd.f32 1e-05, %v201_v32  ;;  %vm266_vm9 = vweird.f32 %v2382_v28 }
 0x106   :  { %v240_v33 = vmul.f32 %v2075_v30, %v214_v14  ;;  %v234_v36 = vmul.f32 %v2071_v13, %v233_v29  ;;  %vm246_vm6 = vweird.f32 %v2075_v30  ;;  %vm2456_vm12 = vmor %vm265_vm8, %vm266_vm9 }
 0x107   :  { %2076 = vrsqrt.f32 %v2384_v31  ;;  %v261_v49 = vmul.f32 %v2382_v28, %v260_v38  ;;  %vm247_vm7 = vmor %vm245_vm5, %vm246_vm6  ;;  %vm255_vm10 = vweird.f32 %v2384_v31  ;;  %vm275_vm1 = vweird.f32 %v2392_v42 }
 0x108   :  { %v241_v41 = vmul.f32 %v2075_v30, %v240_v33  ;;  %v238_v48 = vsel %vm2394_vm4, %v2071_v13, %v234_v36  ;;  %2078 = vrsqrt.f32 %v2392_v42 }
 0x109   :  { %v75_v43 = vpop.xlane.xlu2 %74  ;;  %v389_v59 = vmul.f32 %v238_v48, %v2286_v25  ;;  %v262_v2 = vmul.f32 0.5, %v261_v49 }
 0x10a   :  { %v242_v45 = vmul.f32 0.5, %v241_v41  ;;  %v110_v46 = vmul.f32 %v2283_v20, %v75_v43  ;;  %v166_v47 = vpop.xlane.xlu1 %165  ;;  %77 = vadd.xlane.f32.xlu0 %v76_v34 }
 0x10b   :  { %v202_v51 = vmul.f32 %v166_v47, %v2283_v20  ;;  %v263_v13 = vsub.f32 1.5, %v262_v2 }
 0x10c   :  { %v243_v53 = vsub.f32 1.5, %v242_v45  ;;  %v2404_v54 = vsub.f32 %v2331_v56, %v110_v46  ;;  %v2421_v56 = vld [vmem:[%s3476_s1] ss:$0 sm:$0xff] }
 0x10d   :  { %v2077_v57 = vpop.eup %2076  ;;  %v2412_v58 = vadd.f32 1e-05, %v202_v51  ;;  %v408_v9 = vmul.f32 %v2421_v56, %v389_v59  ;;  %v264_v24 = vmul.f32 %v2382_v28, %v263_v13  ;;  %v2484_v51 = vld [vmem:[%s3475_s0 + $0x78] sm:$0xff] }
 0x10e   :  { %v244_v62 = vmul.f32 %v2075_v30, %v243_v53  ;;  %v250_v63 = vmul.f32 %v2077_v57, %v2384_v31  ;;  %v142_v1 = vmul.f32 %v2404_v54, %v2404_v54  ;;  %v2434_v11 = vpop.eup %2078  ;;  %vm256_vm11 = vweird.f32 %v2077_v57 }
 0x10f   :  { %2080 = vrsqrt.f32 %v2412_v58  ;;  %v2453_v12 = vadd.f32 %v2432_v10, %v408_v9  ;;  %v270_v29 = vmul.f32 %v2434_v11, %v2392_v42  ;;  %vm257_vm13 = vmor %vm255_vm10, %vm256_vm11  ;;  %v268_v43 = vsel %vm2456_vm12, %v2382_v28, %v264_v24 }
 0x110   :  { %v248_v4 = vsel %vm247_vm7, %v2075_v30, %v244_v62  ;;  %v251_v5 = vmul.f32 %v2077_v57, %v250_v63  ;;  %v176_v7 = vsel %vm45_vm0, %v142_v1, 0.0  ;;  %v88_v30 = vsel %vm45_vm0, %v2443_v17, 0.0 }
 0x111   :  { %v390_v25 = vmul.f32 %v248_v4, %v2300_v37  ;;  %177 = vadd.xlane.f32.xlu2 %v176_v7  ;;  %v84_v36 = vpop.xlane.xlu2 %83  ;;  %v271_v44 = vmul.f32 %v2434_v11, %v270_v29  ;;  %v392_v28 = vmul.f32 %v268_v43, %v2295_v35  ;;  %vm285_vm14 = vweird.f32 %v2412_v58 }
 0x112   :  { %v252_v6 = vmul.f32 0.5, %v251_v5  ;;  %v72_v8 = vpop.xlane.xlu1 %71  ;;  %86 = vadd.xlane.f32.xlu0 %v85_v3  ;;  %v113_v47 = vmul.f32 %v2283_v20, %v84_v36  ;;  %vm276_vm2 = vweird.f32 %v2434_v11 }
 0x113   :  { %v109_v14 = vmul.f32 %v2283_v20, %v72_v8  ;;  %v409_v37 = vmul.f32 %v2421_v56, %v390_v25  ;;  %v272_v53 = vmul.f32 0.5, %v271_v44  ;;  %v411_v1 = vmul.f32 %v2421_v56, %v392_v28  ;;  %vm277_vm4 = vmor %vm275_vm1, %vm276_vm2 }
 0x114   :  { %v253_v16 = vsub.f32 1.5, %v252_v6  ;;  %v2490_v59 = vsub.f32 %v2341_v60, %v113_v47 }
 0x115   :  { %v2447_v18 = vsub.f32 %v2346_v61, %v109_v14  ;;  %v2450_v21 = vadd.f32 %v2432_v10, %v409_v37  ;;  %v2081_v22 = vpop.eup %2080  ;;  %v273_v2 = vsub.f32 1.5, %v272_v53  ;;  %v2504_v4 = vadd.f32 %v2432_v10, %v411_v1 }
 0x116   :  { %v254_v23 = vmul.f32 %v2077_v57, %v253_v16  ;;  %v280_v61 = vmul.f32 %v2081_v22, %v2412_v58  ;;  %v145_v60 = vmul.f32 %v2490_v59, %v2490_v59  ;;  %vm286_vm15 = vweird.f32 %v2081_v22 }
 0x117   :  { %v443_v31 = vpack.c.bf16 %v2450_v21, %v2453_v12  ;;  %v141_v32 = vmul.f32 %v2447_v18, %v2447_v18  ;;  %v274_v5 = vmul.f32 %v2434_v11, %v273_v2  ;;  %vm287_vm3 = vmor %vm285_vm14, %vm286_vm15 }
 0x118   :  { %v258_v33 = vsel %vm257_vm13, %v2077_v57, %v254_v23  ;;  %v281_v34 = vmul.f32 %v2081_v22, %v280_v61  ;;  %v185_v6 = vsel %vm45_vm0, %v145_v60, 0.0 }
 0x119   :  { %2003 = vmatmul.msk.bf16.vlgmr.msra.gmra.mxu0 %vm45_vm0, %v443_v31  ;;  %v173_v38 = vsel %vm45_vm0, %v141_v32, 0.0  ;;  %v391_v46 = vmul.f32 %v258_v33, %v2306_v40  ;;  %v91_v40 = vsel %vm45_vm0, %v2484_v51, 0.0  ;;  %v278_v58 = vsel %vm277_vm4, %v2434_v11, %v274_v5 }
 0x11a   :  { %v81_v41 = vpop.xlane.xlu1 %80  ;;  %89 = vadd.xlane.f32.xlu0 %v88_v30  ;;  %174 = vadd.xlane.f32.xlu1 %v173_v38  ;;  %v282_v48 = vmul.f32 0.5, %v281_v34  ;;  %v393_v9 = vmul.f32 %v278_v58, %v2304_v39 }
 0x11b   :  { %v112_v45 = vmul.f32 %v2283_v20, %v81_v41 }
 0x11c   :  { %v283_v62 = vsub.f32 1.5, %v282_v48  ;;  %v412_v13 = vmul.f32 %v2421_v56, %v393_v9 }
 0x11d   :  { %v2479_v49 = vsub.f32 %v2355_v0, %v112_v45  ;;  %v410_v0 = vmul.f32 %v2421_v56, %v391_v46 }
 0x11e   :  { %v284_v3 = vmul.f32 %v2081_v22, %v283_v62  ;;  %v2522_v37 = vadd.f32 %v2432_v10, %v412_v13 }
 0x11f   :  { %v144_v57 = vmul.f32 %v2479_v49, %v2479_v49  ;;  %v2498_v35 = vadd.f32 %v2432_v10, %v410_v0 }
 0x120   :  { %v288_v7 = vsel %vm287_vm3, %v2081_v22, %v284_v3 }
 0x121   :  { %v182_v63 = vsel %vm45_vm0, %v144_v57, 0.0  ;;  %v444_v25 = vpack.c.bf16 %v2504_v4, %v2498_v35  ;;  %v394_v8 = vmul.f32 %v288_v7, %v2323_v52  ;;  %v203_v52 = vmul.f32 %v2373_v19, %v2283_v20 }
 0x122   :  { %183 = vadd.xlane.f32.xlu0 %v182_v63  ;;  %92 = vadd.xlane.f32.xlu1 %v91_v40 }
 0x123   :  { %v413_v42 = vmul.f32 %v2421_v56, %v394_v8  ;;  %v219_v11 = vadd.f32 1e-05, %v203_v52 }
 0x125   :  { %v2519_v14 = vadd.f32 %v2432_v10, %v413_v42  ;;  %2082 = vrsqrt.f32 %v219_v11  ;;  %vm295_vm5 = vweird.f32 %v219_v11 }
 0x127   :  { %v445_v16 = vpack.c.bf16 %v2519_v14, %v2522_v37 }
 0x129   :  { %2004 = vmatmul.msk.bf16.gmra.mxu0 %vm45_vm0, %v444_v25 }
 0x12a   :  { %186 = vadd.xlane.f32.xlu1 %v185_v6 }
 0x12b   :  { %v2083_v39 = vpop.eup %2082 }
 0x12c   :  { %v290_v22 = vmul.f32 %v2083_v39, %v219_v11  ;;  %vm296_vm6 = vweird.f32 %v2083_v39 }
 0x12d   :  { %vm297_vm7 = vmor %vm295_vm5, %vm296_vm6 }
 0x12e   :  { %v291_v23 = vmul.f32 %v2083_v39, %v290_v22 }
 0x130   :  { %v292_v61 = vmul.f32 0.5, %v291_v23 }
 0x132   :  { %v293_v30 = vsub.f32 1.5, %v292_v61 }
 0x134   :  { %v294_v34 = vmul.f32 %v2083_v39, %v293_v30 }
 0x136   :  { %v298_v44 = vsel %vm297_vm7, %v2083_v39, %v294_v34 }
 0x137   :  { %v395_v53 = vmul.f32 %v298_v44, %v2319_v50 }
 0x139   :  { %2005 = vmatmul.msk.bf16.gmra.mxu0 %vm45_vm0, %v445_v16  ;;  %v414_v60 = vmul.f32 %v2421_v56, %v395_v53 }
 0x13b   :  { %v2555_v7 = vadd.f32 %v2432_v10, %v414_v60 }
 0x175   :  { %v172_v24 = vpop.xlane.xlu0 %171 }
 0x176   :  { %v204_v26 = vmul.f32 %v172_v24, %v2283_v20 }
 0x178   :  { %v220_v29 = vadd.f32 1e-05, %v204_v26 }
 0x17a   :  { %2084 = vrsqrt.f32 %v220_v29  ;;  %vm305_vm9 = vweird.f32 %v220_v29 }
 0x17d   :  { %v78_v31 = vpop.xlane.xlu0 %77 }
 0x17e   :  { %v111_v32 = vmul.f32 %v2283_v20, %v78_v31 }
 0x180   :  { %v2085_v33 = vpop.eup %2084  ;;  %v2532_v19 = vsub.f32 %v2380_v27, %v111_v32  ;;  %v2575_v32 = vld [vmem:[%s3479_s4] ss:$0 sm:$0xff]  ;;  %s2209_s4 = smov 112  }
 0x181   :  { %v300_v36 = vmul.f32 %v2085_v33, %v220_v29  ;;  %vm306_vm8 = vweird.f32 %v2085_v33 }
 0x182   :  { %v143_v38 = vmul.f32 %v2532_v19, %v2532_v19  ;;  %vm307_vm10 = vmor %vm305_vm9, %vm306_vm8 }
 0x183   :  { %v301_v41 = vmul.f32 %v2085_v33, %v300_v36 }
 0x184   :  { %v179_v43 = vsel %vm45_vm0, %v143_v38, 0.0  ;;  %v178_v47 = vpop.xlane.xlu2 %177 }
 0x185   :  { %v302_v45 = vmul.f32 0.5, %v301_v41  ;;  %180 = vadd.xlane.f32.xlu2 %v179_v43  ;;  %v87_v46 = vpop.xlane.xlu0 %86  ;;  %v206_v27 = vmul.f32 %v178_v47, %v2283_v20 }
 0x186   :  { %v114_v48 = vmul.f32 %v2283_v20, %v87_v46 }
 0x187   :  { %v303_v28 = vsub.f32 1.5, %v302_v45  ;;  %v222_v0 = vadd.f32 1e-05, %v206_v27 }
 0x188   :  { %v2541_v57 = vsub.f32 %v2409_v55, %v114_v48 }
 0x189   :  { %v304_v40 = vmul.f32 %v2085_v33, %v303_v28  ;;  %2086 = vrsqrt.f32 %v222_v0  ;;  %vm325_vm11 = vweird.f32 %v222_v0 }
 0x18a   :  { %v146_v62 = vmul.f32 %v2541_v57, %v2541_v57 }
 0x18b   :  { %v308_v63 = vsel %vm307_vm10, %v2085_v33, %v304_v40 }
 0x18c   :  { %v396_v1 = vmul.f32 %v308_v63, %v2368_v15  ;;  %v188_v2 = vsel %vm45_vm0, %v146_v62, 0.0 }
 0x18d   :  { %189 = vadd.xlane.f32.xlu2 %v188_v2  ;;  %v90_v50 = vpop.xlane.xlu0 %89  ;;  %v175_v3 = vpop.xlane.xlu1 %174 }
 0x18e   :  { %v115_v55 = vmul.f32 %v2283_v20, %v90_v50  ;;  %v415_v5 = vmul.f32 %v2421_v56, %v396_v1  ;;  %v205_v25 = vmul.f32 %v175_v3, %v2283_v20 }
 0x18f   :  { %v2087_v58 = vpop.eup %2086 }
 0x190   :  { %v2552_v6 = vsub.f32 %v2443_v17, %v115_v55  ;;  %v2558_v15 = vadd.f32 %v2432_v10, %v415_v5  ;;  %v221_v8 = vadd.f32 1e-05, %v205_v25  ;;  %v320_v9 = vmul.f32 %v2087_v58, %v222_v0 }
 0x191   :  { %vm326_vm12 = vweird.f32 %v2087_v58 }
 0x192   :  { %v446_v42 = vpack.c.bf16 %v2558_v15, %v2555_v7  ;;  %v147_v13 = vmul.f32 %v2552_v6, %v2552_v6  ;;  %2088 = vrsqrt.f32 %v221_v8  ;;  %v321_v16 = vmul.f32 %v2087_v58, %v320_v9  ;;  %vm327_vm13 = vmor %vm325_vm11, %vm326_vm12 }
 0x193   :  { %vm315_vm14 = vweird.f32 %v221_v8 }
 0x194   :  { %2006 = vmatmul.msk.bf16.gmra.mxu0 %vm45_vm0, %v446_v42  ;;  %v191_v17 = vsel %vm45_vm0, %v147_v13, 0.0  ;;  %v322_v52 = vmul.f32 0.5, %v321_v16 }
 0x195   :  { %192 = vadd.xlane.f32.xlu0 %v191_v17  ;;  %v93_v11 = vpop.xlane.xlu1 %92  ;;  %v184_v5 = vpop.xlane.xlu0 %183 }
 0x196   :  { %v116_v39 = vmul.f32 %v2283_v20, %v93_v11  ;;  %v496_v22 = vpop.f32.mrf.mxu0  ;;  %v323_v23 = vsub.f32 1.5, %v322_v52  ;;  %v208_v25 = vmul.f32 %v184_v5, %v2283_v20 }
 0x197   :  { %v497_v41 = vadd.f32 %v2575_v32, %v496_v22 }
 0x198   :  { %v2089_v24 = vpop.eup %2088  ;;  %v2568_v26 = vsub.f32 %v2484_v51, %v116_v39  ;;  %v324_v29 = vmul.f32 %v2087_v58, %v323_v23 }
 0x199   :  { %v310_v61 = vmul.f32 %v2089_v24, %v221_v8  ;;  %vm316_vm15 = vweird.f32 %v2089_v24 }
 0x19a   :  { %v148_v30 = vmul.f32 %v2568_v26, %v2568_v26  ;;  %v328_v34 = vsel %vm327_vm13, %v2087_v58, %v324_v29  ;;  %vm317_vm1 = vmor %vm315_vm14, %vm316_vm15  ;;  %v224_v58 = vadd.f32 1e-05, %v208_v25 }
 0x19b   :  { %v311_v31 = vmul.f32 %v2089_v24, %v310_v61  ;;  %v398_v44 = vmul.f32 %v328_v34, %v2404_v54 }
 0x19c   :  { %v194_v33 = vsel %vm45_vm0, %v148_v30, 0.0  ;;  %2090 = vrsqrt.f32 %v224_v58  ;;  %vm345_vm2 = vweird.f32 %v224_v58 }
 0x19d   :  { %v312_v36 = vmul.f32 0.5, %v311_v31  ;;  %195 = vadd.xlane.f32.xlu1 %v194_v33  ;;  %v417_v28 = vmul.f32 %v2421_v56, %v398_v44  ;;  %v187_v8 = vpop.xlane.xlu1 %186 }
 0x19e   :  { %v498_v51 = vpop.f32.mrf.mxu0  ;;  %v209_v42 = vmul.f32 %v187_v8, %v2283_v20 }
 0x19f   :  { %v313_v38 = vsub.f32 1.5, %v312_v36  ;;  %v499_v43 = vadd.f32 %v2575_v32, %v498_v51  ;;  %v2590_v0 = vadd.f32 %v2432_v10, %v417_v28 }
 0x1a0   :  { %v225_v16 = vadd.f32 1e-05, %v209_v42 }
 0x1a1   :  { %v314_v45 = vmul.f32 %v2089_v24, %v313_v38  ;;  %v2581_v46 = vpack.c.bf16 %v499_v43, %v497_v41 }
 0x1a2   :  { %v2091_v9 = vpop.eup %2090  ;;  %2092 = vrsqrt.f32 %v225_v16  ;;  %vm355_vm8 = vweird.f32 %v225_v16 }
 0x1a3   :  { %v318_v47 = vsel %vm317_vm1, %v2089_v24, %v314_v45  ;;  %v340_v13 = vmul.f32 %v2091_v9, %v224_v58  ;;  %vm346_vm3 = vweird.f32 %v2091_v9 }
 0x1a4   :  { %v397_v48 = vmul.f32 %v318_v47, %v2447_v18  ;;  %vm347_vm4 = vmor %vm345_vm2, %vm346_vm3 }
 0x1a5   :  { %v341_v17 = vmul.f32 %v2091_v9, %v340_v13 }
 0x1a6   :  { %v501_v27 = vpop.f32.mrf.mxu0  ;;  %v416_v53 = vmul.f32 %v2421_v56, %v397_v48 }
 0x1a7   :  { %v502_v18 = vadd.f32 %v2575_v32, %v501_v27  ;;  %v342_v22 = vmul.f32 0.5, %v341_v17 }
 0x1a8   :  { %v2587_v40 = vadd.f32 %v2432_v10, %v416_v53  ;;  %v2614_v29 = vpop.eup %2092 }
 0x1a9   :  { %v343_v23 = vsub.f32 1.5, %v342_v22  ;;  %v350_v34 = vmul.f32 %v2614_v29, %v225_v16  ;;  %vm356_vm9 = vweird.f32 %v2614_v29 }
 0x1aa   :  { %v447_v54 = vpack.c.bf16 %v2590_v0, %v2587_v40  ;;  %vm357_vm12 = vmor %vm355_vm8, %vm356_vm9 }
 0x1ab   :  { %v344_v33 = vmul.f32 %v2091_v9, %v343_v23  ;;  %v351_v41 = vmul.f32 %v2614_v29, %v350_v34 }
 0x1ac   :  { %2007 = vmatmul.msk.bf16.gmra.mxu0 %vm45_vm0, %v447_v54 }
 0x1ad   :  { %v348_v38 = vsel %vm347_vm4, %v2091_v9, %v344_v33  ;;  %v352_v53 = vmul.f32 0.5, %v351_v41 }
 0x1ae   :  { %v503_v62 = vpop.f32.mrf.mxu0  ;;  %v400_v28 = vmul.f32 %v348_v38, %v2479_v49 }
 0x1af   :  { %v504_v63 = vadd.f32 %v2575_v32, %v503_v62 }
 0x1b1   :  { %v2597_v1 = vpack.c.bf16 %v504_v63, %v502_v18 }
 0x1b6   :  { %546 = vrot.lane.b32.xlu1 %v2597_v1, %s2209_s4  ;;  %v506_v2 = vpop.f32.mrf.mxu0 }
 0x1b7   :  { %v507_v50 = vadd.f32 %v2575_v32, %v506_v2 }
 0x1be   :  { %757 = vrot.lane.b32.xlu1 %v2597_v1, %s2210_s16  ;;  %v508_v60 = vpop.f32.mrf.mxu0 }
 0x1bf   :  { %v509_v3 = vadd.f32 %v2575_v32, %v508_v60  ;;  %v419_v60 = vmul.f32 %v2421_v56, %v400_v28 }
 0x1c1   :  { %v2605_v55 = vpack.c.bf16 %v509_v3, %v507_v50  ;;  %v353_v50 = vsub.f32 1.5, %v352_v53 }
 0x1c3   :  { %548 = vrot.lane.b32.xlu0 %v2605_v55, %s2209_s4  ;;  %v354_v13 = vmul.f32 %v2614_v29, %v353_v50 }
 0x1c5   :  { %v358_v22 = vsel %vm357_vm12, %v2614_v29, %v354_v13 }
 0x1c6   :  { %749 = vrot.lane.b32.xlu1 %v2597_v1, %s2211_s17  ;;  %v401_v33 = vmul.f32 %v358_v22, %v2490_v59 }
 0x1c8   :  { %v420_v29 = vmul.f32 %v2421_v56, %v401_v33 }
 0x1f8   :  { %v181_v52 = vpop.xlane.xlu2 %180 }
 0x1f9   :  { %v207_v11 = vmul.f32 %v181_v52, %v2283_v20 }
 0x1fb   :  { %v223_v39 = vadd.f32 1e-05, %v207_v11 }
 0x1fd   :  { %2094 = vrsqrt.f32 %v223_v39  ;;  %vm335_vm6 = vweird.f32 %v223_v39 }
 0x200   :  { %v190_v24 = vpop.xlane.xlu2 %189 }
 0x201   :  { %v210_v61 = vmul.f32 %v190_v24, %v2283_v20 }
 0x203   :  { %v2095_v30 = vpop.eup %2094  ;;  %v226_v31 = vadd.f32 1e-05, %v210_v61 }
 0x204   :  { %v330_v36 = vmul.f32 %v2095_v30, %v223_v39  ;;  %vm336_vm5 = vweird.f32 %v2095_v30 }
 0x205   :  { %2096 = vrsqrt.f32 %v226_v31  ;;  %vm337_vm7 = vmor %vm335_vm6, %vm336_vm5  ;;  %vm365_vm10 = vweird.f32 %v226_v31  ;;  %vm552_vm5 = vcmask 64512   ;;  %vm614_vm6 = vcmask 523264  }
 0x206   :  { %v331_v51 = vmul.f32 %v2095_v30, %v330_v36 }
 0x208   :  { %v332_v43 = vmul.f32 0.5, %v331_v51  ;;  %v193_v44 = vpop.xlane.xlu0 %192 }
 0x209   :  { %v211_v45 = vmul.f32 %v193_v44, %v2283_v20 }
 0x20a   :  { %v333_v47 = vsub.f32 1.5, %v332_v43 }
 0x20b   :  { %v2097_v48 = vpop.eup %2096  ;;  %v227_v27 = vadd.f32 1e-05, %v211_v45 }
 0x20c   :  { %v334_v54 = vmul.f32 %v2095_v30, %v333_v47  ;;  %v360_v62 = vmul.f32 %v2097_v48, %v226_v31  ;;  %vm366_vm11 = vweird.f32 %v2097_v48  ;;  %v2653_v47 = vadd.f32 %v2432_v10, %v420_v29 }
 0x20d   :  { %2098 = vrsqrt.f32 %v227_v27  ;;  %vm367_vm13 = vmor %vm365_vm10, %vm366_vm11  ;;  %vm375_vm14 = vweird.f32 %v227_v27 }
 0x20e   :  { %v338_v63 = vsel %vm337_vm7, %v2095_v30, %v334_v54  ;;  %v361_v18 = vmul.f32 %v2097_v48, %v360_v62 }
 0x20f   :  { %v399_v2 = vmul.f32 %v338_v63, %v2532_v19  ;;  %v2630_v19 = vadd.f32 %v2432_v10, %v419_v60 }
 0x210   :  { %v362_v3 = vmul.f32 0.5, %v361_v18  ;;  %v196_v5 = vpop.xlane.xlu1 %195 }
 0x211   :  { %v511_v49 = vpop.f32.mrf.mxu0  ;;  %v418_v25 = vmul.f32 %v2421_v56, %v399_v2  ;;  %v212_v8 = vmul.f32 %v196_v5, %v2283_v20 }
 0x212   :  { %v363_v58 = vsub.f32 1.5, %v362_v3  ;;  %v512_v30 = vadd.f32 %v2575_v32, %v511_v49 }
 0x213   :  { %v2099_v9 = vpop.eup %2098  ;;  %v2627_v42 = vadd.f32 %v2432_v10, %v418_v25  ;;  %v228_v52 = vadd.f32 1e-05, %v212_v8 }
 0x214   :  { %v364_v16 = vmul.f32 %v2097_v48, %v363_v58  ;;  %v370_v17 = vmul.f32 %v2099_v9, %v227_v27  ;;  %vm376_vm15 = vweird.f32 %v2099_v9 }
 0x215   :  { %v448_v11 = vpack.c.bf16 %v2630_v19, %v2627_v42  ;;  %2100 = vrsqrt.f32 %v228_v52  ;;  %vm385_vm1 = vweird.f32 %v228_v52  ;;  %vm377_vm3 = vmor %vm375_vm14, %vm376_vm15 }
 0x216   :  { %v368_v39 = vsel %vm367_vm13, %v2097_v48, %v364_v16  ;;  %v371_v23 = vmul.f32 %v2099_v9, %v370_v17 }
 0x217   :  { %2008 = vmatmul.msk.bf16.gmra.mxu0 %vm45_vm0, %v448_v11  ;;  %v402_v24 = vmul.f32 %v368_v39, %v2541_v57 }
 0x218   :  { %v372_v36 = vmul.f32 0.5, %v371_v23 }
 0x219   :  { %v513_v61 = vpop.f32.mrf.mxu0  ;;  %v421_v41 = vmul.f32 %v2421_v56, %v402_v24 }
 0x21a   :  { %v514_v31 = vadd.f32 %v2575_v32, %v513_v61  ;;  %v373_v43 = vsub.f32 1.5, %v372_v36 }
 0x21b   :  { %v2101_v34 = vpop.eup %2100  ;;  %v2650_v59 = vadd.f32 %v2432_v10, %v421_v41 }
 0x21c   :  { %v2641_v51 = vpack.c.bf16 %v514_v31, %v512_v30  ;;  %v380_v38 = vmul.f32 %v2101_v34, %v228_v52  ;;  %vm386_vm2 = vweird.f32 %v2101_v34  ;;  %v374_v48 = vmul.f32 %v2099_v9, %v373_v43 }
 0x21d   :  { %v449_v53 = vpack.c.bf16 %v2650_v59, %v2653_v47  ;;  %vm387_vm4 = vmor %vm385_vm1, %vm386_vm2 }
 0x21e   :  { %550 = vrot.lane.b32.xlu2 %v2641_v51, %s2209_s4  ;;  %761 = vrot.lane.b32.xlu0 %v2641_v51, %s2210_s16  ;;  %v381_v57 = vmul.f32 %v2101_v34, %v380_v38  ;;  %v378_v54 = vsel %vm377_vm3, %v2099_v9, %v374_v48 }
 0x21f   :  { %v403_v63 = vmul.f32 %v378_v54, %v2552_v6 }
 0x220   :  { %v382_v44 = vmul.f32 0.5, %v381_v57 }
 0x221   :  { %v422_v60 = vmul.f32 %v2421_v56, %v403_v63 }
 0x222   :  { %v383_v45 = vsub.f32 1.5, %v382_v44 }
 0x223   :  { %v2674_v3 = vadd.f32 %v2432_v10, %v422_v60 }
 0x224   :  { %v384_v28 = vmul.f32 %v2101_v34, %v383_v45 }
 0x226   :  { %544 = vrot.lane.b32.xlu2 %v2581_v46, %s2209_s4  ;;  %755 = vrot.lane.b32.xlu0 %v2581_v46, %s2210_s16  ;;  %v388_v27 = vsel %vm387_vm4, %v2101_v34, %v384_v28 }
 0x227   :  { %2009 = vmatmul.msk.bf16.gmra.mxu0 %vm45_vm0, %v449_v53  ;;  %v404_v62 = vmul.f32 %v388_v27, %v2568_v26 }
 0x228   :  { %v547_v9 = vpop.permute.xlu1 %546 }
 0x229   :  { %v516_v18 = vpop.f32.mrf.mxu0  ;;  %v423_v2 = vmul.f32 %v2421_v56, %v404_v62  ;;  %v569_v13 = vsel %vm552_vm5, %v547_v9, 0 }
 0x22a   :  { %v517_v5 = vadd.f32 %v2575_v32, %v516_v18 }
 0x22b   :  { %v2671_v50 = vadd.f32 %v2432_v10, %v423_v2 }
 0x22d   :  { %v450_v6 = vpack.c.bf16 %v2671_v50, %v2674_v3 }
 0x22e   :  { %759 = vrot.lane.b32.xlu2 %v2605_v55, %s2210_s16  ;;  %751 = vrot.lane.b32.xlu0 %v2605_v55, %s2211_s17 }
 0x230   :  { %v758_v31 = vpop.permute.xlu1 %757 }
 0x231   :  { %v518_v26 = vpop.f32.mrf.mxu0  ;;  %v779_v34 = vsel %vm552_vm5, %v758_v31, 0 }
 0x232   :  { %v519_v56 = vadd.f32 %v2575_v32, %v518_v26 }
 0x234   :  { %v2685_v49 = vpack.c.bf16 %v519_v56, %v517_v5 }
 0x235   :  { %v549_v58 = vpop.permute.xlu0 %548 }
 0x236   :  { %747 = vrot.lane.b32.xlu2 %v2581_v46, %s2211_s17  ;;  %753 = vrot.lane.b32.xlu0 %v2641_v51, %s2211_s17  ;;  %v572_v8 = vsel %vm552_vm5, %v549_v58, 0 }
 0x237   :  { %2010 = vmatmul.msk.bf16.gmra.mxu0 %vm45_vm0, %v450_v6 }
 0x23e   :  { %1205 = vrot.lane.b32.xlu0 %v2685_v49, %s2211_s17 }
 0x278   :  { %v551_v10 = vpop.permute.xlu2 %550 }
 0x279   :  { %v575_v25 = vsel %vm552_vm5, %v551_v10, 0 }
 0x27a   :  { %581 = vmatpush.bf16.xpose.msra.mxu3 %v575_v25 }
 0x280   :  { %v545_v16 = vpop.permute.xlu2 %544 }
 0x281   :  { %v566_v52 = vsel %vm552_vm5, %v545_v16, 0 }
 0x282   :  { %582 = vmatpush.bf16.xpose.msra.mxu3 %v572_v8 }
 0x288   :  { %v760_v22 = vpop.permute.xlu2 %759 }
 0x289   :  { %v782_v23 = vsel %vm552_vm5, %v760_v22, 0 }
 0x28a   :  { %583 = vmatpush.bf16.xpose.msra.mxu3 %v569_v13 }
 0x290   :  { %v762_v17 = vpop.permute.xlu0 %761 }
 0x291   :  { %v785_v11 = vsel %vm552_vm5, %v762_v17, 0 }
 0x292   :  { %584 = vmatpush.bf16.xpose.msra.mxu3 %v566_v52 }
 0x294   :  { %v521_v39 = vpop.f32.mrf.mxu0 }
 0x295   :  { %v522_v61 = vadd.f32 %v2575_v32, %v521_v39 }
 0x298   :  { %v756_v38 = vpop.permute.xlu0 %755 }
 0x299   :  { %2011 = vmatmul.msk.bf16.vlgmr.msra.gmra.mxu3 %vm552_vm5, %v2581_v46  ;;  %v776_v41 = vsel %vm552_vm5, %v756_v38, 0 }
 0x29a   :  { %791 = vmatpush.bf16.xpose.msrb.mxu3 %v785_v11 }
 0x29c   :  { %v523_v24 = vpop.f32.mrf.mxu0 }
 0x29d   :  { %v524_v30 = vadd.f32 %v2575_v32, %v523_v24 }
 0x29f   :  { %v2699_v33 = vpack.c.bf16 %v524_v30, %v522_v61 }
 0x2a1   :  { %1207 = vrot.lane.b32.xlu0 %v2699_v33, %s2211_s17 }
 0x2a2   :  { %792 = vmatpush.bf16.xpose.msrb.mxu3 %v782_v23 }
 0x2a4   :  { %v526_v36 = vpop.f32.mrf.mxu0 }
 0x2a5   :  { %v527_v29 = vadd.f32 %v2575_v32, %v526_v36 }
 0x2a9   :  { %2012 = vmatmul.msk.bf16.gmra.mxu3 %vm552_vm5, %v2597_v1 }
 0x2aa   :  { %793 = vmatpush.bf16.xpose.msrb.mxu3 %v779_v34 }
 0x2ac   :  { %v528_v57 = vpop.f32.mrf.mxu0 }
 0x2ad   :  { %v529_v43 = vadd.f32 %v2575_v32, %v528_v57 }
 0x2af   :  { %v2709_v44 = vpack.c.bf16 %v529_v43, %v527_v29 }
 0x2b1   :  { %1217 = vrot.lane.b32.xlu1 %v2709_v44, %s2210_s16  ;;  %1209 = vrot.lane.b32.xlu0 %v2709_v44, %s2211_s17 }
 0x2b2   :  { %794 = vmatpush.bf16.xpose.msrb.mxu3 %v776_v41 }
 0x2b4   :  { %v531_v45 = vpop.f32.mrf.mxu0 }
 0x2b5   :  { %v532_v28 = vadd.f32 %v2575_v32, %v531_v45 }
 0x2b9   :  { %1213 = vrot.lane.b32.xlu1 %v2685_v49, %s2210_s16  ;;  %698 = vrot.lane.b32.xlu0 %v2605_v55, %s2212_s18 }
 0x2ba   :  { %2013 = vmatmul.msk.bf16.gmra.mxu3 %vm552_vm5, %v2605_v55 }
 0x2bc   :  { %v533_v48 = vpop.f32.mrf.mxu0 }
 0x2bd   :  { %v534_v53 = vadd.f32 %v2575_v32, %v533_v48  ;;  %v748_v32 = vpop.permute.xlu2 %747 }
 0x2bf   :  { %v2723_v27 = vpack.c.bf16 %v534_v53, %v532_v28 }
 0x2c1   :  { %1008 = vrot.lane.b32.xlu1 %v2709_v44, %s2209_s4  ;;  %909 = vrot.lane.b32.xlu0 %v2641_v51, %s2213_s19 }
 0x2c2   :  { %1219 = vrot.lane.b32.xlu2 %v2723_v27, %s2210_s16 }
 0x2c9   :  { %1004 = vrot.lane.b32.xlu1 %v2685_v49, %s2209_s4  ;;  %903 = vrot.lane.b32.xlu0 %v2581_v46, %s2213_s19 }
 0x2ca   :  { %1215 = vrot.lane.b32.xlu2 %v2699_v33, %s2210_s16  ;;  %2014 = vmatmul.msk.bf16.gmra.mxu3 %vm552_vm5, %v2641_v51 }
 0x2d1   :  { %700 = vrot.lane.b32.xlu1 %v2641_v51, %s2212_s18  ;;  %1363 = vrot.lane.b32.xlu0 %v2699_v33, %s2213_s19  ;;  %v750_v51 = vpop.permute.xlu1 %749 }
 0x2d2   :  { %1010 = vrot.lane.b32.xlu2 %v2723_v27, %s2209_s4 }
 0x2d9   :  { %694 = vrot.lane.b32.xlu1 %v2581_v46, %s2212_s18  ;;  %1156 = vrot.lane.b32.xlu0 %v2709_v44, %s2212_s18  ;;  %v752_v46 = vpop.permute.xlu0 %751 }
 0x2da   :  { %1006 = vrot.lane.b32.xlu2 %v2699_v33, %s2209_s4  ;;  %2019 = vmatmul.msk.bf16.vlgmr.msrb.gmra.mxu3 %vm552_vm5, %v748_v32 }
 0x2e1   :  { %905 = vrot.lane.b32.xlu1 %v2597_v1, %s2213_s19  ;;  %v754_v54 = vpop.permute.xlu0 %753 }
 0x2e2   :  { %1211 = vrot.lane.b32.xlu2 %v2723_v27, %s2211_s17 }
 0x2e9   :  { %1365 = vrot.lane.b32.xlu1 %v2709_v44, %s2213_s19  ;;  %v1206_v26 = vpop.permute.xlu0 %1205 }
 0x2ea   :  { %696 = vrot.lane.b32.xlu2 %v2597_v1, %s2212_s18  ;;  %2020 = vmatmul.msk.bf16.gmra.mxu3 %vm552_vm5, %v750_v51 }
 0x2f1   :  { %1158 = vrot.lane.b32.xlu1 %v2723_v27, %s2212_s18 }
 0x2f2   :  { %907 = vrot.lane.b32.xlu2 %v2605_v55, %s2213_s19 }
 0x2f9   :  { %1152 = vrot.lane.b32.xlu1 %v2685_v49, %s2212_s18 }
 0x2fa   :  { %1367 = vrot.lane.b32.xlu2 %v2723_v27, %s2213_s19  ;;  %2021 = vmatmul.msk.bf16.gmra.mxu3 %vm552_vm5, %v752_v46 }
 0x302   :  { %1361 = vrot.lane.b32.xlu2 %v2685_v49, %s2213_s19 }
 0x30a   :  { %1154 = vrot.lane.b32.xlu2 %v2699_v33, %s2212_s18  ;;  %2022 = vmatmul.msk.bf16.gmra.mxu3 %vm552_vm5, %v754_v54 }
 0x313   :  { %v1208_v10 = vpop.permute.xlu0 %1207 }
 0x31c   :  { %v1220_v1 = vpop.permute.xlu2 %1219  ;;  %v586_v62 = vpop.f32.mrf.mxu3 }
 0x31d   :  { %v1243_v55 = vsel %vm552_vm5, %v1220_v1, 0  ;;  %v606_v28 = vmul.f32 0.35355338, %v586_v62 }
 0x31e   :  { %1249 = vmatpush.bf16.xpose.msrb.mxu0 %v1243_v55 }
 0x323   :  { %v1218_v63 = vpop.permute.xlu1 %1217  ;;  %v1210_v17 = vpop.permute.xlu0 %1209 }
 0x324   :  { %v1216_v18 = vpop.permute.xlu2 %1215  ;;  %v588_v2 = vpop.f32.mrf.mxu3  ;;  %v1240_v60 = vsel %vm552_vm5, %v1218_v63, 0 }
 0x325   :  { %v1237_v58 = vsel %vm552_vm5, %v1216_v18, 0  ;;  %v607_v43 = vmul.f32 0.35355338, %v588_v2 }
 0x326   :  { %1250 = vmatpush.bf16.xpose.msrb.mxu0 %v1240_v60  ;;  %v615_v60 = vsel %vm614_vm6, %v606_v28, -inf }
 0x327   :  { %v616_v1 = vsel %vm614_vm6, %v607_v43, -inf }
 0x32b   :  { %v1214_v6 = vpop.permute.xlu1 %1213  ;;  %v699_v24 = vpop.permute.xlu0 %698 }
 0x32c   :  { %v1011_v56 = vpop.permute.xlu2 %1010  ;;  %v591_v5 = vpop.f32.mrf.mxu3  ;;  %v1234_v52 = vsel %vm552_vm5, %v1214_v6, 0 }
 0x32d   :  { %v1034_v25 = vsel %vm552_vm5, %v1011_v56, 0  ;;  %v608_v51 = vmul.f32 0.35355338, %v591_v5 }
 0x32e   :  { %1040 = vmatpush.bf16.xpose.msra.mxu1 %v1034_v25  ;;  %1251 = vmatpush.bf16.xpose.msrb.mxu0 %v1237_v58 }
 0x333   :  { %v1009_v8 = vpop.permute.xlu1 %1008  ;;  %v910_v36 = vpop.permute.xlu0 %909 }
 0x334   :  { %v1007_v9 = vpop.permute.xlu2 %1006  ;;  %v593_v13 = vpop.f32.mrf.mxu3  ;;  %v1031_v16 = vsel %vm552_vm5, %v1009_v8, 0 }
 0x335   :  { %v1028_v23 = vsel %vm552_vm5, %v1007_v9, 0  ;;  %v609_v46 = vmul.f32 0.35355338, %v593_v13 }
 0x336   :  { %1041 = vmatpush.bf16.xpose.msra.mxu1 %v1031_v16  ;;  %1252 = vmatpush.bf16.xpose.msrb.mxu0 %v1234_v52 }
 0x337   :  { %v618_v6 = vsel %vm614_vm6, %v609_v46, -inf }
 0x33b   :  { %v1005_v11 = vpop.permute.xlu1 %1004  ;;  %v904_v53 = vpop.permute.xlu0 %903 }
 0x33c   :  { %v2773_v39 = vpop.permute.xlu2 %1211  ;;  %v1025_v34 = vsel %vm552_vm5, %v1005_v11, 0 }
 0x33d   :  { %v596_v22 = vpop.f32.mrf.mxu3  ;;  %2035 = vmatmul.msk.bf16.vlgmr.msrb.gmra.mxu0 %vm552_vm5, %v1206_v26  ;;  %v617_v26 = vsel %vm614_vm6, %v608_v51, -inf }
 0x33e   :  { %1042 = vmatpush.bf16.xpose.msra.mxu1 %v1028_v23  ;;  %v2783_v45 = vmul.f32 0.35355338, %v596_v22 }
 0x340   :  { %v619_v55 = vsel %vm614_vm6, %v2783_v45, -inf }
 0x341   :  { %v620_v5 = vmax.f32 %v615_v60, %v619_v55 }
 0x343   :  { %v701_v61 = vpop.permute.xlu1 %700  ;;  %v2805_v13 = vpop.permute.xlu0 %1363 }
 0x344   :  { %v697_v30 = vpop.permute.xlu2 %696  ;;  %722 = vmatpush.bf16.msra.mxu2 %v701_v61 }
 0x345   :  { %v598_v31 = vpop.f32.mrf.mxu3 }
 0x346   :  { %1043 = vmatpush.bf16.xpose.msra.mxu1 %v1025_v34  ;;  %v2781_v29 = vmul.f32 0.35355338, %v598_v31 }
 0x348   :  { %723 = vmatpush.bf16.msra.mxu2 %v699_v24 }
 0x34b   :  { %v695_v38 = vpop.permute.xlu1 %694  ;;  %v1157_v34 = vpop.permute.xlu0 %1156 }
 0x34c   :  { %724 = vmatpush.bf16.msra.mxu2 %v697_v30  ;;  %v908_v41 = vpop.permute.xlu2 %907 }
 0x34d   :  { %v601_v57 = vpop.f32.mrf.mxu3  ;;  %2027 = vmatmul.msk.bf16.vlgmr.msra.gmra.mxu1 %vm552_vm5, %v2685_v49  ;;  %2036 = vmatmul.msk.bf16.gmra.mxu0 %vm552_vm5, %v1208_v10  ;;  %v621_v49 = vsel %vm614_vm6, %v2781_v29, -inf }
 0x34e   :  { %v2785_v48 = vmul.f32 0.35355338, %v601_v57  ;;  %v622_v62 = vmax.f32 %v616_v1, %v621_v49 }
 0x350   :  { %725 = vmatpush.bf16.msra.mxu2 %v695_v38  ;;  %v623_v63 = vsel %vm614_vm6, %v2785_v48, -inf  ;;  %v627_v58 = vmax.f32 %v620_v5, %v622_v62 }
 0x351   :  { %v624_v10 = vmax.f32 %v617_v26, %v623_v63 }
 0x353   :  { %v906_v32 = vpop.permute.xlu1 %905 }
 0x354   :  { %931 = vmatpush.bf16.msrb.mxu2 %v910_v36  ;;  %v2796_v2 = vpop.permute.xlu2 %1367 }
 0x355   :  { %v603_v54 = vpop.f32.mrf.mxu3 }
 0x356   :  { %v2794_v18 = vmul.f32 0.35355338, %v603_v54 }
 0x358   :  { %932 = vmatpush.bf16.msrb.mxu2 %v908_v41  ;;  %v625_v56 = vsel %vm614_vm6, %v2794_v18, -inf }
 0x359   :  { %v626_v25 = vmax.f32 %v618_v6, %v625_v56 }
 0x35b   :  { %v628_v8 = vmax.f32 %v624_v10, %v626_v25  ;;  %v2803_v9 = vpop.permute.xlu1 %1365 }
 0x35c   :  { %933 = vmatpush.bf16.msrb.mxu2 %v906_v32  ;;  %v2812_v23 = vpop.permute.xlu2 %1361 }
 0x35d   :  { %v629_v16 = vmax.f32 %v627_v58, %v628_v8  ;;  %v2807_v52 = vpop.f32.mrf.mxu3  ;;  %2028 = vmatmul.msk.bf16.gmra.mxu1 %vm552_vm5, %v2699_v33  ;;  %2037 = vmatmul.msk.bf16.gmra.mxu0 %vm552_vm5, %v1210_v17 }
 0x35f   :  { %v630_v11 = vrot.slane %v629_v16, 4 }
 0x360   :  { %934 = vmatpush.bf16.msrb.mxu2 %v904_v53 }
 0x361   :  { %v631_v22 = vmax.f32 %v629_v16, %v630_v11 }
 0x363   :  { %v632_v24 = vrot.slane %v631_v22, 2  ;;  %v1159_v61 = vpop.permute.xlu1 %1158 }
 0x364   :  { %1180 = vmatpush.bf16.msra.mxu3 %v1159_v61  ;;  %v1155_v17 = vpop.permute.xlu2 %1154 }
 0x365   :  { %v633_v30 = vmax.f32 %v631_v22, %v632_v24  ;;  %v2814_v31 = vpop.f32.mrf.mxu3 }
 0x367   :  { %v634_v36 = vrot.slane %v633_v30, 1 }
 0x368   :  { %1181 = vmatpush.bf16.msra.mxu3 %v1157_v34 }
 0x369   :  { %v635_v38 = vmax.f32 %v633_v30, %v634_v36 }
 0x36b   :  { %v636_v41 = vsub.f32 %v606_v28, %v635_v38  ;;  %v637_v57 = vsub.f32 %v607_v43, %v635_v38  ;;  %v638_v33 = vsub.f32 %v608_v51, %v635_v38  ;;  %v639_v32 = vsub.f32 %v609_v46, %v635_v38  ;;  %v1153_v43 = vpop.permute.xlu1 %1152 }
 0x36c   :  { %v640_v53 = vsub.f32 %v2783_v45, %v635_v38  ;;  %1182 = vmatpush.bf16.msra.mxu3 %v1155_v17  ;;  %v641_v63 = vsub.f32 %v2781_v29, %v635_v38  ;;  %v642_v51 = vsub.f32 %v2785_v48, %v635_v38  ;;  %v643_v46 = vsub.f32 %v2794_v18, %v635_v38 }
 0x36d   :  { %v644_v49 = vmul.f32 1.442695, %v636_v41  ;;  %v646_v54 = vmul.f32 1.442695, %v637_v57  ;;  %v648_v1 = vmul.f32 1.442695, %v638_v33  ;;  %v801_v55 = vpop.f32.mrf.mxu3  ;;  %2029 = vmatmul.msk.bf16.gmra.mxu1 %vm552_vm5, %v2709_v44  ;;  %2038 = vmatmul.msk.bf16.gmra.mxu0 %vm552_vm5, %v2773_v39 }
 0x36e   :  { %v650_v28 = vmul.f32 1.442695, %v639_v32  ;;  %v652_v45 = vmul.f32 1.442695, %v640_v53  ;;  %v654_v62 = vmul.f32 1.442695, %v641_v63 }
 0x36f   :  { %2102 = vpow2.f32 %v644_v49  ;;  %v656_v44 = vmul.f32 1.442695, %v642_v51  ;;  %v658_v29 = vmul.f32 1.442695, %v643_v46 }
 0x370   :  { %2104 = vpow2.f32 %v646_v54  ;;  %1183 = vmatpush.bf16.msra.mxu3 %v1153_v43 }
 0x371   :  { %2106 = vpow2.f32 %v648_v1 }
 0x372   :  { %2108 = vpow2.f32 %v650_v28 }
 0x373   :  { %2110 = vpow2.f32 %v652_v45  ;;  %v817_v45 = vmul.f32 0.35355338, %v2814_v31 }
 0x374   :  { %2112 = vpow2.f32 %v654_v62  ;;  %v816_v62 = vmul.f32 0.35355338, %v2807_v52 }
 0x375   :  { %v2103_v60 = vpop.eup %2102  ;;  %v803_v26 = vpop.f32.mrf.mxu3  ;;  %2114 = vpow2.f32 %v656_v44  ;;  %v818_v44 = vmul.f32 0.35355338, %v801_v55 }
 0x376   :  { %v2105_v39 = vpop.eup %2104  ;;  %v660_v6 = vsel %vm614_vm6, %v2103_v60, 0.0  ;;  %2116 = vpow2.f32 %v658_v29  ;;  %v819_v29 = vmul.f32 0.35355338, %v803_v26  ;;  %v824_v31 = vsel %vm614_vm6, %v816_v62, -inf }
 0x377   :  { %v2825_v56 = vpop.eup %2106  ;;  %v661_v48 = vsel %vm614_vm6, %v2105_v39, 0.0  ;;  %v826_v52 = vsel %vm614_vm6, %v818_v44, -inf }
 0x378   :  { %v2828_v5 = vpop.eup %2108  ;;  %v662_v10 = vadd.f32 %v661_v48, %v660_v6  ;;  %v663_v18 = vsel %vm614_vm6, %v2825_v56, 0.0  ;;  %v827_v55 = vsel %vm614_vm6, %v819_v29, -inf }
 0x379   :  { %v2111_v25 = vpop.eup %2110  ;;  %v665_v8 = vsel %vm614_vm6, %v2828_v5, 0.0 }
 0x37a   :  { %v664_v58 = vadd.f32 %v663_v18, %v662_v10  ;;  %v2113_v16 = vpop.eup %2112  ;;  %v667_v22 = vsel %vm614_vm6, %v2111_v25, 0.0  ;;  %v825_v18 = vsel %vm614_vm6, %v817_v45, -inf }
 0x37b   :  { %v2115_v61 = vpop.eup %2114  ;;  %v669_v34 = vsel %vm614_vm6, %v2113_v16, 0.0 }
 0x37c   :  { %v666_v11 = vadd.f32 %v665_v8, %v664_v58  ;;  %v2117_v36 = vpop.eup %2116  ;;  %v671_v41 = vsel %vm614_vm6, %v2115_v61, 0.0 }
 0x37d   :  { %v806_v24 = vpop.f32.mrf.mxu3  ;;  %2030 = vmatmul.msk.bf16.gmra.mxu1 %vm552_vm5, %v2723_v27  ;;  %v673_v33 = vsel %vm614_vm6, %v2117_v36, 0.0 }
 0x37e   :  { %v668_v30 = vadd.f32 %v667_v22, %v666_v11  ;;  %v820_v51 = vmul.f32 0.35355338, %v806_v24 }
 0x380   :  { %v670_v38 = vadd.f32 %v669_v34, %v668_v30  ;;  %v828_v48 = vsel %vm614_vm6, %v820_v51, -inf }
 0x381   :  { %v829_v26 = vmax.f32 %v824_v31, %v828_v48 }
 0x382   :  { %v672_v57 = vadd.f32 %v671_v41, %v670_v38 }
 0x384   :  { %v674_v32 = vadd.f32 %v673_v33, %v672_v57 }
 0x385   :  { %v808_v17 = vpop.f32.mrf.mxu3 }
 0x386   :  { %v675_v53 = vrot.slane %v674_v32, 4  ;;  %v2840_v43 = vmul.f32 0.35355338, %v808_v17 }
 0x388   :  { %v676_v49 = vadd.f32 %v675_v53, %v674_v32  ;;  %v830_v6 = vsel %vm614_vm6, %v2840_v43, -inf }
 0x389   :  { %v831_v11 = vmax.f32 %v825_v18, %v830_v6 }
 0x38a   :  { %v677_v54 = vrot.slane %v676_v49, 2 }
 0x38b   :  { %v836_v17 = vmax.f32 %v829_v26, %v831_v11 }
 0x38c   :  { %v678_v1 = vadd.f32 %v677_v54, %v676_v49 }
 0x38d   :  { %v811_v63 = vpop.f32.mrf.mxu3 }
 0x38e   :  { %v679_v28 = vrot.slane %v678_v1, 1  ;;  %v2843_v46 = vmul.f32 0.35355338, %v811_v63 }
 0x390   :  { %v680_v27 = vadd.f32 %v679_v28, %v678_v1  ;;  %v832_v58 = vsel %vm614_vm6, %v2843_v46, -inf }
 0x391   :  { %v833_v30 = vmax.f32 %v826_v52, %v832_v58 }
 0x392   :  { %2118 = vrcp.f32 %v680_v27 }
 0x395   :  { %v813_v10 = vpop.f32.mrf.mxu3 }
 0x396   :  { %v823_v8 = vmul.f32 0.35355338, %v813_v10 }
 0x398   :  { %v2119_v22 = vpop.eup %2118  ;;  %v834_v24 = vsel %vm614_vm6, %v823_v8, -inf }
 0x399   :  { %v835_v34 = vmax.f32 %v827_v55, %v834_v24  ;;  %v682_v38 = vmul.f32 %v2119_v22, %v2103_v60  ;;  %v683_v41 = vmul.f32 %v2119_v22, %v2105_v39  ;;  %v2856_v57 = vmul.f32 %v2119_v22, %v2111_v25 }
 0x39a   :  { %v2858_v33 = vmul.f32 %v2119_v22, %v2113_v16  ;;  %v2860_v32 = vmul.f32 %v2119_v22, %v2115_v61  ;;  %v2862_v54 = vmul.f32 %v2119_v22, %v2117_v36  ;;  %v684_v36 = vmul.f32 %v2119_v22, %v2825_v56 }
 0x39b   :  { %v837_v53 = vmax.f32 %v833_v30, %v835_v34  ;;  %v690_v49 = vpack.c.bf16 %v683_v41, %v682_v38  ;;  %v685_v28 = vmul.f32 %v2119_v22, %v2828_v5 }
 0x39c   :  { %v692_v1 = vpack.c.bf16 %v2858_v33, %v2856_v57  ;;  %v693_v60 = vpack.c.bf16 %v2862_v54, %v2860_v32 }
 0x39d   :  { %v838_v63 = vmax.f32 %v836_v17, %v837_v53  ;;  %2015 = vmatmul.msk.bf16.vlgmr.msra.gmra.mxu2 %vm614_vm6, %v690_v49  ;;  %v691_v48 = vpack.c.bf16 %v685_v28, %v684_v36 }
 0x39e   :  { %1389 = vmatpush.bf16.msra.mxu2 %v2796_v2 }
 0x39f   :  { %v839_v39 = vrot.slane %v838_v63, 4 }
 0x3a1   :  { %v840_v25 = vmax.f32 %v838_v63, %v839_v39 }
 0x3a2   :  { %1390 = vmatpush.bf16.msra.mxu2 %v2803_v9 }
 0x3a3   :  { %v841_v16 = vrot.slane %v840_v25, 2 }
 0x3a5   :  { %v842_v61 = vmax.f32 %v840_v25, %v841_v16 }
 0x3a6   :  { %1391 = vmatpush.bf16.msra.mxu2 %v2805_v13 }
 0x3a7   :  { %v843_v27 = vrot.slane %v842_v61, 1 }
 0x3a9   :  { %v844_v6 = vmax.f32 %v842_v61, %v843_v27 }
 0x3aa   :  { %1392 = vmatpush.bf16.msra.mxu2 %v2812_v23 }
 0x3ab   :  { %v845_v10 = vsub.f32 %v816_v62, %v844_v6  ;;  %v846_v18 = vsub.f32 %v817_v45, %v844_v6  ;;  %v847_v2 = vsub.f32 %v818_v44, %v844_v6  ;;  %v848_v58 = vsub.f32 %v819_v29, %v844_v6 }
 0x3ac   :  { %v849_v31 = vsub.f32 %v820_v51, %v844_v6  ;;  %v850_v13 = vsub.f32 %v2840_v43, %v844_v6  ;;  %v851_v5 = vsub.f32 %v2843_v46, %v844_v6  ;;  %v852_v23 = vsub.f32 %v823_v8, %v844_v6 }
 0x3ad   :  { %v853_v11 = vmul.f32 1.442695, %v845_v10  ;;  %v855_v9 = vmul.f32 1.442695, %v846_v18  ;;  %v857_v52 = vmul.f32 1.442695, %v847_v2  ;;  %2016 = vmatmul.msk.bf16.gmra.mxu2 %vm614_vm6, %v691_v48 }
 0x3ae   :  { %v859_v56 = vmul.f32 1.442695, %v848_v58  ;;  %v861_v22 = vmul.f32 1.442695, %v849_v31  ;;  %v863_v45 = vmul.f32 1.442695, %v850_v13 }
 0x3af   :  { %2120 = vpow2.f32 %v853_v11  ;;  %v865_v62 = vmul.f32 1.442695, %v851_v5  ;;  %v867_v29 = vmul.f32 1.442695, %v852_v23 }
 0x3b0   :  { %2122 = vpow2.f32 %v855_v9 }
 0x3b1   :  { %2124 = vpow2.f32 %v857_v52 }
 0x3b2   :  { %2126 = vpow2.f32 %v859_v56 }
 0x3b3   :  { %2128 = vpow2.f32 %v861_v22 }
 0x3b4   :  { %2130 = vpow2.f32 %v863_v45 }
 0x3b5   :  { %v2121_v51 = vpop.eup %2120  ;;  %2132 = vpow2.f32 %v865_v62 }
 0x3b6   :  { %v2123_v44 = vpop.eup %2122  ;;  %v869_v55 = vsel %vm614_vm6, %v2121_v51, 0.0  ;;  %2134 = vpow2.f32 %v867_v29 }
 0x3b7   :  { %v2125_v26 = vpop.eup %2124  ;;  %v870_v43 = vsel %vm614_vm6, %v2123_v44, 0.0 }
 0x3b8   :  { %v2127_v24 = vpop.eup %2126  ;;  %v871_v46 = vadd.f32 %v870_v43, %v869_v55  ;;  %v872_v30 = vsel %vm614_vm6, %v2125_v26, 0.0 }
 0x3b9   :  { %v2129_v34 = vpop.eup %2128  ;;  %v874_v41 = vsel %vm614_vm6, %v2127_v24, 0.0 }
 0x3ba   :  { %v873_v8 = vadd.f32 %v872_v30, %v871_v46  ;;  %v1254_v38 = vpop.f32.mrf.mxu0  ;;  %v2131_v57 = vpop.eup %2130  ;;  %v876_v17 = vsel %vm614_vm6, %v2129_v34, 0.0 }
 0x3bb   :  { %v2133_v53 = vpop.eup %2132  ;;  %v878_v63 = vsel %vm614_vm6, %v2131_v57, 0.0 }
 0x3bc   :  { %v875_v33 = vadd.f32 %v874_v41, %v873_v8  ;;  %v2135_v39 = vpop.eup %2134  ;;  %v880_v16 = vsel %vm614_vm6, %v2133_v53, 0.0 }
 0x3bd   :  { %2017 = vmatmul.msk.bf16.gmra.mxu2 %vm614_vm6, %v692_v1  ;;  %v882_v28 = vsel %vm614_vm6, %v2135_v39, 0.0 }
 0x3be   :  { %v877_v49 = vadd.f32 %v876_v17, %v875_v33  ;;  %v1274_v17 = vmul.f32 0.35355338, %v1254_v38 }
 0x3c0   :  { %v879_v25 = vadd.f32 %v878_v63, %v877_v49  ;;  %v1282_v38 = vsel %vm614_vm6, %v1274_v17, -inf }
 0x3c2   :  { %v881_v61 = vadd.f32 %v880_v16, %v879_v25  ;;  %v1256_v36 = vpop.f32.mrf.mxu0 }
 0x3c3   :  { %v1275_v41 = vmul.f32 0.35355338, %v1256_v36 }
 0x3c4   :  { %v883_v27 = vadd.f32 %v882_v28, %v881_v61 }
 0x3c6   :  { %v884_v6 = vrot.slane %v883_v27, 4 }
 0x3c8   :  { %v885_v48 = vadd.f32 %v884_v6, %v883_v27 }
 0x3ca   :  { %v886_v10 = vrot.slane %v885_v48, 2  ;;  %v2887_v18 = vpop.f32.mrf.mxu1  ;;  %v1259_v2 = vpop.f32.mrf.mxu0 }
 0x3cc   :  { %v887_v1 = vadd.f32 %v886_v10, %v885_v48 }
 0x3cd   :  { %2018 = vmatmul.msk.bf16.gmra.mxu2 %vm614_vm6, %v693_v60 }
 0x3ce   :  { %v888_v58 = vrot.slane %v887_v1, 1 }
 0x3d0   :  { %v889_v31 = vadd.f32 %v888_v58, %v887_v1 }
 0x3d2   :  { %2136 = vrcp.f32 %v889_v31  ;;  %v1047_v11 = vpop.f32.mrf.mxu1  ;;  %v1261_v9 = vpop.f32.mrf.mxu0 }
 0x3d3   :  { %v1277_v49 = vmul.f32 0.35355338, %v1261_v9 }
 0x3d5   :  { %v1285_v27 = vsel %vm614_vm6, %v1277_v49, -inf }
 0x3d8   :  { %v2137_v52 = vpop.eup %2136 }
 0x3d9   :  { %v891_v13 = vmul.f32 %v2137_v52, %v2121_v51  ;;  %v892_v56 = vmul.f32 %v2137_v52, %v2123_v44  ;;  %v895_v23 = vmul.f32 %v2137_v52, %v2129_v34  ;;  %v896_v45 = vmul.f32 %v2137_v52, %v2131_v57 }
 0x3da   :  { %v1050_v5 = vpop.f32.mrf.mxu1  ;;  %v1264_v22 = vpop.f32.mrf.mxu0  ;;  %v2893_v62 = vmul.f32 %v2137_v52, %v2133_v53  ;;  %v2895_v29 = vmul.f32 %v2137_v52, %v2135_v39  ;;  %v893_v46 = vmul.f32 %v2137_v52, %v2125_v26  ;;  %v894_v51 = vmul.f32 %v2137_v52, %v2127_v24 }
 0x3db   :  { %v899_v55 = vpack.c.bf16 %v892_v56, %v891_v13  ;;  %v901_v32 = vpack.c.bf16 %v896_v45, %v895_v23  ;;  %v2903_v57 = vmul.f32 0.35355338, %v1264_v22  ;;  %v1276_v53 = vmul.f32 0.35355338, %v1259_v2 }
 0x3dc   :  { %v902_v54 = vpack.c.bf16 %v2895_v29, %v2893_v62  ;;  %v900_v8 = vpack.c.bf16 %v894_v51, %v893_v46  ;;  %v1283_v39 = vsel %vm614_vm6, %v1275_v41, -inf  ;;  %v2924_v22 = vmul.f32 0.35355338, %v1047_v11 }
 0x3dd   :  { %2023 = vmatmul.msk.bf16.vlgmr.msrb.gmra.mxu2 %vm614_vm6, %v899_v55  ;;  %v1286_v25 = vsel %vm614_vm6, %v2903_v57, -inf  ;;  %v1284_v28 = vsel %vm614_vm6, %v1276_v53, -inf  ;;  %v2933_v46 = vmul.f32 0.35355338, %v2887_v18  ;;  %v2935_v51 = vmul.f32 0.35355338, %v1050_v5 }
 0x3de   :  { %v1287_v48 = vmax.f32 %v1282_v38, %v1286_v25  ;;  %v1074_v11 = vsel %vm614_vm6, %v2924_v22, -inf }
 0x3df   :  { %v1075_v25 = vsel %vm614_vm6, %v2935_v51, -inf }
 0x3e2   :  { %v1052_v60 = vpop.f32.mrf.mxu1  ;;  %v1266_v43 = vpop.f32.mrf.mxu0 }
 0x3e3   :  { %v2900_v34 = vmul.f32 0.35355338, %v1266_v43  ;;  %v2930_v43 = vmul.f32 0.35355338, %v1052_v60 }
 0x3e5   :  { %v1288_v63 = vsel %vm614_vm6, %v2900_v34, -inf  ;;  %v1076_v5 = vsel %vm614_vm6, %v2930_v43, -inf }
 0x3e6   :  { %v1289_v36 = vmax.f32 %v1283_v39, %v1288_v63  ;;  %v1073_v39 = vsel %vm614_vm6, %v2933_v46, -inf }
 0x3e8   :  { %v1294_v1 = vmax.f32 %v1287_v48, %v1289_v36 }
 0x3ea   :  { %v1055_v44 = vpop.f32.mrf.mxu1  ;;  %v1269_v30 = vpop.f32.mrf.mxu0 }
 0x3eb   :  { %v2905_v33 = vmul.f32 0.35355338, %v1269_v30  ;;  %v2926_v23 = vmul.f32 0.35355338, %v1055_v44 }
 0x3ed   :  { %2024 = vmatmul.msk.bf16.gmra.mxu2 %vm614_vm6, %v900_v8  ;;  %v1290_v16 = vsel %vm614_vm6, %v2905_v33, -inf  ;;  %v1077_v44 = vsel %vm614_vm6, %v2926_v23, -inf }
 0x3ee   :  { %v1291_v10 = vmax.f32 %v1284_v28, %v1290_v16  ;;  %v1078_v38 = vmax.f32 %v1073_v39, %v1077_v44 }
 0x3f2   :  { %v1057_v26 = vpop.f32.mrf.mxu1  ;;  %v1271_v24 = vpop.f32.mrf.mxu0 }
 0x3f3   :  { %v2914_v61 = vmul.f32 0.35355338, %v1271_v24  ;;  %v2922_v13 = vmul.f32 0.35355338, %v1057_v26 }
 0x3f5   :  { %v1292_v6 = vsel %vm614_vm6, %v2914_v61, -inf }
 0x3f6   :  { %v1293_v2 = vmax.f32 %v1285_v27, %v1292_v6 }
 0x3f8   :  { %v1295_v58 = vmax.f32 %v1291_v10, %v1293_v2 }
 0x3fa   :  { %v1296_v31 = vmax.f32 %v1294_v1, %v1295_v58  ;;  %v1060_v9 = vpop.f32.mrf.mxu1 }
 0x3fb   :  { %v2928_v55 = vmul.f32 0.35355338, %v1060_v9 }
 0x3fc   :  { %v1297_v52 = vrot.slane %v1296_v31, 4 }
 0x3fd   :  { %2025 = vmatmul.msk.bf16.gmra.mxu2 %vm614_vm6, %v901_v32  ;;  %v1079_v32 = vsel %vm614_vm6, %v2922_v13, -inf  ;;  %v1081_v18 = vsel %vm614_vm6, %v2928_v55, -inf }
 0x3fe   :  { %v1298_v56 = vmax.f32 %v1296_v31, %v1297_v52  ;;  %v1080_v26 = vmax.f32 %v1074_v11, %v1079_v32  ;;  %v1082_v28 = vmax.f32 %v1075_v25, %v1081_v18 }
 0x400   :  { %v1299_v45 = vrot.slane %v1298_v56, 2  ;;  %v1085_v2 = vmax.f32 %v1078_v38, %v1080_v26 }
 0x402   :  { %v1300_v30 = vmax.f32 %v1298_v56, %v1299_v45  ;;  %v1062_v8 = vpop.f32.mrf.mxu1 }
 0x403   :  { %v2939_v63 = vmul.f32 0.35355338, %v1062_v8 }
 0x404   :  { %v1301_v60 = vrot.slane %v1300_v30, 1 }
 0x405   :  { %v1083_v24 = vsel %vm614_vm6, %v2939_v63, -inf }
 0x406   :  { %v1302_v16 = vmax.f32 %v1300_v30, %v1301_v60  ;;  %v1084_v36 = vmax.f32 %v1076_v5, %v1083_v24 }
 0x408   :  { %v1303_v27 = vsub.f32 %v1274_v17, %v1302_v16  ;;  %v1304_v6 = vsub.f32 %v1275_v41, %v1302_v16  ;;  %v1305_v48 = vsub.f32 %v1276_v53, %v1302_v16  ;;  %v1306_v10 = vsub.f32 %v1277_v49, %v1302_v16 }
 0x409   :  { %v1307_v1 = vsub.f32 %v2903_v57, %v1302_v16  ;;  %v1086_v52 = vmax.f32 %v1082_v28, %v1084_v36  ;;  %v1308_v56 = vsub.f32 %v2900_v34, %v1302_v16  ;;  %v1309_v30 = vsub.f32 %v2905_v33, %v1302_v16 }
 0x40a   :  { %v1311_v58 = vmul.f32 1.442695, %v1303_v27  ;;  %v1313_v31 = vmul.f32 1.442695, %v1304_v6  ;;  %v1315_v9 = vmul.f32 1.442695, %v1305_v48  ;;  %v1310_v57 = vsub.f32 %v2914_v61, %v1302_v16 }
 0x40b   :  { %v1317_v45 = vmul.f32 1.442695, %v1306_v10  ;;  %v1087_v32 = vmax.f32 %v1085_v2, %v1086_v52  ;;  %v1319_v8 = vmul.f32 1.442695, %v1307_v1  ;;  %v1321_v17 = vmul.f32 1.442695, %v1308_v56 }
 0x40c   :  { %2138 = vpow2.f32 %v1311_v58  ;;  %v1323_v34 = vmul.f32 1.442695, %v1309_v30  ;;  %v1325_v44 = vmul.f32 1.442695, %v1310_v57 }
 0x40d   :  { %2140 = vpow2.f32 %v1313_v31  ;;  %2026 = vmatmul.msk.bf16.gmra.mxu2 %vm614_vm6, %v902_v54  ;;  %v1088_v41 = vrot.slane %v1087_v32, 4 }
 0x40e   :  { %2142 = vpow2.f32 %v1315_v9 }
 0x40f   :  { %2144 = vpow2.f32 %v1317_v45  ;;  %v1089_v53 = vmax.f32 %v1087_v32, %v1088_v41 }
 0x410   :  { %2146 = vpow2.f32 %v1319_v8 }
 0x411   :  { %v1090_v11 = vrot.slane %v1089_v53, 2  ;;  %2148 = vpow2.f32 %v1321_v17 }
 0x412   :  { %v2963_v49 = vpop.eup %2138  ;;  %2150 = vpow2.f32 %v1323_v34 }
 0x413   :  { %v2965_v33 = vpop.eup %2140  ;;  %v1327_v62 = vsel %vm614_vm6, %v2963_v49, 0.0  ;;  %v1091_v61 = vmax.f32 %v1089_v53, %v1090_v11  ;;  %2152 = vpow2.f32 %v1325_v44 }
 0x414   :  { %v2969_v29 = vpop.eup %2142  ;;  %v1328_v54 = vsel %vm614_vm6, %v2965_v33, 0.0 }
 0x415   :  { %v2973_v60 = vpop.eup %2144  ;;  %v1329_v18 = vadd.f32 %v1328_v54, %v1327_v62  ;;  %v1330_v5 = vsel %vm614_vm6, %v2969_v29, 0.0  ;;  %v1092_v26 = vrot.slane %v1091_v61, 1 }
 0x416   :  { %v2977_v24 = vpop.eup %2146  ;;  %v1332_v25 = vsel %vm614_vm6, %v2973_v60, 0.0 }
 0x417   :  { %v1331_v39 = vadd.f32 %v1330_v5, %v1329_v18  ;;  %v1093_v16 = vmax.f32 %v1091_v61, %v1092_v26  ;;  %v2981_v36 = vpop.eup %2148  ;;  %v1334_v28 = vsel %vm614_vm6, %v2977_v24, 0.0 }
 0x418   :  { %v2988_v10 = vpop.eup %2150  ;;  %v1336_v31 = vsel %vm614_vm6, %v2981_v36, 0.0 }
 0x419   :  { %v1333_v38 = vadd.f32 %v1332_v25, %v1331_v39  ;;  %v1094_v27 = vsub.f32 %v2933_v46, %v1093_v16  ;;  %v1095_v6 = vsub.f32 %v2924_v22, %v1093_v16  ;;  %v1096_v48 = vsub.f32 %v2935_v51, %v1093_v16  ;;  %v2994_v56 = vpop.eup %2152 }
 0x41a   :  { %v1097_v1 = vsub.f32 %v2930_v43, %v1093_v16  ;;  %v1098_v58 = vsub.f32 %v2926_v23, %v1093_v16  ;;  %v1099_v46 = vsub.f32 %v2922_v13, %v1093_v16  ;;  %v1338_v51 = vsel %vm614_vm6, %v2988_v10, 0.0 }
 0x41b   :  { %v1335_v2 = vadd.f32 %v1334_v28, %v1333_v38  ;;  %v1102_v9 = vmul.f32 1.442695, %v1094_v27  ;;  %v1104_v52 = vmul.f32 1.442695, %v1095_v6  ;;  %v1106_v22 = vmul.f32 1.442695, %v1096_v48 }
 0x41c   :  { %v1108_v32 = vmul.f32 1.442695, %v1097_v1  ;;  %v1100_v43 = vsub.f32 %v2928_v55, %v1093_v16  ;;  %v1110_v23 = vmul.f32 1.442695, %v1098_v58  ;;  %v1340_v8 = vsel %vm614_vm6, %v2994_v56, 0.0 }
 0x41d   :  { %v1337_v45 = vadd.f32 %v1336_v31, %v1335_v2  ;;  %2154 = vpow2.f32 %v1102_v9  ;;  %v1101_v13 = vsub.f32 %v2939_v63, %v1093_v16  ;;  %v1112_v17 = vmul.f32 1.442695, %v1099_v46 }
 0x41e   :  { %2156 = vpow2.f32 %v1104_v52  ;;  %v1114_v34 = vmul.f32 1.442695, %v1100_v43 }
 0x41f   :  { %v1339_v30 = vadd.f32 %v1338_v51, %v1337_v45  ;;  %2158 = vpow2.f32 %v1106_v22  ;;  %v1116_v55 = vmul.f32 1.442695, %v1101_v13 }
 0x420   :  { %v3002_v41 = vpop.f32.mrf.mxu2  ;;  %2160 = vpow2.f32 %v1108_v32 }
 0x421   :  { %v1341_v57 = vadd.f32 %v1340_v8, %v1339_v30  ;;  %2162 = vpow2.f32 %v1110_v23 }
 0x422   :  { %2164 = vpow2.f32 %v1112_v17 }
 0x423   :  { %v1342_v53 = vrot.slane %v1341_v57, 4  ;;  %v2155_v11 = vpop.eup %2154  ;;  %2166 = vpow2.f32 %v1114_v34 }
 0x424   :  { %v2157_v44 = vpop.eup %2156  ;;  %v1118_v54 = vsel %vm614_vm6, %v2155_v11, 0.0  ;;  %2168 = vpow2.f32 %v1116_v55 }
 0x425   :  { %v1343_v62 = vadd.f32 %v1342_v53, %v1341_v57  ;;  %v3006_v61 = vpop.eup %2158  ;;  %v1119_v18 = vsel %vm614_vm6, %v2157_v44, 0.0 }
 0x426   :  { %v3009_v5 = vpop.eup %2160  ;;  %v1120_v63 = vadd.f32 %v1119_v18, %v1118_v54  ;;  %v1121_v39 = vsel %vm614_vm6, %v3006_v61, 0.0 }
 0x427   :  { %v1344_v26 = vrot.slane %v1343_v62, 2  ;;  %v2163_v16 = vpop.eup %2162  ;;  %v1123_v27 = vsel %vm614_vm6, %v3009_v5, 0.0 }
 0x428   :  { %v3013_v25 = vpop.f32.mrf.mxu2  ;;  %v1122_v28 = vadd.f32 %v1121_v39, %v1120_v63  ;;  %v2165_v6 = vpop.eup %2164  ;;  %v1125_v1 = vsel %vm614_vm6, %v2163_v16, 0.0 }
 0x429   :  { %v1345_v38 = vadd.f32 %v1344_v26, %v1343_v62  ;;  %v2167_v58 = vpop.eup %2166  ;;  %v1127_v52 = vsel %vm614_vm6, %v2165_v6, 0.0 }
 0x42a   :  { %v1124_v2 = vadd.f32 %v1123_v27, %v1122_v28  ;;  %v2169_v45 = vpop.eup %2168  ;;  %v1129_v22 = vsel %vm614_vm6, %v2167_v58, 0.0 }
 0x42b   :  { %v1346_v48 = vrot.slane %v1345_v38, 1  ;;  %v1131_v30 = vsel %vm614_vm6, %v2169_v45, 0.0 }
 0x42c   :  { %v1126_v9 = vadd.f32 %v1125_v1, %v1124_v2 }
 0x42d   :  { %v1347_v31 = vadd.f32 %v1346_v48, %v1345_v38 }
 0x42e   :  { %v1128_v46 = vadd.f32 %v1127_v52, %v1126_v9 }
 0x42f   :  { %2170 = vrcp.f32 %v1347_v31 }
 0x430   :  { %v3020_v32 = vpop.f32.mrf.mxu2  ;;  %v1130_v51 = vadd.f32 %v1129_v22, %v1128_v46 }
 0x432   :  { %v1132_v43 = vadd.f32 %v1131_v30, %v1130_v51 }
 0x434   :  { %v1133_v8 = vrot.slane %v1132_v43, 4 }
 0x435   :  { %v2171_v23 = vpop.eup %2170 }
 0x436   :  { %v1349_v57 = vmul.f32 %v2171_v23, %v2963_v49  ;;  %v1350_v13 = vmul.f32 %v2171_v23, %v2965_v33  ;;  %v1134_v17 = vadd.f32 %v1133_v8, %v1132_v43  ;;  %v1353_v53 = vmul.f32 %v2171_v23, %v2977_v24 }
 0x437   :  { %v1354_v34 = vmul.f32 %v2171_v23, %v2981_v36  ;;  %v1355_v62 = vmul.f32 %v2171_v23, %v2988_v10  ;;  %v1356_v18 = vmul.f32 %v2171_v23, %v2994_v56  ;;  %v1351_v24 = vmul.f32 %v2171_v23, %v2969_v29 }
 0x438   :  { %v3028_v55 = vpop.f32.mrf.mxu2  ;;  %v1357_v54 = vpack.c.bf16 %v1350_v13, %v1349_v57  ;;  %v1135_v26 = vrot.slane %v1134_v17, 2  ;;  %v1352_v36 = vmul.f32 %v2171_v23, %v2973_v60 }
 0x439   :  { %v1359_v63 = vpack.c.bf16 %v1354_v34, %v1353_v53  ;;  %v1360_v39 = vpack.c.bf16 %v1356_v18, %v1355_v62 }
 0x43a   :  { %2039 = vmatmul.msk.bf16.vlgmr.msra.gmra.mxu2 %vm614_vm6, %v1357_v54  ;;  %v1136_v49 = vadd.f32 %v1135_v26, %v1134_v17  ;;  %v1358_v2 = vpack.c.bf16 %v1352_v36, %v1351_v24 }
 0x43c   :  { %v1137_v38 = vrot.slane %v1136_v49, 1 }
 0x43e   :  { %v1138_v33 = vadd.f32 %v1137_v38, %v1136_v49 }
 0x440   :  { %v3032_v28 = vpop.f32.mrf.mxu2  ;;  %2172 = vrcp.f32 %v1138_v33 }
 0x446   :  { %v2173_v10 = vpop.eup %2172 }
 0x447   :  { %v1140_v48 = vmul.f32 %v2173_v10, %v2155_v11  ;;  %v1141_v56 = vmul.f32 %v2173_v10, %v2157_v44  ;;  %v1144_v1 = vmul.f32 %v2173_v10, %v2163_v16  ;;  %v1145_v31 = vmul.f32 %v2173_v10, %v2165_v6 }
 0x448   :  { %v3036_v27 = vpop.f32.mrf.mxu2  ;;  %v1146_v9 = vmul.f32 %v2173_v10, %v2167_v58  ;;  %v1147_v52 = vmul.f32 %v2173_v10, %v2169_v45  ;;  %v1142_v60 = vmul.f32 %v2173_v10, %v3006_v61  ;;  %v1143_v30 = vmul.f32 %v2173_v10, %v3009_v5 }
 0x449   :  { %v1148_v46 = vpack.c.bf16 %v1141_v56, %v1140_v48  ;;  %v1150_v22 = vpack.c.bf16 %v1145_v31, %v1144_v1 }
 0x44a   :  { %2040 = vmatmul.msk.bf16.gmra.mxu2 %vm614_vm6, %v1358_v2  ;;  %v1151_v51 = vpack.c.bf16 %v1147_v52, %v1146_v9  ;;  %v1149_v44 = vpack.c.bf16 %v1143_v30, %v1142_v60 }
 0x44b   :  { %2031 = vmatmul.msk.bf16.vlgmr.msra.gmra.mxu3 %vm614_vm6, %v1148_v46 }
 0x450   :  { %v3040_v29 = vpop.f32.mrf.mxu2 }
 0x458   :  { %v3044_v11 = vpop.f32.mrf.mxu2 }
 0x45a   :  { %2041 = vmatmul.msk.bf16.gmra.mxu2 %vm614_vm6, %v1359_v63 }
 0x45b   :  { %2032 = vmatmul.msk.bf16.gmra.mxu3 %vm614_vm6, %v1149_v44 }
 0x460   :  { %v936_v16 = vpop.f32.mrf.mxu2 }
 0x461   :  { %964 = vrot.lane.b32.xlu0 %v936_v16, %s2214_s20 }
 0x468   :  { %v938_v6 = vpop.f32.mrf.mxu2 }
 0x469   :  { %966 = vrot.lane.b32.xlu2 %v938_v6, %s2214_s20 }
 0x46a   :  { %2042 = vmatmul.msk.bf16.gmra.mxu2 %vm614_vm6, %v1360_v39 }
 0x46b   :  { %2033 = vmatmul.msk.bf16.gmra.mxu3 %vm614_vm6, %v1150_v22 }
 0x470   :  { %v941_v61 = vpop.f32.mrf.mxu2 }
 0x471   :  { %968 = vrot.lane.b32.xlu1 %v941_v61, %s2214_s20 }
 0x478   :  { %v943_v5 = vpop.f32.mrf.mxu2 }
 0x479   :  { %970 = vrot.lane.b32.xlu0 %v943_v5, %s2214_s20 }
 0x47b   :  { %2034 = vmatmul.msk.bf16.gmra.mxu3 %vm614_vm6, %v1151_v51 }
 0x480   :  { %v946_v58 = vpop.f32.mrf.mxu2 }
 0x481   :  { %972 = vrot.lane.b32.xlu2 %v946_v58, %s2214_s20 }
 0x488   :  { %v948_v45 = vpop.f32.mrf.mxu2 }
 0x489   :  { %974 = vrot.lane.b32.xlu1 %v948_v45, %s2214_s20 }
 0x490   :  { %v951_v43 = vpop.f32.mrf.mxu2 }
 0x491   :  { %976 = vrot.lane.b32.xlu1 %v951_v43, %s2214_s20 }
 0x498   :  { %v953_v23 = vpop.f32.mrf.mxu2 }
 0x499   :  { %978 = vrot.lane.b32.xlu1 %v953_v23, %s2214_s20 }
 0x4bd   :  { %v1394_v8 = vpop.f32.mrf.mxu2 }
 0x4be   :  { %1422 = vrot.lane.b32.xlu2 %v1394_v8, %s2214_s20 }
 0x4c3   :  { %v967_v53 = vpop.permute.xlu2 %966 }
 0x4c4   :  { %v989_v34 = vsel %vm552_vm5, %v3013_v25, %v967_v53 }
 0x4c5   :  { %v1396_v57 = vpop.f32.mrf.mxu2  ;;  %v3066_v62 = vadd.f32 %v989_v34, %v2450_v21 }
 0x4c6   :  { %1424 = vrot.lane.b32.xlu0 %v1396_v57, %s2214_s20 }
 0x4c7   :  { %v1473_v54 = vsel %vm45_vm0, %v3066_v62, 0.0 }
 0x4cd   :  { %v1399_v13 = vpop.f32.mrf.mxu2 }
 0x4ce   :  { %1426 = vrot.lane.b32.xlu0 %v1399_v13, %s2214_s20  ;;  %v1185_v46 = vpop.f32.mrf.mxu3 }
 0x4d3   :  { %v965_v18 = vpop.permute.xlu0 %964 }
 0x4d4   :  { %v988_v26 = vsel %vm552_vm5, %v3002_v41, %v965_v18 }
 0x4d5   :  { %v1401_v17 = vpop.f32.mrf.mxu2  ;;  %v3073_v63 = vadd.f32 %v988_v26, %v2453_v12 }
 0x4d6   :  { %1428 = vrot.lane.b32.xlu1 %v1401_v17, %s2214_s20  ;;  %v1187_v22 = vpop.f32.mrf.mxu3 }
 0x4d7   :  { %v1470_v38 = vsel %vm45_vm0, %v3073_v63, 0.0 }
 0x4db   :  { %v973_v36 = vpop.permute.xlu2 %972 }
 0x4de   :  { %v3120_v51 = vpop.f32.mrf.mxu3 }
 0x4e3   :  { %v969_v39 = vpop.permute.xlu1 %968 }
 0x4e4   :  { %v990_v21 = vsel %vm552_vm5, %v3020_v32, %v969_v39 }
 0x4e5   :  { %v3082_v33 = vadd.f32 %v990_v21, %v2498_v35  ;;  %v992_v35 = vsel %vm552_vm5, %v3032_v28, %v973_v36 }
 0x4e7   :  { %1474 = vadd.xlane.f32.xlu2 %v1473_v54 }
 0x4eb   :  { %v971_v49 = vpop.permute.xlu0 %970 }
 0x4ec   :  { %v991_v25 = vsel %vm552_vm5, %v3028_v55, %v971_v49  ;;  %v1476_v55 = vsel %vm45_vm0, %v3082_v33, 0.0 }
 0x4ed   :  { %v3085_v41 = vadd.f32 %v991_v25, %v2504_v4 }
 0x4ef   :  { %v1479_v4 = vsel %vm45_vm0, %v3085_v41, 0.0 }
 0x4f8   :  { %1471 = vadd.xlane.f32.xlu0 %v1470_v38 }
 0x4fb   :  { %v975_v24 = vpop.permute.xlu1 %974 }
 0x4fc   :  { %v993_v12 = vsel %vm552_vm5, %v3036_v27, %v975_v24  ;;  %v3101_v27 = vadd.f32 %v992_v35, %v2522_v37 }
 0x4fd   :  { %v3090_v10 = vadd.f32 %v993_v12, %v2519_v14 }
 0x4fe   :  { %v1482_v28 = vsel %vm45_vm0, %v3101_v27, 0.0 }
 0x4ff   :  { %v1485_v32 = vsel %vm45_vm0, %v3090_v10, 0.0 }
 0x500   :  { %1486 = vadd.xlane.f32.xlu2 %v1485_v32  ;;  %1477 = vadd.xlane.f32.xlu1 %v1476_v55 }
 0x501   :  { %1480 = vadd.xlane.f32.xlu0 %v1479_v4 }
 0x503   :  { %v977_v14 = vpop.permute.xlu1 %976 }
 0x504   :  { %v994_v48 = vsel %vm552_vm5, %v3040_v29, %v977_v14 }
 0x505   :  { %v3106_v56 = vadd.f32 %v994_v48, %v2555_v7  ;;  %v1404_v7 = vpop.f32.mrf.mxu2 }
 0x507   :  { %v1488_v2 = vsel %vm45_vm0, %v3106_v56, 0.0 }
 0x508   :  { %1489 = vadd.xlane.f32.xlu2 %v1488_v2  ;;  %1483 = vadd.xlane.f32.xlu1 %v1482_v28 }
 0x50b   :  { %v979_v1 = vpop.permute.xlu1 %978 }
 0x50c   :  { %v995_v37 = vsel %vm552_vm5, %v3044_v11, %v979_v1  ;;  %v1192_v11 = vpop.f32.mrf.mxu3 }
 0x50d   :  { %v3115_v31 = vadd.f32 %v995_v37, %v2558_v15  ;;  %v1406_v52 = vpop.f32.mrf.mxu2 }
 0x50f   :  { %v1491_v9 = vsel %vm45_vm0, %v3115_v31, 0.0 }
 0x510   :  { %1492 = vadd.xlane.f32.xlu2 %v1491_v9 }
 0x514   :  { %v3159_v24 = vpop.f32.mrf.mxu3 }
 0x515   :  { %v1409_v1 = vpop.f32.mrf.mxu2 }
 0x518   :  { %v1423_v6 = vpop.permute.xlu2 %1422 }
 0x519   :  { %v1446_v38 = vsel %vm552_vm5, %v1185_v46, %v1423_v6 }
 0x51a   :  { %v3157_v25 = vadd.f32 %v1446_v38, %v2587_v40 }
 0x51c   :  { %v1494_v12 = vsel %vm45_vm0, %v3157_v25, 0.0  ;;  %v1197_v4 = vpop.f32.mrf.mxu3 }
 0x51d   :  { %v1411_v9 = vpop.f32.mrf.mxu2 }
 0x528   :  { %1432 = vrot.lane.b32.xlu2 %v1406_v52, %s2214_s20 }
 0x538   :  { %v1425_v29 = vpop.permute.xlu0 %1424 }
 0x539   :  { %v1447_v60 = vsel %vm552_vm5, %v1187_v22, %v1425_v29 }
 0x53a   :  { %v3124_v30 = vadd.f32 %v1447_v60, %v2590_v0 }
 0x53c   :  { %v1497_v44 = vsel %vm45_vm0, %v3124_v30, 0.0 }
 0x540   :  { %v1427_v8 = vpop.permute.xlu0 %1426 }
 0x548   :  { %v1429_v15 = vpop.permute.xlu1 %1428 }
 0x549   :  { %v1449_v16 = vsel %vm552_vm5, %v1192_v11, %v1429_v15 }
 0x54a   :  { %v3130_v61 = vadd.f32 %v1449_v16, %v2630_v19 }
 0x54c   :  { %v1503_v5 = vsel %vm45_vm0, %v3130_v61, 0.0 }
 0x551   :  { %1498 = vadd.xlane.f32.xlu2 %v1497_v44  ;;  %v1448_v44 = vsel %vm552_vm5, %v3120_v51, %v1427_v8 }
 0x552   :  { %v3196_v16 = vadd.f32 %v1448_v44, %v2627_v42 }
 0x559   :  { %1504 = vadd.xlane.f32.xlu2 %v1503_v5 }
 0x55a   :  { %v1475_v58 = vpop.xlane.xlu2 %1474 }
 0x55b   :  { %v1519_v0 = vmul.f32 %v1475_v58, %v2283_v20  ;;  %v1500_v58 = vsel %vm45_vm0, %v3196_v16, 0.0 }
 0x55d   :  { %v3136_v45 = vsub.f32 %v3066_v62, %v1519_v0 }
 0x55f   :  { %v1551_v43 = vmul.f32 %v3136_v45, %v3136_v45 }
 0x561   :  { %v1569_v23 = vsel %vm45_vm0, %v1551_v43, 0.0 }
 0x562   :  { %1570 = vadd.xlane.f32.xlu1 %v1569_v23 }
 0x56b   :  { %v1472_v57 = vpop.xlane.xlu0 %1471 }
 0x56c   :  { %v1518_v19 = vmul.f32 %v1472_v57, %v2283_v20 }
 0x56e   :  { %v3143_v13 = vsub.f32 %v3073_v63, %v1518_v19 }
 0x570   :  { %v1550_v17 = vmul.f32 %v3143_v13, %v3143_v13 }
 0x572   :  { %v1566_v53 = vsel %vm45_vm0, %v1550_v17, 0.0 }
 0x573   :  { %v1487_v34 = vpop.xlane.xlu2 %1486  ;;  %v1478_v54 = vpop.xlane.xlu1 %1477  ;;  %1567 = vadd.xlane.f32.xlu0 %v1566_v53 }
 0x574   :  { %v1520_v18 = vmul.f32 %v1478_v54, %v2283_v20  ;;  %v1481_v37 = vpop.xlane.xlu0 %1480  ;;  %v1523_v0 = vmul.f32 %v1487_v34, %v2283_v20 }
 0x576   :  { %v3150_v26 = vsub.f32 %v3082_v33, %v1520_v18  ;;  %v3208_v51 = vsub.f32 %v3090_v10, %v1523_v0 }
 0x578   :  { %v1552_v39 = vmul.f32 %v3150_v26, %v3150_v26  ;;  %v1555_v17 = vmul.f32 %v3208_v51, %v3208_v51 }
 0x57a   :  { %v1572_v49 = vsel %vm45_vm0, %v1552_v39, 0.0  ;;  %v1581_v34 = vsel %vm45_vm0, %v1555_v17, 0.0 }
 0x57b   :  { %v1490_v21 = vpop.xlane.xlu2 %1489  ;;  %1573 = vadd.xlane.f32.xlu1 %v1572_v49  ;;  %v1484_v46 = vpop.xlane.xlu1 %1483 }
 0x57c   :  { %v1524_v6 = vmul.f32 %v1490_v21, %v2283_v20 }
 0x57e   :  { %v3200_v5 = vsub.f32 %v3106_v56, %v1524_v6 }
 0x580   :  { %v1556_v23 = vmul.f32 %v3200_v5, %v3200_v5 }
 0x582   :  { %v1584_v57 = vsel %vm45_vm0, %v1556_v23, 0.0  ;;  %v3242_v23 = vld [vmem:[%s3476_s1] ss:$0 sm:$0xff] }
 0x583   :  { %v1493_v36 = vpop.xlane.xlu2 %1492  ;;  %1495 = vadd.xlane.f32.xlu1 %v1494_v12 }
 0x584   :  { %v1525_v32 = vmul.f32 %v1493_v36, %v2283_v20 }
 0x586   :  { %v3165_v55 = vsub.f32 %v3115_v31, %v1525_v32  ;;  %v2056_v32 = vld [vmem:[%s3480_s5] sm:$0xff] }
 0x587   :  { %1430 = vrot.lane.b32.xlu0 %v1404_v7, %s2214_s20  ;;  %v1521_v7 = vmul.f32 %v1481_v37, %v2283_v20  ;;  %1905 = vmatpush.bf16.msrb.mxu1 %v2056_v32 }
 0x588   :  { %v1557_v35 = vmul.f32 %v3165_v55, %v3165_v55 }
 0x589   :  { %v3181_v52 = vsub.f32 %v3085_v41, %v1521_v7 }
 0x58a   :  { %v1587_v40 = vsel %vm45_vm0, %v1557_v35, 0.0 }
 0x58b   :  { %v1433_v14 = vpop.permute.xlu2 %1432  ;;  %1588 = vadd.xlane.f32.xlu2 %v1587_v40  ;;  %v1553_v22 = vmul.f32 %v3181_v52, %v3181_v52 }
 0x58c   :  { %v1451_v48 = vsel %vm552_vm5, %v1197_v4, %v1433_v14 }
 0x58d   :  { %v3173_v2 = vadd.f32 %v1451_v48, %v2650_v59  ;;  %v1522_v59 = vmul.f32 %v1484_v46, %v2283_v20  ;;  %v1575_v60 = vsel %vm45_vm0, %v1553_v22, 0.0 }
 0x58f   :  { %v1509_v28 = vsel %vm45_vm0, %v3173_v2, 0.0  ;;  %v3187_v29 = vsub.f32 %v3101_v27, %v1522_v59 }
 0x591   :  { %v1554_v15 = vmul.f32 %v3187_v29, %v3187_v29 }
 0x593   :  { %1510 = vadd.xlane.f32.xlu2 %v1509_v28  ;;  %v1578_v11 = vsel %vm45_vm0, %v1554_v15, 0.0 }
 0x59c   :  { %1434 = vrot.lane.b32.xlu1 %v1409_v1, %s2214_s20 }
 0x5a4   :  { %1436 = vrot.lane.b32.xlu1 %v1411_v9, %s2214_s20 }
 0x5b1   :  { %1576 = vadd.xlane.f32.xlu0 %v1575_v60 }
 0x5b9   :  { %1579 = vadd.xlane.f32.xlu0 %v1578_v11 }
 0x5c1   :  { %1501 = vadd.xlane.f32.xlu0 %v1500_v58 }
 0x5c4   :  { %v1499_v43 = vpop.xlane.xlu2 %1498 }
 0x5c5   :  { %v1527_v42 = vmul.f32 %v1499_v43, %v2283_v20 }
 0x5c7   :  { %v3212_v8 = vsub.f32 %v3124_v30, %v1527_v42 }
 0x5c9   :  { %1585 = vadd.xlane.f32.xlu0 %v1584_v57  ;;  %v1559_v19 = vmul.f32 %v3212_v8, %v3212_v8 }
 0x5cb   :  { %v1593_v53 = vsel %vm45_vm0, %v1559_v19, 0.0 }
 0x5cc   :  { %1594 = vadd.xlane.f32.xlu2 %v1593_v53 }
 0x5ce   :  { %1582 = vadd.xlane.f32.xlu1 %v1581_v34  ;;  %v1505_v34 = vpop.xlane.xlu2 %1504 }
 0x5d5   :  { %v1571_v54 = vpop.xlane.xlu1 %1570 }
 0x5d6   :  { %v1615_v18 = vmul.f32 %v1571_v54, %v2283_v20  ;;  %v1200_v54 = vpop.f32.mrf.mxu3 }
 0x5d8   :  { %v1631_v39 = vadd.f32 1e-05, %v1615_v18  ;;  %v1529_v18 = vmul.f32 %v1505_v34, %v2283_v20 }
 0x5da   :  { %2174 = vrsqrt.f32 %v1631_v39  ;;  %vm1662_vm8 = vweird.f32 %v1631_v39 }
 0x5e0   :  { %v2175_v49 = vpop.eup %2174 }
 0x5e1   :  { %v1657_v38 = vmul.f32 %v2175_v49, %v1631_v39  ;;  %vm1663_vm7 = vweird.f32 %v2175_v49 }
 0x5e2   :  { %vm1664_vm9 = vmor %vm1662_vm8, %vm1663_vm7 }
 0x5e3   :  { %v1658_v21 = vmul.f32 %v2175_v49, %v1657_v38 }
 0x5e5   :  { %v1659_v40 = vmul.f32 0.5, %v1658_v21 }
 0x5e6   :  { %v1568_v12 = vpop.xlane.xlu0 %1567 }
 0x5e7   :  { %v1614_v36 = vmul.f32 %v1568_v12, %v2283_v20  ;;  %v1660_v4 = vsub.f32 1.5, %v1659_v40  ;;  %v3264_v12 = vsub.f32 %v3130_v61, %v1529_v18 }
 0x5e9   :  { %v1630_v35 = vadd.f32 1e-05, %v1614_v36  ;;  %v1661_v28 = vmul.f32 %v2175_v49, %v1660_v4  ;;  %v1561_v4 = vmul.f32 %v3264_v12, %v3264_v12 }
 0x5eb   :  { %2176 = vrsqrt.f32 %v1630_v35  ;;  %v1665_v9 = vsel %vm1664_vm9, %v2175_v49, %v1661_v28  ;;  %vm1652_vm11 = vweird.f32 %v1630_v35  ;;  %v1599_v28 = vsel %vm45_vm0, %v1561_v4, 0.0 }
 0x5ec   :  { %v1807_v22 = vmul.f32 %v1665_v9, %v3136_v45 }
 0x5ee   :  { %v1574_v14 = vpop.xlane.xlu1 %1573 }
 0x5ef   :  { %v1616_v49 = vmul.f32 %v1574_v14, %v2283_v20 }
 0x5f1   :  { %v2177_v48 = vpop.eup %2176  ;;  %v1632_v32 = vadd.f32 1e-05, %v1616_v49 }
 0x5f2   :  { %v1647_v1 = vmul.f32 %v2177_v48, %v1630_v35  ;;  %vm1653_vm10 = vweird.f32 %v2177_v48  ;;  %v1202_v35 = vpop.f32.mrf.mxu3 }
 0x5f3   :  { %vm1654_vm12 = vmor %vm1652_vm11, %vm1653_vm10  ;;  %2178 = vrsqrt.f32 %v1632_v32  ;;  %vm1672_vm14 = vweird.f32 %v1632_v32 }
 0x5f4   :  { %v1648_v37 = vmul.f32 %v2177_v48, %v1647_v1 }
 0x5f6   :  { %v1649_v7 = vmul.f32 0.5, %v1648_v37  ;;  %v1496_v46 = vpop.xlane.xlu1 %1495 }
 0x5f7   :  { %v1526_v60 = vmul.f32 %v1496_v46, %v2283_v20 }
 0x5f8   :  { %v1650_v59 = vsub.f32 1.5, %v1649_v7 }
 0x5f9   :  { %v1431_v15 = vpop.permute.xlu0 %1430  ;;  %v3235_v43 = vsub.f32 %v3157_v25, %v1526_v60  ;;  %v2179_v1 = vpop.eup %2178 }
 0x5fa   :  { %v1651_v11 = vmul.f32 %v2177_v48, %v1650_v59  ;;  %v1450_v44 = vsel %vm552_vm5, %v3159_v24, %v1431_v15  ;;  %v1823_v24 = vmul.f32 %v3242_v23, %v1807_v22  ;;  %v1667_v37 = vmul.f32 %v2179_v1, %v1632_v32 }
 0x5fb   :  { %v3231_v6 = vadd.f32 %v1450_v44, %v2653_v47  ;;  %v1558_v19 = vmul.f32 %v3235_v43, %v3235_v43  ;;  %vm1673_vm13 = vweird.f32 %v2179_v1 }
 0x5fc   :  { %v1655_v58 = vsel %vm1654_vm12, %v2177_v48, %v1651_v11  ;;  %v1668_v9 = vmul.f32 %v2179_v1, %v1667_v37  ;;  %vm1674_vm15 = vmor %vm1672_vm14, %vm1673_vm13 }
 0x5fd   :  { %v1806_v0 = vmul.f32 %v1655_v58, %v3143_v13  ;;  %v1506_v45 = vsel %vm45_vm0, %v3231_v6, 0.0  ;;  %v3249_v13 = vld [vmem:[%s3477_s2] ss:$0 sm:$0xff]  ;;  %v1590_v53 = vsel %vm45_vm0, %v1558_v19, 0.0 }
 0x5fe   :  { %1507 = vadd.xlane.f32.xlu0 %v1506_v45  ;;  %v1839_v57 = vadd.f32 %v3249_v13, %v1823_v24  ;;  %v1669_v22 = vmul.f32 0.5, %v1668_v9  ;;  %v1589_v60 = vpop.xlane.xlu2 %1588 }
 0x5ff   :  { %v1822_v47 = vmul.f32 %v3242_v23, %v1806_v0  ;;  %v1621_v4 = vmul.f32 %v1589_v60, %v2283_v20 }
 0x600   :  { %v1670_v15 = vsub.f32 1.5, %v1669_v22 }
 0x601   :  { %v1838_v42 = vadd.f32 %v3249_v13, %v1822_v47 }
 0x602   :  { %v1671_v58 = vmul.f32 %v2179_v1, %v1670_v15 }
 0x603   :  { %v1854_v17 = vpack.c.bf16 %v1839_v57, %v1838_v42 }
 0x604   :  { %v1675_v47 = vsel %vm1674_vm15, %v2179_v1, %v1671_v58 }
 0x605   :  { %2047 = vmatmul.msk.bf16.vlgmr.msrb.gmra.mxu1 %vm45_vm0, %v1854_v17  ;;  %v1808_v34 = vmul.f32 %v1675_v47, %v3150_v26 }
 0x606   :  { %1591 = vadd.xlane.f32.xlu0 %v1590_v53  ;;  %v1511_v42 = vpop.xlane.xlu2 %1510 }
 0x60e   :  { %v1435_v39 = vpop.permute.xlu1 %1434 }
 0x60f   :  { %v1452_v38 = vsel %vm552_vm5, %v1200_v54, %v1435_v39  ;;  %v1531_v54 = vmul.f32 %v1511_v42, %v2283_v20 }
 0x610   :  { %v3261_v21 = vadd.f32 %v1452_v38, %v2674_v3 }
 0x611   :  { %v3288_v32 = vsub.f32 %v3173_v2, %v1531_v54 }
 0x612   :  { %v1512_v36 = vsel %vm45_vm0, %v3261_v21, 0.0 }
 0x613   :  { %1513 = vadd.xlane.f32.xlu0 %v1512_v36 }
 0x616   :  { %v1437_v40 = vpop.permute.xlu1 %1436 }
 0x617   :  { %v1453_v14 = vsel %vm552_vm5, %v1202_v35, %v1437_v40  ;;  %v1824_v40 = vmul.f32 %v3242_v23, %v1808_v34 }
 0x618   :  { %v3272_v48 = vadd.f32 %v1453_v14, %v2671_v50 }
 0x619   :  { %v1840_v9 = vadd.f32 %v3249_v13, %v1824_v40 }
 0x61a   :  { %v1515_v3 = vsel %vm45_vm0, %v3272_v48, 0.0 }
 0x61b   :  { %1516 = vadd.xlane.f32.xlu2 %v1515_v3  ;;  %1600 = vadd.xlane.f32.xlu0 %v1599_v28 }
 0x624   :  { %v1577_v7 = vpop.xlane.xlu0 %1576 }
 0x625   :  { %v1617_v46 = vmul.f32 %v1577_v7, %v2283_v20 }
 0x627   :  { %v1633_v59 = vadd.f32 1e-05, %v1617_v46  ;;  %v1637_v46 = vadd.f32 1e-05, %v1621_v4 }
 0x629   :  { %2180 = vrsqrt.f32 %v1633_v59  ;;  %vm1682_vm2 = vweird.f32 %v1633_v59  ;;  %vm1722_vm14 = vweird.f32 %v1637_v46 }
 0x62c   :  { %v1580_v50 = vpop.xlane.xlu0 %1579 }
 0x62d   :  { %v1618_v11 = vmul.f32 %v1580_v50, %v2283_v20 }
 0x62f   :  { %v2181_v44 = vpop.eup %2180  ;;  %v1634_v45 = vadd.f32 1e-05, %v1618_v11 }
 0x630   :  { %v1677_v0 = vmul.f32 %v2181_v44, %v1633_v59  ;;  %vm1683_vm1 = vweird.f32 %v2181_v44 }
 0x631   :  { %2182 = vrsqrt.f32 %v1634_v45  ;;  %vm1684_vm3 = vmor %vm1682_vm2, %vm1683_vm1  ;;  %vm1692_vm5 = vweird.f32 %v1634_v45 }
 0x632   :  { %v1678_v24 = vmul.f32 %v2181_v44, %v1677_v0 }
 0x634   :  { %v1679_v57 = vmul.f32 0.5, %v1678_v24  ;;  %v1502_v19 = vpop.xlane.xlu0 %1501 }
 0x635   :  { %v1528_v17 = vmul.f32 %v1502_v19, %v2283_v20 }
 0x636   :  { %v1680_v53 = vsub.f32 1.5, %v1679_v57 }
 0x637   :  { %v3283_v18 = vsub.f32 %v3196_v16, %v1528_v17  ;;  %v2183_v38 = vpop.eup %2182 }
 0x638   :  { %v1681_v39 = vmul.f32 %v2181_v44, %v1680_v53  ;;  %v1687_v3 = vmul.f32 %v2183_v38, %v1634_v45  ;;  %vm1693_vm4 = vweird.f32 %v2183_v38 }
 0x639   :  { %v1560_v49 = vmul.f32 %v3283_v18, %v3283_v18  ;;  %vm1694_vm6 = vmor %vm1692_vm5, %vm1693_vm4 }
 0x63a   :  { %v1685_v36 = vsel %vm1684_vm3, %v2181_v44, %v1681_v39  ;;  %v1688_v59 = vmul.f32 %v2183_v38, %v1687_v3 }
 0x63b   :  { %v1809_v35 = vmul.f32 %v1685_v36, %v3181_v52  ;;  %v1596_v26 = vsel %vm45_vm0, %v1560_v49, 0.0  ;;  %v1563_v52 = vmul.f32 %v3288_v32, %v3288_v32 }
 0x63c   :  { %1597 = vadd.xlane.f32.xlu1 %v1596_v26  ;;  %v1586_v14 = vpop.xlane.xlu0 %1585  ;;  %v1689_v44 = vmul.f32 0.5, %v1688_v59 }
 0x63d   :  { %v1620_v28 = vmul.f32 %v1586_v14, %v2283_v20  ;;  %v1825_v1 = vmul.f32 %v3242_v23, %v1809_v35  ;;  %v1605_v50 = vsel %vm45_vm0, %v1563_v52, 0.0 }
 0x63e   :  { %v1690_v0 = vsub.f32 1.5, %v1689_v44 }
 0x63f   :  { %v1636_v37 = vadd.f32 1e-05, %v1620_v28  ;;  %v1841_v7 = vadd.f32 %v3249_v13, %v1825_v1 }
 0x640   :  { %v1691_v19 = vmul.f32 %v2183_v38, %v1690_v0 }
 0x641   :  { %v1583_v22 = vpop.xlane.xlu1 %1582  ;;  %v1855_v15 = vpack.c.bf16 %v1841_v7, %v1840_v9  ;;  %2184 = vrsqrt.f32 %v1636_v37  ;;  %vm1712_vm12 = vweird.f32 %v1636_v37 }
 0x642   :  { %v1619_v60 = vmul.f32 %v1583_v22, %v2283_v20  ;;  %2186 = vrsqrt.f32 %v1637_v46  ;;  %v1695_v39 = vsel %vm1694_vm6, %v2183_v38, %v1691_v19 }
 0x643   :  { %2048 = vmatmul.msk.bf16.gmra.mxu1 %vm45_vm0, %v1855_v15  ;;  %v1810_v26 = vmul.f32 %v1695_v39, %v3187_v29  ;;  %v1595_v15 = vpop.xlane.xlu2 %1594 }
 0x644   :  { %v1635_v11 = vadd.f32 1e-05, %v1619_v60  ;;  %1606 = vadd.xlane.f32.xlu1 %v1605_v50 }
 0x645   :  { %v1826_v45 = vmul.f32 %v3242_v23, %v1810_v26 }
 0x646   :  { %2188 = vrsqrt.f32 %v1635_v11  ;;  %vm1702_vm8 = vweird.f32 %v1635_v11 }
 0x647   :  { %v2185_v58 = vpop.eup %2184  ;;  %v1842_v7 = vadd.f32 %v3249_v13, %v1826_v45 }
 0x648   :  { %v2187_v24 = vpop.eup %2186  ;;  %v1707_v47 = vmul.f32 %v2185_v58, %v1636_v37  ;;  %vm1713_vm10 = vweird.f32 %v2185_v58 }
 0x649   :  { %v1717_v57 = vmul.f32 %v2187_v24, %v1637_v46  ;;  %vm1723_vm11 = vweird.f32 %v2187_v24  ;;  %vm1714_vm13 = vmor %vm1712_vm12, %vm1713_vm10 }
 0x64a   :  { %v1708_v53 = vmul.f32 %v2185_v58, %v1707_v47  ;;  %vm1724_vm15 = vmor %vm1722_vm14, %vm1723_vm11 }
 0x64b   :  { %v1718_v54 = vmul.f32 %v2187_v24, %v1717_v57 }
 0x64c   :  { %v2189_v42 = vpop.eup %2188  ;;  %v1709_v36 = vmul.f32 0.5, %v1708_v53 }
 0x64d   :  { %v1697_v17 = vmul.f32 %v2189_v42, %v1635_v11  ;;  %vm1703_vm7 = vweird.f32 %v2189_v42  ;;  %v1719_v40 = vmul.f32 0.5, %v1718_v54  ;;  %v1623_v11 = vmul.f32 %v1595_v15, %v2283_v20 }
 0x64e   :  { %vm1704_vm9 = vmor %vm1702_vm8, %vm1703_vm7  ;;  %v1710_v14 = vsub.f32 1.5, %v1709_v36  ;;  %v3329_v36 = vld [vmem:[%s3481_s6] ss:$0 sm:$0xff] }
 0x64f   :  { %v1698_v34 = vmul.f32 %v2189_v42, %v1697_v17  ;;  %v1720_v1 = vsub.f32 1.5, %v1719_v40  ;;  %v1639_v0 = vadd.f32 1e-05, %v1623_v11 }
 0x650   :  { %v1711_v38 = vmul.f32 %v2185_v58, %v1710_v14 }
 0x651   :  { %v1699_v49 = vmul.f32 0.5, %v1698_v34  ;;  %v1721_v29 = vmul.f32 %v2187_v24, %v1720_v1  ;;  %2190 = vrsqrt.f32 %v1639_v0  ;;  %vm1742_vm2 = vweird.f32 %v1639_v0 }
 0x652   :  { %v1715_v22 = vsel %vm1714_vm13, %v2185_v58, %v1711_v38 }
 0x653   :  { %v1700_v35 = vsub.f32 1.5, %v1699_v49  ;;  %v1812_v60 = vmul.f32 %v1715_v22, %v3200_v5 }
 0x655   :  { %v1701_v4 = vmul.f32 %v2189_v42, %v1700_v35  ;;  %v1828_v44 = vmul.f32 %v3242_v23, %v1812_v60 }
 0x657   :  { %v1705_v3 = vsel %vm1704_vm9, %v2189_v42, %v1701_v4  ;;  %v1844_v47 = vadd.f32 %v3249_v13, %v1828_v44  ;;  %v2191_v42 = vpop.eup %2190 }
 0x658   :  { %v1811_v28 = vmul.f32 %v1705_v3, %v3208_v51  ;;  %v1725_v51 = vsel %vm1724_vm15, %v2187_v24, %v1721_v29  ;;  %v1737_v57 = vmul.f32 %v2191_v42, %v1639_v0  ;;  %vm1743_vm1 = vweird.f32 %v2191_v42 }
 0x659   :  { %v1813_v50 = vmul.f32 %v1725_v51, %v3165_v55  ;;  %vm1744_vm3 = vmor %vm1742_vm2, %vm1743_vm1 }
 0x65a   :  { %v1827_v9 = vmul.f32 %v3242_v23, %v1811_v28  ;;  %v1738_v53 = vmul.f32 %v2191_v42, %v1737_v57 }
 0x65b   :  { %v1829_v37 = vmul.f32 %v3242_v23, %v1813_v50 }
 0x65c   :  { %v1843_v52 = vadd.f32 %v3249_v13, %v1827_v9  ;;  %v1739_v49 = vmul.f32 0.5, %v1738_v53 }
 0x65d   :  { %v1845_v46 = vadd.f32 %v3249_v13, %v1829_v37 }
 0x65e   :  { %v1856_v59 = vpack.c.bf16 %v1843_v52, %v1842_v7  ;;  %v1740_v35 = vsub.f32 1.5, %v1739_v49 }
 0x65f   :  { %v1857_v58 = vpack.c.bf16 %v1845_v46, %v1844_v47 }
 0x660   :  { %2049 = vmatmul.msk.bf16.gmra.mxu1 %vm45_vm0, %v1856_v59  ;;  %v1741_v14 = vmul.f32 %v2191_v42, %v1740_v35 }
 0x662   :  { %v1745_v7 = vsel %vm1744_vm3, %v2191_v42, %v1741_v14 }
 0x663   :  { %v1815_v15 = vmul.f32 %v1745_v7, %v3212_v8 }
 0x670   :  { %2050 = vmatmul.msk.bf16.gmra.mxu1 %vm45_vm0, %v1857_v58  ;;  %v1831_v58 = vmul.f32 %v3242_v23, %v1815_v15 }
 0x671   :  { %v1508_v24 = vpop.xlane.xlu0 %1507 }
 0x672   :  { %v1530_v5 = vmul.f32 %v1508_v24, %v2283_v20 }
 0x674   :  { %v3320_v55 = vsub.f32 %v3231_v6, %v1530_v5  ;;  %v1847_v5 = vadd.f32 %v3249_v13, %v1831_v58 }
 0x676   :  { %v1562_v19 = vmul.f32 %v3320_v55, %v3320_v55 }
 0x678   :  { %v1602_v17 = vsel %vm45_vm0, %v1562_v19, 0.0 }
 0x679   :  { %1603 = vadd.xlane.f32.xlu2 %v1602_v17  ;;  %v1592_v34 = vpop.xlane.xlu0 %1591 }
 0x67a   :  { %v1622_v54 = vmul.f32 %v1592_v34, %v2283_v20 }
 0x67c   :  { %v1638_v39 = vadd.f32 1e-05, %v1622_v54 }
 0x67e   :  { %2192 = vrsqrt.f32 %v1638_v39  ;;  %vm1732_vm5 = vweird.f32 %v1638_v39 }
 0x682   :  { %v1907_v26 = vpop.f32.mrf.mxu1 }
 0x683   :  { %v1908_v40 = vadd.f32 %v3329_v36, %v1907_v26 }
 0x684   :  { %v2193_v4 = vpop.eup %2192 }
 0x685   :  { %v1727_v3 = vmul.f32 %v2193_v4, %v1638_v39  ;;  %v1947_v28 = vmax.f32 %v1908_v40, 0.0  ;;  %vm1733_vm4 = vweird.f32 %v2193_v4 }
 0x686   :  { %v1514_v45 = vpop.xlane.xlu0 %1513  ;;  %vm1734_vm6 = vmor %vm1732_vm5, %vm1733_vm4 }
 0x687   :  { %v1728_v1 = vmul.f32 %v2193_v4, %v1727_v3  ;;  %v1963_v9 = vadd.f32 %v1947_v28, %v3073_v63  ;;  %v1532_v38 = vmul.f32 %v1514_v45, %v2283_v20 }
 0x689   :  { %v1729_v52 = vmul.f32 0.5, %v1728_v1  ;;  %1979 = vst.msk [vmem:[%s3482_s7] sm:$0xff] %vm45_vm0, %v1963_v9  ;;  %v3339_v29 = vsub.f32 %v3261_v21, %v1532_v38 }
 0x68a   :  { %v1909_v59 = vpop.f32.mrf.mxu1 }
 0x68b   :  { %v1730_v22 = vsub.f32 1.5, %v1729_v52  ;;  %v1910_v51 = vadd.f32 %v3329_v36, %v1909_v59  ;;  %v1564_v63 = vmul.f32 %v3339_v29, %v3339_v29 }
 0x68d   :  { %v1731_v60 = vmul.f32 %v2193_v4, %v1730_v22  ;;  %v1948_v50 = vmax.f32 %v1910_v51, 0.0  ;;  %v1608_v11 = vsel %vm45_vm0, %v1564_v63, 0.0 }
 0x68e   :  { %v1517_v44 = vpop.xlane.xlu2 %1516  ;;  %1609 = vadd.xlane.f32.xlu0 %v1608_v11  ;;  %v1601_v19 = vpop.xlane.xlu0 %1600 }
 0x68f   :  { %v1735_v0 = vsel %vm1734_vm6, %v2193_v4, %v1731_v60  ;;  %v1964_v37 = vadd.f32 %v1948_v50, %v3066_v62  ;;  %v1533_v47 = vmul.f32 %v1517_v44, %v2283_v20  ;;  %v1625_v17 = vmul.f32 %v1601_v19, %v2283_v20 }
 0x690   :  { %v1814_v46 = vmul.f32 %v1735_v0, %v3235_v43 }
 0x691   :  { %1980 = vst.msk [vmem:[%s3482_s7 + $0x8] sm:$0xff] %vm45_vm0, %v1964_v37  ;;  %v3355_v8 = vsub.f32 %v3272_v48, %v1533_v47  ;;  %v1641_v53 = vadd.f32 1e-05, %v1625_v17 }
 0x692   :  { %v1830_v24 = vmul.f32 %v3242_v23, %v1814_v46 }
 0x693   :  { %v1565_v42 = vmul.f32 %v3355_v8, %v3355_v8  ;;  %2194 = vrsqrt.f32 %v1641_v53  ;;  %vm1762_vm8 = vweird.f32 %v1641_v53 }
 0x694   :  { %v1846_v62 = vadd.f32 %v3249_v13, %v1830_v24 }
 0x695   :  { %v1611_v43 = vsel %vm45_vm0, %v1565_v42, 0.0 }
 0x696   :  { %1612 = vadd.xlane.f32.xlu2 %v1611_v43  ;;  %v1858_v57 = vpack.c.bf16 %v1847_v5, %v1846_v62 }
 0x698   :  { %2051 = vmatmul.msk.bf16.gmra.mxu1 %vm45_vm0, %v1858_v57 }
 0x699   :  { %v2195_v34 = vpop.eup %2194 }
 0x69a   :  { %v1757_v54 = vmul.f32 %v2195_v34, %v1641_v53  ;;  %vm1763_vm7 = vweird.f32 %v2195_v34 }
 0x69b   :  { %vm1764_vm9 = vmor %vm1762_vm8, %vm1763_vm7 }
 0x69c   :  { %v1758_v39 = vmul.f32 %v2195_v34, %v1757_v54 }
 0x69e   :  { %v1759_v40 = vmul.f32 0.5, %v1758_v39 }
 0x6a0   :  { %v1760_v4 = vsub.f32 1.5, %v1759_v40 }
 0x6a2   :  { %v1761_v3 = vmul.f32 %v2195_v34, %v1760_v4 }
 0x6a4   :  { %v1765_v1 = vsel %vm1764_vm9, %v2195_v34, %v1761_v3 }
 0x6a5   :  { %v1817_v59 = vmul.f32 %v1765_v1, %v3264_v12 }
 0x6a7   :  { %v1833_v50 = vmul.f32 %v3242_v23, %v1817_v59 }
 0x6a9   :  { %v1849_v37 = vadd.f32 %v3249_v13, %v1833_v50 }
 0x6af   :  { %v1598_v49 = vpop.xlane.xlu1 %1597 }
 0x6b0   :  { %v1624_v35 = vmul.f32 %v1598_v49, %v2283_v20 }
 0x6b2   :  { %v1640_v26 = vadd.f32 1e-05, %v1624_v35 }
 0x6b4   :  { %2196 = vrsqrt.f32 %v1640_v26  ;;  %vm1752_vm11 = vweird.f32 %v1640_v26 }
 0x6b7   :  { %v1607_v46 = vpop.xlane.xlu1 %1606 }
 0x6b8   :  { %v1627_v58 = vmul.f32 %v1607_v46, %v2283_v20 }
 0x6ba   :  { %v2197_v14 = vpop.eup %2196  ;;  %v1643_v24 = vadd.f32 1e-05, %v1627_v58 }
 0x6bb   :  { %v1747_v28 = vmul.f32 %v2197_v14, %v1640_v26  ;;  %vm1753_vm10 = vweird.f32 %v2197_v14 }
 0x6bc   :  { %vm1754_vm12 = vmor %vm1752_vm11, %vm1753_vm10  ;;  %2198 = vrsqrt.f32 %v1643_v24  ;;  %vm1782_vm14 = vweird.f32 %v1643_v24 }
 0x6bd   :  { %v1748_v45 = vmul.f32 %v2197_v14, %v1747_v28 }
 0x6bf   :  { %v1749_v9 = vmul.f32 0.5, %v1748_v45 }
 0x6c0   :  { %v1912_v38 = vpop.f32.mrf.mxu1 }
 0x6c1   :  { %v1750_v7 = vsub.f32 1.5, %v1749_v9  ;;  %v1913_v52 = vadd.f32 %v3329_v36, %v1912_v38 }
 0x6c3   :  { %v1751_v22 = vmul.f32 %v2197_v14, %v1750_v7  ;;  %v1949_v51 = vmax.f32 %v1913_v52, 0.0 }
 0x6c5   :  { %v1755_v63 = vsel %vm1754_vm12, %v2197_v14, %v1751_v22  ;;  %v1965_v15 = vadd.f32 %v1949_v51, %v3082_v33 }
 0x6c6   :  { %v1816_v60 = vmul.f32 %v1755_v63, %v3283_v18 }
 0x6c7   :  { %1981 = vst.msk [vmem:[%s3482_s7 + $0x10] sm:$0xff] %vm45_vm0, %v1965_v15 }
 0x6c8   :  { %v1914_v11 = vpop.f32.mrf.mxu1  ;;  %v1832_v44 = vmul.f32 %v3242_v23, %v1816_v60 }
 0x6c9   :  { %v1915_v12 = vadd.f32 %v3329_v36, %v1914_v11 }
 0x6ca   :  { %v1848_v0 = vadd.f32 %v3249_v13, %v1832_v44 }
 0x6cb   :  { %v1950_v47 = vmax.f32 %v1915_v12, 0.0 }
 0x6cc   :  { %v1859_v33 = vpack.c.bf16 %v1849_v37, %v1848_v0 }
 0x6cd   :  { %v1966_v18 = vadd.f32 %v1950_v47, %v3085_v41  ;;  %v2199_v41 = vpop.eup %2198 }
 0x6ce   :  { %2052 = vmatmul.msk.bf16.gmra.mxu1 %vm45_vm0, %v1859_v33  ;;  %v1777_v17 = vmul.f32 %v2199_v41, %v1643_v24  ;;  %vm1783_vm13 = vweird.f32 %v2199_v41 }
 0x6cf   :  { %1982 = vst.msk [vmem:[%s3482_s7 + $0x18] sm:$0xff] %vm45_vm0, %v1966_v18  ;;  %vm1784_vm15 = vmor %vm1782_vm14, %vm1783_vm13 }
 0x6d0   :  { %v1778_v54 = vmul.f32 %v2199_v41, %v1777_v17 }
 0x6d2   :  { %v1779_v40 = vmul.f32 0.5, %v1778_v54 }
 0x6d4   :  { %v1780_v3 = vsub.f32 1.5, %v1779_v40 }
 0x6d6   :  { %v1781_v1 = vmul.f32 %v2199_v41, %v1780_v3 }
 0x6dd   :  { %v1917_v42 = vpop.f32.mrf.mxu1 }
 0x6de   :  { %v1918_v62 = vadd.f32 %v3329_v36, %v1917_v42 }
 0x6e0   :  { %v1951_v5 = vmax.f32 %v1918_v62, 0.0 }
 0x6e2   :  { %v1967_v43 = vadd.f32 %v1951_v5, %v3101_v27 }
 0x6e4   :  { %1983 = vst.msk [vmem:[%s3482_s7 + $0x20] sm:$0xff] %vm45_vm0, %v1967_v43 }
 0x6e5   :  { %v1919_v57 = vpop.f32.mrf.mxu1 }
 0x6e6   :  { %v1920_v19 = vadd.f32 %v3329_v36, %v1919_v57 }
 0x6e8   :  { %v1952_v53 = vmax.f32 %v1920_v19, 0.0 }
 0x6ea   :  { %v1968_v34 = vadd.f32 %v1952_v53, %v3090_v10 }
 0x6ec   :  { %1984 = vst.msk [vmem:[%s3482_s7 + $0x28] sm:$0xff] %vm45_vm0, %v1968_v34  ;;  %v1604_v27 = vpop.xlane.xlu2 %1603 }
 0x6ed   :  { %v1626_v39 = vmul.f32 %v1604_v27, %v2283_v20  ;;  %v1922_v49 = vpop.f32.mrf.mxu1 }
 0x6ee   :  { %v1923_v35 = vadd.f32 %v3329_v36, %v1922_v49 }
 0x6ef   :  { %v1642_v26 = vadd.f32 1e-05, %v1626_v39 }
 0x6f0   :  { %v1953_v4 = vmax.f32 %v1923_v35, 0.0 }
 0x6f1   :  { %2200 = vrsqrt.f32 %v1642_v26  ;;  %vm1772_vm2 = vweird.f32 %v1642_v26 }
 0x6f2   :  { %v1969_v14 = vadd.f32 %v1953_v4, %v3106_v56  ;;  %v1785_v56 = vsel %vm1784_vm15, %v2199_v41, %v1781_v1 }
 0x6f3   :  { %v1819_v51 = vmul.f32 %v1785_v56, %v3288_v32 }
 0x6f4   :  { %1985 = vst.msk [vmem:[%s3482_s7 + $0x30] sm:$0xff] %vm45_vm0, %v1969_v14 }
 0x6f5   :  { %v1924_v10 = vpop.f32.mrf.mxu1  ;;  %v1835_v11 = vmul.f32 %v3242_v23, %v1819_v51 }
 0x6f6   :  { %v1925_v28 = vadd.f32 %v3329_v36, %v1924_v10 }
 0x6f7   :  { %v2201_v45 = vpop.eup %2200  ;;  %v1851_v37 = vadd.f32 %v3249_v13, %v1835_v11 }
 0x6f8   :  { %v1767_v9 = vmul.f32 %v2201_v45, %v1642_v26  ;;  %v1954_v38 = vmax.f32 %v1925_v28, 0.0  ;;  %vm1773_vm1 = vweird.f32 %v2201_v45 }
 0x6f9   :  { %vm1774_vm3 = vmor %vm1772_vm2, %vm1773_vm1 }
 0x6fa   :  { %v1768_v7 = vmul.f32 %v2201_v45, %v1767_v9  ;;  %v1970_v52 = vadd.f32 %v1954_v38, %v3115_v31 }
 0x6fc   :  { %v1769_v59 = vmul.f32 0.5, %v1768_v7  ;;  %1986 = vst.msk [vmem:[%s3482_s7 + $0x38] sm:$0xff] %vm45_vm0, %v1970_v52 }
 0x6fe   :  { %v1770_v22 = vsub.f32 1.5, %v1769_v59 }
 0x700   :  { %v1771_v63 = vmul.f32 %v2201_v45, %v1770_v22 }
 0x701   :  { %v1610_v15 = vpop.xlane.xlu0 %1609 }
 0x702   :  { %v1775_v60 = vsel %vm1774_vm3, %v2201_v45, %v1771_v63  ;;  %v1628_v50 = vmul.f32 %v1610_v15, %v2283_v20 }
 0x703   :  { %v1818_v31 = vmul.f32 %v1775_v60, %v3320_v55 }
 0x704   :  { %v1644_v44 = vadd.f32 1e-05, %v1628_v50 }
 0x705   :  { %v1834_v12 = vmul.f32 %v3242_v23, %v1818_v31 }
 0x706   :  { %2202 = vrsqrt.f32 %v1644_v44  ;;  %vm1792_vm5 = vweird.f32 %v1644_v44 }
 0x707   :  { %v1850_v0 = vadd.f32 %v3249_v13, %v1834_v12 }
 0x709   :  { %v1613_v32 = vpop.xlane.xlu2 %1612  ;;  %v1860_v47 = vpack.c.bf16 %v1851_v37, %v1850_v0 }
 0x70a   :  { %v1629_v33 = vmul.f32 %v1613_v32, %v2283_v20 }
 0x70b   :  { %2053 = vmatmul.msk.bf16.gmra.mxu1 %vm45_vm0, %v1860_v47 }
 0x70c   :  { %v2203_v18 = vpop.eup %2202  ;;  %v1645_v46 = vadd.f32 1e-05, %v1629_v33 }
 0x70d   :  { %v1787_v58 = vmul.f32 %v2203_v18, %v1644_v44  ;;  %vm1793_vm4 = vweird.f32 %v2203_v18 }
 0x70e   :  { %2204 = vrsqrt.f32 %v1645_v46  ;;  %vm1794_vm6 = vmor %vm1792_vm5, %vm1793_vm4  ;;  %vm1802_vm8 = vweird.f32 %v1645_v46 }
 0x70f   :  { %v1788_v55 = vmul.f32 %v2203_v18, %v1787_v58 }
 0x711   :  { %v1789_v24 = vmul.f32 0.5, %v1788_v55 }
 0x713   :  { %v1790_v42 = vsub.f32 1.5, %v1789_v24 }
 0x714   :  { %v2205_v62 = vpop.eup %2204 }
 0x715   :  { %v1791_v5 = vmul.f32 %v2203_v18, %v1790_v42  ;;  %v1797_v43 = vmul.f32 %v2205_v62, %v1645_v46  ;;  %v1927_v41 = vpop.f32.mrf.mxu1  ;;  %vm1803_vm7 = vweird.f32 %v2205_v62 }
 0x716   :  { %v1928_v57 = vadd.f32 %v3329_v36, %v1927_v41  ;;  %vm1804_vm9 = vmor %vm1802_vm8, %vm1803_vm7 }
 0x717   :  { %v1798_v19 = vmul.f32 %v2205_v62, %v1797_v43  ;;  %v1795_v17 = vsel %vm1794_vm6, %v2203_v18, %v1791_v5 }
 0x718   :  { %v1955_v20 = vmax.f32 %v1928_v57, 0.0  ;;  %v1820_v27 = vmul.f32 %v1795_v17, %v3339_v29 }
 0x719   :  { %v1799_v53 = vmul.f32 0.5, %v1798_v19 }
 0x71a   :  { %v1971_v34 = vadd.f32 %v1955_v20, %v3157_v25  ;;  %v1836_v25 = vmul.f32 %v3242_v23, %v1820_v27 }
 0x71b   :  { %v1800_v54 = vsub.f32 1.5, %v1799_v53 }
 0x71c   :  { %1987 = vst.msk [vmem:[%s3482_s7 + $0x40] sm:$0xff] %vm45_vm0, %v1971_v34  ;;  %v1852_v3 = vadd.f32 %v3249_v13, %v1836_v25 }
 0x71d   :  { %v1801_v39 = vmul.f32 %v2205_v62, %v1800_v54  ;;  %v1929_v49 = vpop.f32.mrf.mxu1 }
 0x71e   :  { %v1930_v35 = vadd.f32 %v3329_v36, %v1929_v49 }
 0x71f   :  { %v1805_v26 = vsel %vm1804_vm9, %v2205_v62, %v1801_v39 }
 0x720   :  { %v1821_v40 = vmul.f32 %v1805_v26, %v3355_v8  ;;  %v1956_v4 = vmax.f32 %v1930_v35, 0.0 }
 0x722   :  { %v1972_v14 = vadd.f32 %v1956_v4, %v3124_v30  ;;  %v1837_v29 = vmul.f32 %v3242_v23, %v1821_v40 }
 0x724   :  { %1988 = vst.msk [vmem:[%s3482_s7 + $0x48] sm:$0xff] %vm45_vm0, %v1972_v14  ;;  %v1853_v10 = vadd.f32 %v3249_v13, %v1837_v29 }
 0x726   :  { %v1861_v28 = vpack.c.bf16 %v1853_v10, %v1852_v3 }
 0x728   :  { %2054 = vmatmul.msk.bf16.gmra.mxu1 %vm45_vm0, %v1861_v28 }
 0x74b   :  { %v1932_v8 = vpop.f32.mrf.mxu1 }
 0x74c   :  { %v1933_v45 = vadd.f32 %v3329_v36, %v1932_v8 }
 0x74e   :  { %v1957_v1 = vmax.f32 %v1933_v45, 0.0 }
 0x750   :  { %v1973_v30 = vadd.f32 %v1957_v1, %v3196_v16 }
 0x752   :  { %1989 = vst.msk [vmem:[%s3482_s7 + $0x50] sm:$0xff] %vm45_vm0, %v1973_v30 }
 0x753   :  { %v1934_v23 = vpop.f32.mrf.mxu1 }
 0x754   :  { %v1935_v9 = vadd.f32 %v3329_v36, %v1934_v23 }
 0x756   :  { %v1958_v38 = vmax.f32 %v1935_v9, 0.0 }
 0x758   :  { %v1974_v13 = vadd.f32 %v1958_v38, %v3130_v61 }
 0x75a   :  { %1990 = vst.msk [vmem:[%s3482_s7 + $0x58] sm:$0xff] %vm45_vm0, %v1974_v13 }
 0x788   :  { %v1937_v7 = vpop.f32.mrf.mxu1 }
 0x789   :  { %v1938_v52 = vadd.f32 %v3329_v36, %v1937_v7 }
 0x78b   :  { %v1959_v16 = vmax.f32 %v1938_v52, 0.0 }
 0x78d   :  { %v1975_v56 = vadd.f32 %v1959_v16, %v3231_v6 }
 0x78f   :  { %1991 = vst.msk [vmem:[%s3482_s7 + $0x60] sm:$0xff] %vm45_vm0, %v1975_v56 }
 0x790   :  { %v1939_v59 = vpop.f32.mrf.mxu1 }
 0x791   :  { %v1940_v22 = vadd.f32 %v3329_v36, %v1939_v59 }
 0x793   :  { %v1960_v61 = vmax.f32 %v1940_v22, 0.0 }
 0x795   :  { %v1976_v51 = vadd.f32 %v1960_v61, %v3173_v2 }
 0x797   :  { %1992 = vst.msk [vmem:[%s3482_s7 + $0x68] sm:$0xff] %vm45_vm0, %v1976_v51 }
 0x7a5   :  { %v1942_v63 = vpop.f32.mrf.mxu1 }
 0x7a6   :  { %v1943_v15 = vadd.f32 %v3329_v36, %v1942_v63 }
 0x7a8   :  { %v1961_v6 = vmax.f32 %v1943_v15, 0.0 }
 0x7aa   :  { %v1977_v60 = vadd.f32 %v1961_v6, %v3261_v21 }
 0x7ac   :  { %1993 = vst.msk [vmem:[%s3482_s7 + $0x70] sm:$0xff] %vm45_vm0, %v1977_v60 }
 0x7ad   :  { %v1944_v50 = vpop.f32.mrf.mxu1 }
 0x7ae   :  { %v1945_v31 = vadd.f32 %v3329_v36, %v1944_v50 }
 0x7b0   :  { %v1962_v2 = vmax.f32 %v1945_v31, 0.0 }
 0x7b2   :  { %v1978_v11 = vadd.f32 %v1962_v2, %v3272_v48 }
 0x7b4   :  { %1994 = vst.msk [vmem:[%s3482_s7 + $0x78] sm:$0xff] %vm45_vm0, %v1978_v11 }

// kernel: transformer_block_forward.5
= control target key start
LH: loop header
LB: loop body
LE: loop exit
PB: predicated region body
PF: predicated region fallthrough
CT: control target
= control target key end

     0   :  { %s784_s12 = smov 0   ;;  %s786_s13 = smov 0   ;;  %s856_s0 = inlined_call_operand.vmem [shape: bf16[2,432,64], index: 0, kind: input, shape index: {}]   ;;  %s857_s1 = inlined_call_operand.vmem [shape: bf16[4,432], index: 1, kind: input, shape index: {}]   ;;  %s858_s2 = inlined_call_operand.vmem [shape: f32[4,1], index: 2, kind: input, shape index: {}]   ;;  %s859_s3 = inlined_call_operand.vmem [shape: f32[2,4,64], index: 3, kind: output, shape index: {}]  }
   0x1   :  { %s788_s14 = smov 0  }
   0x2 LB: > { %s25_s15 = sadd.s32 1, %s757_s13  ;;  %p571_p0 = scmp.ge.s32.totalorder %s761_s14, 1  ;;  %s761_s14 = sphi %s788_s14, %s13_s14   ;;  %s757_s13 = sphi %s786_s13, %s861_s13   ;;  %s753_s12 = sphi %s784_s12, %s860_s12  }
   0x3   : > { %p27_p1 = scmp.ge.s32.totalorder %s25_s15, 2  ;;  %p156_p2 = scmp.lt.s32.totalorder %s761_s14, 3 }
   0x5   : > { %s863_s15 = smov (%p27_p1, %s25_s15), 0  ;;  %p157_p3 = pnand %p571_p0, %p156_p2 }
   0x6   : > { %p185_p4 = scmp.lt.s32.totalorder (!%p157_p3), %s753_s12, 1 }
   0x7   : > { %160 = sbr.rel (%p157_p3) target bundleno = 190 (0xbe), region = 32 }
   0xc   : > { %v201_v0 = vld [vmem:[%s857_s1] sm:$0xff]  ;;  %s865_s12 = smov (!%p185_p4, %s753_s12), 1  ;;  %v763_v7 = vmov 0   ;;  %vm433_vm0 = vcmask 392192   ;;  %vm488_vm1 = vcmask 519168  }
   0xd   : > { %263 = vst [vmem:[#allocation1] ss:$4 sm:$0xff] %v201_v0  ;;  %s712_s18 = smul.u32 216, %s865_s12  ;;  %738 = vset.pattern.permute.xlu0 %v763_v7  ;;  %v256_v13 = vld [vmem:[%s858_s2] sm:$0xf]  ;;  %s573_s24 = sshll.u32 %s865_s12, 2 }
   0xe   : > { %259 = vperm.xlu0 %738, %v256_v13   ;;  %s199_s27 = scalar_lea.vmem %s859_s3, %s573_s24 }
   0xf   : > { %s811_s21 = scalar_lea.vmem %s856_s0, %s712_s18 }
  0x10   : > { %v692_v1 = vld [vmem:[%s811_s21 + $0x38] sm:$0xff]  ;;  %v691_v4 = vld [vmem:[%s811_s21 + $0x30] sm:$0xff]  ;;  %v690_v9 = vld [vmem:[%s811_s21 + $0x28] sm:$0xff] }
  0x11   : > { %v700_v2 = vld [vmem:[%s811_s21 + $0x78] sm:$0xff]  ;;  %436 = vmatpush.bf16.msra.mxu0 %v692_v1  ;;  %v699_v5 = vld [vmem:[%s811_s21 + $0x70] sm:$0xff]  ;;  %v698_v10 = vld [vmem:[%s811_s21 + $0x68] sm:$0xff] }
  0x12   : > { %v708_v3 = vld [vmem:[%s811_s21 + $0xb8] sm:$0xff]  ;;  %449 = vmatpush.bf16.msra.mxu1 %v700_v2  ;;  %v707_v6 = vld [vmem:[%s811_s21 + $0xb0] sm:$0xff]  ;;  %v706_v11 = vld [vmem:[%s811_s21 + $0xa8] sm:$0xff] }
  0x13   : > { %462 = vmatpush.bf16.msra.mxu2 %v708_v3  ;;  %v711_v8 = vld [vmem:[%s811_s21 + $0xd0] sm:$0xff]  ;;  %v710_v12 = vld [vmem:[%s811_s21 + $0xc8] sm:$0xff]  ;;  %v689_v14 = vld [vmem:[%s811_s21 + $0x20] sm:$0xff] }
  0x14   : > { %480 = vmatpush.bf16.msra.mxu3 %v711_v8  ;;  %v697_v15 = vld [vmem:[%s811_s21 + $0x60] sm:$0xff]  ;;  %v688_v18 = vld [vmem:[%s811_s21 + $0x18] sm:$0xff]  ;;  %v687_v22 = vld [vmem:[%s811_s21 + $0x10] sm:$0xff] }
  0x15   : > { %437 = vmatpush.bf16.msra.mxu0 %v691_v4  ;;  %v705_v16 = vld [vmem:[%s811_s21 + $0xa0] sm:$0xff]  ;;  %v696_v19 = vld [vmem:[%s811_s21 + $0x58] sm:$0xff]  ;;  %v695_v23 = vld [vmem:[%s811_s21 + $0x50] sm:$0xff] }
  0x16   : > { %450 = vmatpush.bf16.msra.mxu1 %v699_v5  ;;  %v709_v17 = vld [vmem:[%s811_s21 + $0xc0] sm:$0xff]  ;;  %v704_v20 = vld [vmem:[%s811_s21 + $0x98] sm:$0xff]  ;;  %v703_v24 = vld [vmem:[%s811_s21 + $0x90] sm:$0xff] }
  0x17   : > { %463 = vmatpush.bf16.msra.mxu2 %v707_v6  ;;  %v267_v21 = vld.sshfl [vmem:[#allocation1 + $0x18] sm:$0xff pattern:$0x73625140]  ;;  %v686_v25 = vld [vmem:[%s811_s21 + $0x8] sm:$0xff]  ;;  %v685_v28 = vld [vmem:[%s811_s21] sm:$0xff] }
  0x18   : > { %481 = vmatpush.bf16.msra.mxu3 %v710_v12  ;;  %v694_v26 = vld [vmem:[%s811_s21 + $0x48] sm:$0xff]  ;;  %v693_v29 = vld [vmem:[%s811_s21 + $0x40] sm:$0xff]  ;;  %v266_v33 = vld.sshfl [vmem:[#allocation1 + $0x10] sm:$0xff pattern:$0x73625140] }
  0x19   : > { %438 = vmatpush.bf16.msra.mxu0 %v690_v9  ;;  %v702_v27 = vld [vmem:[%s811_s21 + $0x88] sm:$0xff]  ;;  %v701_v30 = vld [vmem:[%s811_s21 + $0x80] sm:$0xff] }
  0x1a   : > { %451 = vmatpush.bf16.msra.mxu1 %v698_v10  ;;  %v264_v31 = vld.sshfl [vmem:[#allocation1] sm:$0xff pattern:$0x73625140]  ;;  %v265_v32 = vld.sshfl [vmem:[#allocation1 + $0x8] sm:$0xff pattern:$0x73625140] }
  0x1b   : > { %464 = vmatpush.bf16.msra.mxu2 %v706_v11 }
  0x1c   : > { %482 = vmatpush.bf16.msra.mxu3 %v709_v17 }
  0x1d   : > { %439 = vmatpush.bf16.msra.mxu0 %v689_v14 }
  0x1e   : > { %452 = vmatpush.bf16.msra.mxu1 %v697_v15 }
  0x1f   : > { %465 = vmatpush.bf16.msra.mxu2 %v705_v16  ;;  %682 = vmatmul.msk.bf16.vlgmr.msra.gmra.mxu3 %vm433_vm0, %v267_v21 }
  0x21   : > { %440 = vmatpush.bf16.msra.mxu0 %v688_v18 }
  0x22   : > { %453 = vmatpush.bf16.msra.mxu1 %v696_v19 }
  0x23   : > { %466 = vmatpush.bf16.msra.mxu2 %v704_v20 }
  0x25   : > { %441 = vmatpush.bf16.msra.mxu0 %v687_v22 }
  0x26   : > { %454 = vmatpush.bf16.msra.mxu1 %v695_v23 }
  0x27   : > { %467 = vmatpush.bf16.msra.mxu2 %v703_v24 }
  0x29   : > { %442 = vmatpush.bf16.msra.mxu0 %v686_v25 }
  0x2a   : > { %455 = vmatpush.bf16.msra.mxu1 %v694_v26 }
  0x2b   : > { %468 = vmatpush.bf16.msra.mxu2 %v702_v27 }
  0x2d   : > { %443 = vmatpush.bf16.msra.mxu0 %v685_v28 }
  0x2e   : > { %456 = vmatpush.bf16.msra.mxu1 %v693_v29 }
  0x2f   : > { %469 = vmatpush.bf16.msra.mxu2 %v701_v30 }
  0x30   : > { %444 = vmatmul.bf16.vlgmr.msra.gmra.mxu0 %v264_v31 }
  0x31   : > { %457 = vmatmul.bf16.vlgmr.msra.gmra.mxu1 %v265_v32 }
  0x32   : > { %470 = vmatmul.bf16.vlgmr.msra.gmra.mxu2 %v266_v33 }
  0x80   : > { %v260_v35 = vpop.permute.xlu0 %259 }
  0xa2   : > { %v484_v34 = vpop.f32.mrf.mxu3 }
  0xaa   : > { %v486_v39 = vpop.f32.mrf.mxu3 }
  0xad   : > { %v445_v36 = vpop.f32.mrf.mxu0 }
  0xae   : > { %v458_v37 = vpop.f32.mrf.mxu1  ;;  %v446_v38 = vadd.f32 %v445_v36, %v260_v35 }
  0xb0   : > { %v459_v40 = vadd.f32 %v458_v37, %v446_v38 }
  0xb5   : > { %v471_v41 = vpop.f32.mrf.mxu2  ;;  %v447_v43 = vpop.f32.mrf.mxu0 }
  0xb6   : > { %v472_v42 = vadd.f32 %v471_v41, %v459_v40  ;;  %v460_v44 = vpop.f32.mrf.mxu1 }
  0xb8   : > { %v485_v45 = vadd.f32 %v484_v34, %v472_v42 }
  0xba   : > { %489 = vst.msk [vmem:[%s199_s27] sm:$0xf] %vm488_vm1, %v485_v45 }
  0xbd   : > { %v473_v46 = vpop.f32.mrf.mxu2 }
  0xbe PF: > { %s13_s14 = sadd.s32 1, %s761_s14   ;;  %s860_s12 = smov %s757_s13 }
  0xbf   : > { %p10_p5 = scmp.ge.s32.totalorder %s13_s14, 4   ;;  %s861_s13 = smov %s863_s15 }
  0xc1   :  { %12 = sbr.rel (!%p10_p5) target bundleno = 2 (0x2), region = 62 }

</bundles_post_ra>
